<compile_context>
chip_gen: v7x
topology: tpu7x:2x2x1
jax: 0.10.0
libtpu: 0.0.40
codegen_flags: <defaults>
</compile_context>

<pallas_src>
import functools

import jax
import jax.numpy as jnp
from jax.experimental import pallas as pl
from jax.experimental.pallas import tpu as pltpu


# ----------------------------------------------------------------------------- kernel


def _fourier_kan_kernel(x_ref, w_ref, bias_ref, o_ref, feat_ref, *, gridsize, inputdim):
    # x_ref:    (tn, D)          row tile of inputs
    # w_ref:    (2*G*D, to)      packed cos/sin coefficient tile
    # bias_ref: (1, to)
    # o_ref:    (tn, to)
    # feat_ref: (tn, 2*G*D)      VMEM scratch feature slab (persists across grid steps)
    D = inputdim

    # Recompute the trig features only when the O-tile index wraps back to 0
    # (j is the innermost, "arbitrary" grid axis, so this is valid per core).
    @pl.when(pl.program_id(1) == 0)
    def _build_features():
        x = x_ref[...].astype(jnp.float32)
        c1 = jnp.cos(x)
        s1 = jnp.sin(x)
        feat_ref[:, 0:D] = c1
        feat_ref[:, D:2 * D] = s1
        cg, sg = c1, s1
        for g in range(1, gridsize):
            if g % 16 == 0:
                # Re-anchor the recurrence so rounding drift stays bounded.
                ang = jnp.float32(g + 1) * x
                cg, sg = jnp.cos(ang), jnp.sin(ang)
            else:
                cg, sg = cg * c1 - sg * s1, sg * c1 + cg * s1
            feat_ref[:, 2 * g * D:(2 * g + 1) * D] = cg
            feat_ref[:, (2 * g + 1) * D:(2 * g + 2) * D] = sg

    acc = jnp.dot(feat_ref[...], w_ref[...],
                  preferred_element_type=jnp.float32,
                  precision=jax.lax.Precision.HIGHEST)
    o_ref[...] = (acc + bias_ref[...]).astype(o_ref.dtype)


# ----------------------------------------------------------------------------- wrapper


def _round_up(a, b):
    return ((a + b - 1) // b) * b


def _tpu_info():
    """(vmem_capacity_bytes, num_tensorcores) with conservative fallbacks."""
    vmem_cap = 64 << 20  # conservative default (v7x per-TC)
    num_tc = 1
    try:
        info = pltpu.get_tpu_info()
        vmem_cap = int(getattr(info, "vmem_capacity_bytes", vmem_cap))
    except Exception:
        pass
    try:
        kind = jax.devices()[0].device_kind.lower()
        if "v7" in kind or "7x" in kind:
            num_tc = 2
    except Exception:
        pass
    return vmem_cap, num_tc


def fourier_kan_forward(x, fouriercoeffs, bias, *, row_tile=None):
    """x: (..., inputdim); fouriercoeffs: (2, outdim, inputdim, gridsize); bias: (1, outdim)."""
    *lead, inputdim = x.shape
    _, outdim, in_d, gridsize = fouriercoeffs.shape
    assert in_d == inputdim

    x2 = x.reshape(-1, inputdim).astype(jnp.float32)
    n = x2.shape[0]
    k_dim = 2 * gridsize * inputdim

    vmem_cap, num_tc = _tpu_info()

    # ---------------- tiling derivation (generation-aware) ----------------
    # Lane-dense output padding; use 256 alignment when outdim > 128 so the
    # 256-wide MXU (v6e/v7x) runs full width.
    o_align = 256 if outdim > 128 else 128
    o_pad = _round_up(outdim, o_align)

    budget = max(8 << 20, int(vmem_cap * 0.5))

    def footprint_bytes(tn_, to_, w_bufs):
        return 4 * (2 * tn_ * inputdim      # x tile (double-buffered)
                    + w_bufs * k_dim * to_  # weight tile
                    + w_bufs * to_          # bias tile
                    + 2 * tn_ * to_         # output tile (double-buffered)
                    + tn_ * k_dim)          # feature scratch slab

    # O tile: keep the resident weight tile modest (mandatory on v7x 64 MiB/TC).
    w_budget = min(12 << 20, budget // 2)
    to = o_pad
    while to > o_align and 4 * k_dim * to > w_budget:
        to = _round_up(to // 2, o_align)
    o_tiles = o_pad // to

    # Row tile: large to amortize the ~0.35 us per-grid-step overhead; chips with
    # 128 MiB VMEM (v5e/v6e) can afford 1024-row tiles.
    n8 = _round_up(max(n, 1), 8)
    tn_target = 1024 if vmem_cap >= (96 << 20) else 512
    if row_tile is not None:
        tn_target = row_tile
    tn = _round_up(min(tn_target, n8), 8)
    while tn > 8 and footprint_bytes(tn, to, 2) > budget:
        tn = _round_up(tn // 2, 8)

    # Only split a single row tile into >= 2 grid steps when the chip actually has
    # 2 TensorCores (v7x); on v5e/v6e the grid is a sequential loop.
    if num_tc >= 2 and n8 >= 16 and tn >= n8:
        tn = _round_up(n8 // 2, 8)
    n_pad = _round_up(n8, tn)

    if n_pad != n:
        x2 = jnp.pad(x2, ((0, n_pad - n), (0, 0)))

    # ---------------- pack coefficients into a single (2*G*D, O_pad) RHS ----------------
    # Row layout matches the kernel's feature column order:
    #   [cos_1 (D rows), sin_1 (D rows), cos_2, sin_2, ..., cos_G, sin_G]
    ccos = jnp.transpose(fouriercoeffs[0], (2, 1, 0)).astype(jnp.float32)  # (G, D, O)
    csin = jnp.transpose(fouriercoeffs[1], (2, 1, 0)).astype(jnp.float32)  # (G, D, O)
    w = jnp.stack([ccos, csin], axis=1).reshape(k_dim, outdim)             # (2*G*D, O)
    bias2 = bias.reshape(1, outdim).astype(jnp.float32)
    if o_pad != outdim:
        w = jnp.pad(w, ((0, 0), (0, o_pad - outdim)))
        bias2 = jnp.pad(bias2, ((0, 0), (0, o_pad - outdim)))

    kernel = functools.partial(_fourier_kan_kernel, gridsize=gridsize, inputdim=inputdim)

    cost = pl.CostEstimate(
        flops=2 * n_pad * k_dim * o_pad,
        transcendentals=2 * n_pad * inputdim,
        bytes_accessed=(n_pad * inputdim * 4 + k_dim * o_pad * 4
                        + o_pad * 4 + n_pad * o_pad * 4),
    )

    vmem_limit = int(min(int(vmem_cap * 0.9),
                         max(footprint_bytes(tn, to, 2) + (4 << 20), 16 << 20)))

    def run(single_buffer_consts):
        # When the O axis is not tiled, the weight/bias blocks never change, so
        # request single buffering to halve their VMEM residency.
        const_kwargs = {"pipeline_mode": pl.Buffered(1)} if single_buffer_consts else {}
        grid_spec = pltpu.PrefetchScalarGridSpec(
            num_scalar_prefetch=0,
            grid=(n_pad // tn, o_tiles),
            in_specs=[
                pl.BlockSpec((tn, inputdim), lambda i, j: (i, 0)),
                pl.BlockSpec((k_dim, to), lambda i, j: (0, j), **const_kwargs),
                pl.BlockSpec((1, to), lambda i, j: (0, j), **const_kwargs),
            ],
            out_specs=pl.BlockSpec((tn, to), lambda i, j: (i, j)),
            scratch_shapes=[pltpu.VMEM((tn, k_dim), jnp.float32)],
        )
        return pl.pallas_call(
            kernel,
            out_shape=jax.ShapeDtypeStruct((n_pad, o_pad), jnp.float32),
            grid_spec=grid_spec,
            compiler_params=pltpu.CompilerParams(
                dimension_semantics=("parallel", "arbitrary"),
                vmem_limit_bytes=vmem_limit),
            cost_estimate=cost,
        )(x2, w, bias2)

    if o_tiles == 1:
        try:
            y = jax.block_until_ready(run(True))
        except Exception:
            # Fall back to default (double) buffering if single-buffering the
            # constant blocks is rejected by this JAX/Mosaic version.
            y = run(False)
    else:
        y = run(False)

    y = y[:n, :outdim]
    return y.reshape(*lead, outdim)


# ----------------------------------------------------------------------------- reference


def fourier_kan_reference(x, fouriercoeffs, bias):
    """Pure-JAX reference mirroring the PyTorch forward exactly."""
    *lead, inputdim = x.shape
    _, outdim, _, gridsize = fouriercoeffs.shape
    x2 = x.reshape(-1, inputdim)
    k = jnp.arange(1, gridsize + 1, dtype=jnp.float32).reshape(1, 1, 1, gridsize)
    xr = x2.reshape(x2.shape[0], 1, inputdim, 1)
    c = jnp.cos(k * xr)
    s = jnp.sin(k * xr)
    y = jnp.sum(c * fouriercoeffs[0:1], axis=(-2, -1))
    y = y + jnp.sum(s * fouriercoeffs[1:2], axis=(-2, -1))
    y = y + bias
    return y.reshape(*lead, outdim)


if __name__ == "__main__":
    # Module config (synthetic, deterministic init — no checkpoint).
    inputdim, outdim, gridsize = 32, 16, 8
    batch, seq = 2, 8

    key = jax.random.PRNGKey(0)
    k_coef, k_x = jax.random.split(key)

    # torch.randn(2, outdim, inputdim, gridsize) / (sqrt(inputdim) * sqrt(gridsize))
    grid_norm_factor = jnp.sqrt(jnp.float32(gridsize))  # smooth_initialization=False
    fouriercoeffs = (jax.random.normal(k_coef, (2, outdim, inputdim, gridsize),
                                       dtype=jnp.float32)
                     / (jnp.sqrt(jnp.float32(inputdim)) * grid_norm_factor))
    bias = jnp.zeros((1, outdim), jnp.float32)  # addbias=True

    x = jax.random.normal(k_x, (batch, seq, inputdim), dtype=jnp.float32)

    y = fourier_kan_forward(x, fouriercoeffs, bias)
    y = jax.block_until_ready(y)

    y_ref = fourier_kan_reference(x, fouriercoeffs, bias)
    assert y.shape == (batch, seq, outdim)
    assert jnp.allclose(y, y_ref, atol=1e-4, rtol=1e-4), "mismatch vs reference"

    print("KERNEL_OK")
</pallas_src>

<mosaic_0001>
module attributes {stable_mosaic.version = 11 : i64} {
  func.func @_fourier_kan_kernel(%arg0: i32, %arg1: i32, %arg2: memref<16x32xf32, #tpu.memory_space<vmem>>, %arg3: memref<512x128xf32, #tpu.memory_space<vmem>>, %arg4: memref<1x128xf32, #tpu.memory_space<vmem>>, %arg5: memref<16x128xf32, #tpu.memory_space<vmem>>, %arg6: memref<16x512xf32, #tpu.memory_space<vmem>>) attributes {dimension_semantics = [#tpu.dimension_semantics<parallel>, #tpu.dimension_semantics<arbitrary>], iteration_bounds = array<i64: 1, 1>, scalar_prefetch = 0 : i64, scratch_operands = 1 : i64, tpu.core_type = #tpu.core_type<tc>, window_params = [{transform_indices = @transform_0, window_bounds = array<i64: 16, 32>}, {pipeline_mode = #tpu.pipeline_mode<synchronous>, transform_indices = @transform_1, window_bounds = array<i64: 512, 128>}, {pipeline_mode = #tpu.pipeline_mode<synchronous>, transform_indices = @transform_2, window_bounds = array<i64: 1, 128>}, {transform_indices = @transform_3, window_bounds = array<i64: 16, 128>}]} {
    %c0_i32 = arith.constant 0 : i32
    %0 = arith.cmpi eq, %arg1, %c0_i32 : i32
    %1 = arith.extui %0 : i1 to i32
    %c0_i32_0 = arith.constant 0 : i32
    %2 = arith.cmpi ne, %1, %c0_i32_0 : i32
    scf.if %2 {
      %c0_8 = arith.constant 0 : index
      %c0_9 = arith.constant 0 : index
      %10 = vector.load %arg2[%c0_8, %c0_9] : memref<16x32xf32, #tpu.memory_space<vmem>>, vector<16x32xf32>
      %11 = math.cos %10 : vector<16x32xf32>
      %12 = math.sin %10 : vector<16x32xf32>
      %c0_10 = arith.constant 0 : index
      %c0_11 = arith.constant 0 : index
      %13 = vector.load %arg6[%c0_10, %c0_11] : memref<16x512xf32, #tpu.memory_space<vmem>>, vector<16x32xf32>
      tpu.vector_store %arg6[%c0_10, %c0_11], %11 {strides = array<i32>} : memref<16x512xf32, #tpu.memory_space<vmem>>, vector<16x32xf32>,
      %c0_12 = arith.constant 0 : index
      %c32 = arith.constant 32 : index
      %14 = vector.load %arg6[%c0_12, %c32] : memref<16x512xf32, #tpu.memory_space<vmem>>, vector<16x32xf32>
      tpu.vector_store %arg6[%c0_12, %c32], %12 {strides = array<i32>} : memref<16x512xf32, #tpu.memory_space<vmem>>, vector<16x32xf32>,
      %15 = arith.mulf %11, %11 : vector<16x32xf32>
      %16 = arith.mulf %12, %12 : vector<16x32xf32>
      %17 = arith.subf %15, %16 : vector<16x32xf32>
      %18 = arith.mulf %12, %11 : vector<16x32xf32>
      %19 = arith.mulf %11, %12 : vector<16x32xf32>
      %20 = arith.addf %18, %19 : vector<16x32xf32>
      %c0_13 = arith.constant 0 : index
      %c64 = arith.constant 64 : index
      %21 = vector.load %arg6[%c0_13, %c64] : memref<16x512xf32, #tpu.memory_space<vmem>>, vector<16x32xf32>
      tpu.vector_store %arg6[%c0_13, %c64], %17 {strides = array<i32>} : memref<16x512xf32, #tpu.memory_space<vmem>>, vector<16x32xf32>,
      %c0_14 = arith.constant 0 : index
      %c96 = arith.constant 96 : index
      %22 = vector.load %arg6[%c0_14, %c96] : memref<16x512xf32, #tpu.memory_space<vmem>>, vector<16x32xf32>
      tpu.vector_store %arg6[%c0_14, %c96], %20 {strides = array<i32>} : memref<16x512xf32, #tpu.memory_space<vmem>>, vector<16x32xf32>,
      %23 = arith.mulf %17, %11 : vector<16x32xf32>
      %24 = arith.mulf %20, %12 : vector<16x32xf32>
      %25 = arith.subf %23, %24 : vector<16x32xf32>
      %26 = arith.mulf %20, %11 : vector<16x32xf32>
      %27 = arith.mulf %17, %12 : vector<16x32xf32>
      %28 = arith.addf %26, %27 : vector<16x32xf32>
      %c0_15 = arith.constant 0 : index
      %c128 = arith.constant 128 : index
      %29 = vector.load %arg6[%c0_15, %c128] : memref<16x512xf32, #tpu.memory_space<vmem>>, vector<16x32xf32>
      tpu.vector_store %arg6[%c0_15, %c128], %25 {strides = array<i32>} : memref<16x512xf32, #tpu.memory_space<vmem>>, vector<16x32xf32>,
      %c0_16 = arith.constant 0 : index
      %c160 = arith.constant 160 : index
      %30 = vector.load %arg6[%c0_16, %c160] : memref<16x512xf32, #tpu.memory_space<vmem>>, vector<16x32xf32>
      tpu.vector_store %arg6[%c0_16, %c160], %28 {strides = array<i32>} : memref<16x512xf32, #tpu.memory_space<vmem>>, vector<16x32xf32>,
      %31 = arith.mulf %25, %11 : vector<16x32xf32>
      %32 = arith.mulf %28, %12 : vector<16x32xf32>
      %33 = arith.subf %31, %32 : vector<16x32xf32>
      %34 = arith.mulf %28, %11 : vector<16x32xf32>
      %35 = arith.mulf %25, %12 : vector<16x32xf32>
      %36 = arith.addf %34, %35 : vector<16x32xf32>
      %c0_17 = arith.constant 0 : index
      %c192 = arith.constant 192 : index
      %37 = vector.load %arg6[%c0_17, %c192] : memref<16x512xf32, #tpu.memory_space<vmem>>, vector<16x32xf32>
      tpu.vector_store %arg6[%c0_17, %c192], %33 {strides = array<i32>} : memref<16x512xf32, #tpu.memory_space<vmem>>, vector<16x32xf32>,
      %c0_18 = arith.constant 0 : index
      %c224 = arith.constant 224 : index
      %38 = vector.load %arg6[%c0_18, %c224] : memref<16x512xf32, #tpu.memory_space<vmem>>, vector<16x32xf32>
      tpu.vector_store %arg6[%c0_18, %c224], %36 {strides = array<i32>} : memref<16x512xf32, #tpu.memory_space<vmem>>, vector<16x32xf32>,
      %39 = arith.mulf %33, %11 : vector<16x32xf32>
      %40 = arith.mulf %36, %12 : vector<16x32xf32>
      %41 = arith.subf %39, %40 : vector<16x32xf32>
      %42 = arith.mulf %36, %11 : vector<16x32xf32>
      %43 = arith.mulf %33, %12 : vector<16x32xf32>
      %44 = arith.addf %42, %43 : vector<16x32xf32>
      %c0_19 = arith.constant 0 : index
      %c256 = arith.constant 256 : index
      %45 = vector.load %arg6[%c0_19, %c256] : memref<16x512xf32, #tpu.memory_space<vmem>>, vector<16x32xf32>
      tpu.vector_store %arg6[%c0_19, %c256], %41 {strides = array<i32>} : memref<16x512xf32, #tpu.memory_space<vmem>>, vector<16x32xf32>,
      %c0_20 = arith.constant 0 : index
      %c288 = arith.constant 288 : index
      %46 = vector.load %arg6[%c0_20, %c288] : memref<16x512xf32, #tpu.memory_space<vmem>>, vector<16x32xf32>
      tpu.vector_store %arg6[%c0_20, %c288], %44 {strides = array<i32>} : memref<16x512xf32, #tpu.memory_space<vmem>>, vector<16x32xf32>,
      %47 = arith.mulf %41, %11 : vector<16x32xf32>
      %48 = arith.mulf %44, %12 : vector<16x32xf32>
      %49 = arith.subf %47, %48 : vector<16x32xf32>
      %50 = arith.mulf %44, %11 : vector<16x32xf32>
      %51 = arith.mulf %41, %12 : vector<16x32xf32>
      %52 = arith.addf %50, %51 : vector<16x32xf32>
      %c0_21 = arith.constant 0 : index
      %c320 = arith.constant 320 : index
      %53 = vector.load %arg6[%c0_21, %c320] : memref<16x512xf32, #tpu.memory_space<vmem>>, vector<16x32xf32>
      tpu.vector_store %arg6[%c0_21, %c320], %49 {strides = array<i32>} : memref<16x512xf32, #tpu.memory_space<vmem>>, vector<16x32xf32>,
      %c0_22 = arith.constant 0 : index
      %c352 = arith.constant 352 : index
      %54 = vector.load %arg6[%c0_22, %c352] : memref<16x512xf32, #tpu.memory_space<vmem>>, vector<16x32xf32>
      tpu.vector_store %arg6[%c0_22, %c352], %52 {strides = array<i32>} : memref<16x512xf32, #tpu.memory_space<vmem>>, vector<16x32xf32>,
      %55 = arith.mulf %49, %11 : vector<16x32xf32>
      %56 = arith.mulf %52, %12 : vector<16x32xf32>
      %57 = arith.subf %55, %56 : vector<16x32xf32>
      %58 = arith.mulf %52, %11 : vector<16x32xf32>
      %59 = arith.mulf %49, %12 : vector<16x32xf32>
      %60 = arith.addf %58, %59 : vector<16x32xf32>
      %c0_23 = arith.constant 0 : index
      %c384 = arith.constant 384 : index
      %61 = vector.load %arg6[%c0_23, %c384] : memref<16x512xf32, #tpu.memory_space<vmem>>, vector<16x32xf32>
      tpu.vector_store %arg6[%c0_23, %c384], %57 {strides = array<i32>} : memref<16x512xf32, #tpu.memory_space<vmem>>, vector<16x32xf32>,
      %c0_24 = arith.constant 0 : index
      %c416 = arith.constant 416 : index
      %62 = vector.load %arg6[%c0_24, %c416] : memref<16x512xf32, #tpu.memory_space<vmem>>, vector<16x32xf32>
      tpu.vector_store %arg6[%c0_24, %c416], %60 {strides = array<i32>} : memref<16x512xf32, #tpu.memory_space<vmem>>, vector<16x32xf32>,
      %63 = arith.mulf %57, %11 : vector<16x32xf32>
      %64 = arith.mulf %60, %12 : vector<16x32xf32>
      %65 = arith.subf %63, %64 : vector<16x32xf32>
      %66 = arith.mulf %60, %11 : vector<16x32xf32>
      %67 = arith.mulf %57, %12 : vector<16x32xf32>
      %68 = arith.addf %66, %67 : vector<16x32xf32>
      %c0_25 = arith.constant 0 : index
      %c448 = arith.constant 448 : index
      %69 = vector.load %arg6[%c0_25, %c448] : memref<16x512xf32, #tpu.memory_space<vmem>>, vector<16x32xf32>
      tpu.vector_store %arg6[%c0_25, %c448], %65 {strides = array<i32>} : memref<16x512xf32, #tpu.memory_space<vmem>>, vector<16x32xf32>,
      %c0_26 = arith.constant 0 : index
      %c480 = arith.constant 480 : index
      %70 = vector.load %arg6[%c0_26, %c480] : memref<16x512xf32, #tpu.memory_space<vmem>>, vector<16x32xf32>
      tpu.vector_store %arg6[%c0_26, %c480], %68 {strides = array<i32>} : memref<16x512xf32, #tpu.memory_space<vmem>>, vector<16x32xf32>,
    } else {
    }
    %c0 = arith.constant 0 : index
    %c0_1 = arith.constant 0 : index
    %3 = vector.load %arg6[%c0, %c0_1] : memref<16x512xf32, #tpu.memory_space<vmem>>, vector<16x512xf32>
    %c0_2 = arith.constant 0 : index
    %c0_3 = arith.constant 0 : index
    %4 = vector.load %arg3[%c0_2, %c0_3] : memref<512x128xf32, #tpu.memory_space<vmem>>, vector<512x128xf32>
    %cst = arith.constant dense<0.000000e+00> : vector<16x128xf32>
    %5 = tpu.matmul %3, %4, %cst {dimension_numbers = #tpu.dot_dimension_numbers<[1], [0], [0], [1], [0, 0, 1, 1], [], []>, precision = #tpu.contract_precision<fp32>} : vector<16x512xf32>, vector<512x128xf32>, vector<16x128xf32> -> vector<16x128xf32>
    %c0_4 = arith.constant 0 : index
    %c0_5 = arith.constant 0 : index
    %6 = vector.load %arg4[%c0_4, %c0_5] : memref<1x128xf32, #tpu.memory_space<vmem>>, vector<1x128xf32>
    %7 = vector.broadcast %6 : vector<1x128xf32> to vector<16x128xf32>
    %8 = arith.addf %5, %7 : vector<16x128xf32>
    %c0_6 = arith.constant 0 : index
    %c0_7 = arith.constant 0 : index
    %9 = vector.load %arg5[%c0_6, %c0_7] : memref<16x128xf32, #tpu.memory_space<vmem>>, vector<16x128xf32>
    tpu.vector_store %arg5[%c0_6, %c0_7], %8 {strides = array<i32>} : memref<16x128xf32, #tpu.memory_space<vmem>>, vector<16x128xf32>,
    return
  }
  func.func @transform_0(%arg0: i32, %arg1: i32) -> (i32, i32) {
    %c0_i32 = arith.constant 0 : i32
    %c0_i32_0 = arith.constant 0 : i32
    return %arg0, %c0_i32 : i32, i32
  }
  func.func @transform_1(%arg0: i32, %arg1: i32) -> (i32, i32) {
    %c0_i32 = arith.constant 0 : i32
    %c0_i32_0 = arith.constant 0 : i32
    return %c0_i32, %arg1 : i32, i32
  }
  func.func @transform_2(%arg0: i32, %arg1: i32) -> (i32, i32) {
    %c0_i32 = arith.constant 0 : i32
    %c0_i32_0 = arith.constant 0 : i32
    return %c0_i32, %arg1 : i32, i32
  }
  func.func @transform_3(%arg0: i32, %arg1: i32) -> (i32, i32) {
    %c0_i32 = arith.constant 0 : i32
    return %arg0, %arg1 : i32, i32
  }
}

module attributes {stable_mosaic.version = 11 : i64} {
  func.func @_fourier_kan_kernel(%arg0: i32, %arg1: i32, %arg2: memref<16x32xf32, #tpu.memory_space<vmem>>, %arg3: memref<512x128xf32, #tpu.memory_space<vmem>>, %arg4: memref<1x128xf32, #tpu.memory_space<vmem>>, %arg5: memref<16x128xf32, #tpu.memory_space<vmem>>, %arg6: memref<16x512xf32, #tpu.memory_space<vmem>>) attributes {dimension_semantics = [#tpu.dimension_semantics<parallel>, #tpu.dimension_semantics<arbitrary>], iteration_bounds = array<i64: 1, 1>, scalar_prefetch = 0 : i64, scratch_operands = 1 : i64, tpu.core_type = #tpu.core_type<tc>, window_params = [{transform_indices = @transform_0, window_bounds = array<i64: 16, 32>}, {transform_indices = @transform_1, window_bounds = array<i64: 512, 128>}, {transform_indices = @transform_2, window_bounds = array<i64: 1, 128>}, {transform_indices = @transform_3, window_bounds = array<i64: 16, 128>}]} {
    %c0_i32 = arith.constant 0 : i32
    %0 = arith.cmpi eq, %arg1, %c0_i32 : i32
    %1 = arith.extui %0 : i1 to i32
    %c0_i32_0 = arith.constant 0 : i32
    %2 = arith.cmpi ne, %1, %c0_i32_0 : i32
    scf.if %2 {
      %c0_8 = arith.constant 0 : index
      %c0_9 = arith.constant 0 : index
      %10 = vector.load %arg2[%c0_8, %c0_9] : memref<16x32xf32, #tpu.memory_space<vmem>>, vector<16x32xf32>
      %11 = math.cos %10 : vector<16x32xf32>
      %12 = math.sin %10 : vector<16x32xf32>
      %c0_10 = arith.constant 0 : index
      %c0_11 = arith.constant 0 : index
      %13 = vector.load %arg6[%c0_10, %c0_11] : memref<16x512xf32, #tpu.memory_space<vmem>>, vector<16x32xf32>
      tpu.vector_store %arg6[%c0_10, %c0_11], %11 {strides = array<i32>} : memref<16x512xf32, #tpu.memory_space<vmem>>, vector<16x32xf32>,
      %c0_12 = arith.constant 0 : index
      %c32 = arith.constant 32 : index
      %14 = vector.load %arg6[%c0_12, %c32] : memref<16x512xf32, #tpu.memory_space<vmem>>, vector<16x32xf32>
      tpu.vector_store %arg6[%c0_12, %c32], %12 {strides = array<i32>} : memref<16x512xf32, #tpu.memory_space<vmem>>, vector<16x32xf32>,
      %15 = arith.mulf %11, %11 : vector<16x32xf32>
      %16 = arith.mulf %12, %12 : vector<16x32xf32>
      %17 = arith.subf %15, %16 : vector<16x32xf32>
      %18 = arith.mulf %12, %11 : vector<16x32xf32>
      %19 = arith.mulf %11, %12 : vector<16x32xf32>
      %20 = arith.addf %18, %19 : vector<16x32xf32>
      %c0_13 = arith.constant 0 : index
      %c64 = arith.constant 64 : index
      %21 = vector.load %arg6[%c0_13, %c64] : memref<16x512xf32, #tpu.memory_space<vmem>>, vector<16x32xf32>
      tpu.vector_store %arg6[%c0_13, %c64], %17 {strides = array<i32>} : memref<16x512xf32, #tpu.memory_space<vmem>>, vector<16x32xf32>,
      %c0_14 = arith.constant 0 : index
      %c96 = arith.constant 96 : index
      %22 = vector.load %arg6[%c0_14, %c96] : memref<16x512xf32, #tpu.memory_space<vmem>>, vector<16x32xf32>
      tpu.vector_store %arg6[%c0_14, %c96], %20 {strides = array<i32>} : memref<16x512xf32, #tpu.memory_space<vmem>>, vector<16x32xf32>,
      %23 = arith.mulf %17, %11 : vector<16x32xf32>
      %24 = arith.mulf %20, %12 : vector<16x32xf32>
      %25 = arith.subf %23, %24 : vector<16x32xf32>
      %26 = arith.mulf %20, %11 : vector<16x32xf32>
      %27 = arith.mulf %17, %12 : vector<16x32xf32>
      %28 = arith.addf %26, %27 : vector<16x32xf32>
      %c0_15 = arith.constant 0 : index
      %c128 = arith.constant 128 : index
      %29 = vector.load %arg6[%c0_15, %c128] : memref<16x512xf32, #tpu.memory_space<vmem>>, vector<16x32xf32>
      tpu.vector_store %arg6[%c0_15, %c128], %25 {strides = array<i32>} : memref<16x512xf32, #tpu.memory_space<vmem>>, vector<16x32xf32>,
      %c0_16 = arith.constant 0 : index
      %c160 = arith.constant 160 : index
      %30 = vector.load %arg6[%c0_16, %c160] : memref<16x512xf32, #tpu.memory_space<vmem>>, vector<16x32xf32>
      tpu.vector_store %arg6[%c0_16, %c160], %28 {strides = array<i32>} : memref<16x512xf32, #tpu.memory_space<vmem>>, vector<16x32xf32>,
      %31 = arith.mulf %25, %11 : vector<16x32xf32>
      %32 = arith.mulf %28, %12 : vector<16x32xf32>
      %33 = arith.subf %31, %32 : vector<16x32xf32>
      %34 = arith.mulf %28, %11 : vector<16x32xf32>
      %35 = arith.mulf %25, %12 : vector<16x32xf32>
      %36 = arith.addf %34, %35 : vector<16x32xf32>
      %c0_17 = arith.constant 0 : index
      %c192 = arith.constant 192 : index
      %37 = vector.load %arg6[%c0_17, %c192] : memref<16x512xf32, #tpu.memory_space<vmem>>, vector<16x32xf32>
      tpu.vector_store %arg6[%c0_17, %c192], %33 {strides = array<i32>} : memref<16x512xf32, #tpu.memory_space<vmem>>, vector<16x32xf32>,
      %c0_18 = arith.constant 0 : index
      %c224 = arith.constant 224 : index
      %38 = vector.load %arg6[%c0_18, %c224] : memref<16x512xf32, #tpu.memory_space<vmem>>, vector<16x32xf32>
      tpu.vector_store %arg6[%c0_18, %c224], %36 {strides = array<i32>} : memref<16x512xf32, #tpu.memory_space<vmem>>, vector<16x32xf32>,
      %39 = arith.mulf %33, %11 : vector<16x32xf32>
      %40 = arith.mulf %36, %12 : vector<16x32xf32>
      %41 = arith.subf %39, %40 : vector<16x32xf32>
      %42 = arith.mulf %36, %11 : vector<16x32xf32>
      %43 = arith.mulf %33, %12 : vector<16x32xf32>
      %44 = arith.addf %42, %43 : vector<16x32xf32>
      %c0_19 = arith.constant 0 : index
      %c256 = arith.constant 256 : index
      %45 = vector.load %arg6[%c0_19, %c256] : memref<16x512xf32, #tpu.memory_space<vmem>>, vector<16x32xf32>
      tpu.vector_store %arg6[%c0_19, %c256], %41 {strides = array<i32>} : memref<16x512xf32, #tpu.memory_space<vmem>>, vector<16x32xf32>,
      %c0_20 = arith.constant 0 : index
      %c288 = arith.constant 288 : index
      %46 = vector.load %arg6[%c0_20, %c288] : memref<16x512xf32, #tpu.memory_space<vmem>>, vector<16x32xf32>
      tpu.vector_store %arg6[%c0_20, %c288], %44 {strides = array<i32>} : memref<16x512xf32, #tpu.memory_space<vmem>>, vector<16x32xf32>,
      %47 = arith.mulf %41, %11 : vector<16x32xf32>
      %48 = arith.mulf %44, %12 : vector<16x32xf32>
      %49 = arith.subf %47, %48 : vector<16x32xf32>
      %50 = arith.mulf %44, %11 : vector<16x32xf32>
      %51 = arith.mulf %41, %12 : vector<16x32xf32>
      %52 = arith.addf %50, %51 : vector<16x32xf32>
      %c0_21 = arith.constant 0 : index
      %c320 = arith.constant 320 : index
      %53 = vector.load %arg6[%c0_21, %c320] : memref<16x512xf32, #tpu.memory_space<vmem>>, vector<16x32xf32>
      tpu.vector_store %arg6[%c0_21, %c320], %49 {strides = array<i32>} : memref<16x512xf32, #tpu.memory_space<vmem>>, vector<16x32xf32>,
      %c0_22 = arith.constant 0 : index
      %c352 = arith.constant 352 : index
      %54 = vector.load %arg6[%c0_22, %c352] : memref<16x512xf32, #tpu.memory_space<vmem>>, vector<16x32xf32>
      tpu.vector_store %arg6[%c0_22, %c352], %52 {strides = array<i32>} : memref<16x512xf32, #tpu.memory_space<vmem>>, vector<16x32xf32>,
      %55 = arith.mulf %49, %11 : vector<16x32xf32>
      %56 = arith.mulf %52, %12 : vector<16x32xf32>
      %57 = arith.subf %55, %56 : vector<16x32xf32>
      %58 = arith.mulf %52, %11 : vector<16x32xf32>
      %59 = arith.mulf %49, %12 : vector<16x32xf32>
      %60 = arith.addf %58, %59 : vector<16x32xf32>
      %c0_23 = arith.constant 0 : index
      %c384 = arith.constant 384 : index
      %61 = vector.load %arg6[%c0_23, %c384] : memref<16x512xf32, #tpu.memory_space<vmem>>, vector<16x32xf32>
      tpu.vector_store %arg6[%c0_23, %c384], %57 {strides = array<i32>} : memref<16x512xf32, #tpu.memory_space<vmem>>, vector<16x32xf32>,
      %c0_24 = arith.constant 0 : index
      %c416 = arith.constant 416 : index
      %62 = vector.load %arg6[%c0_24, %c416] : memref<16x512xf32, #tpu.memory_space<vmem>>, vector<16x32xf32>
      tpu.vector_store %arg6[%c0_24, %c416], %60 {strides = array<i32>} : memref<16x512xf32, #tpu.memory_space<vmem>>, vector<16x32xf32>,
      %63 = arith.mulf %57, %11 : vector<16x32xf32>
      %64 = arith.mulf %60, %12 : vector<16x32xf32>
      %65 = arith.subf %63, %64 : vector<16x32xf32>
      %66 = arith.mulf %60, %11 : vector<16x32xf32>
      %67 = arith.mulf %57, %12 : vector<16x32xf32>
      %68 = arith.addf %66, %67 : vector<16x32xf32>
      %c0_25 = arith.constant 0 : index
      %c448 = arith.constant 448 : index
      %69 = vector.load %arg6[%c0_25, %c448] : memref<16x512xf32, #tpu.memory_space<vmem>>, vector<16x32xf32>
      tpu.vector_store %arg6[%c0_25, %c448], %65 {strides = array<i32>} : memref<16x512xf32, #tpu.memory_space<vmem>>, vector<16x32xf32>,
      %c0_26 = arith.constant 0 : index
      %c480 = arith.constant 480 : index
      %70 = vector.load %arg6[%c0_26, %c480] : memref<16x512xf32, #tpu.memory_space<vmem>>, vector<16x32xf32>
      tpu.vector_store %arg6[%c0_26, %c480], %68 {strides = array<i32>} : memref<16x512xf32, #tpu.memory_space<vmem>>, vector<16x32xf32>,
    } else {
    }
    %c0 = arith.constant 0 : index
    %c0_1 = arith.constant 0 : index
    %3 = vector.load %arg6[%c0, %c0_1] : memref<16x512xf32, #tpu.memory_space<vmem>>, vector<16x512xf32>
    %c0_2 = arith.constant 0 : index
    %c0_3 = arith.constant 0 : index
    %4 = vector.load %arg3[%c0_2, %c0_3] : memref<512x128xf32, #tpu.memory_space<vmem>>, vector<512x128xf32>
    %cst = arith.constant dense<0.000000e+00> : vector<16x128xf32>
    %5 = tpu.matmul %3, %4, %cst {dimension_numbers = #tpu.dot_dimension_numbers<[1], [0], [0], [1], [0, 0, 1, 1], [], []>, precision = #tpu.contract_precision<fp32>} : vector<16x512xf32>, vector<512x128xf32>, vector<16x128xf32> -> vector<16x128xf32>
    %c0_4 = arith.constant 0 : index
    %c0_5 = arith.constant 0 : index
    %6 = vector.load %arg4[%c0_4, %c0_5] : memref<1x128xf32, #tpu.memory_space<vmem>>, vector<1x128xf32>
    %7 = vector.broadcast %6 : vector<1x128xf32> to vector<16x128xf32>
    %8 = arith.addf %5, %7 : vector<16x128xf32>
    %c0_6 = arith.constant 0 : index
    %c0_7 = arith.constant 0 : index
    %9 = vector.load %arg5[%c0_6, %c0_7] : memref<16x128xf32, #tpu.memory_space<vmem>>, vector<16x128xf32>
    tpu.vector_store %arg5[%c0_6, %c0_7], %8 {strides = array<i32>} : memref<16x128xf32, #tpu.memory_space<vmem>>, vector<16x128xf32>,
    return
  }
  func.func @transform_0(%arg0: i32, %arg1: i32) -> (i32, i32) {
    %c0_i32 = arith.constant 0 : i32
    %c0_i32_0 = arith.constant 0 : i32
    return %arg0, %c0_i32 : i32, i32
  }
  func.func @transform_1(%arg0: i32, %arg1: i32) -> (i32, i32) {
    %c0_i32 = arith.constant 0 : i32
    %c0_i32_0 = arith.constant 0 : i32
    return %c0_i32, %arg1 : i32, i32
  }
  func.func @transform_2(%arg0: i32, %arg1: i32) -> (i32, i32) {
    %c0_i32 = arith.constant 0 : i32
    %c0_i32_0 = arith.constant 0 : i32
    return %c0_i32, %arg1 : i32, i32
  }
  func.func @transform_3(%arg0: i32, %arg1: i32) -> (i32, i32) {
    %c0_i32 = arith.constant 0 : i32
    return %arg0, %arg1 : i32, i32
  }
}

</mosaic_0001>

<bundles_post_ra>
// kernel: tpu_custom_call.1
= control target key start
LH: loop header
LB: loop body
LE: loop exit
PB: predicated region body
PF: predicated region fallthrough
CT: control target
= control target key end

     0   :  { %8 = vsyncpa [#allocation4], 0  ;;  %s5389_s0 = inlined_call_operand.hbm [shape: f32[16,32], index: 0, kind: input, shape index: {}]   ;;  %s5390_s1 = inlined_call_operand.hbm [shape: f32[512,128], index: 1, kind: input, shape index: {}]   ;;  %s5391_s2 = inlined_call_operand.vmem [shape: f32[1,128], index: 2, kind: input, shape index: {}]   ;;  %s5392_s3 = inlined_call_operand.hbm [shape: f32[16,128], index: 3, kind: output, shape index: {}]  }
   0x1   :  { %9 = vsyncpa [#allocation7], 0 }
   0x2   :  { %10 = vsyncpa [#allocation5], 0  ;;  %s3571_s12 = smov [#allocation3]   ;;  %s3499_s16 = scalar_lea.hbm %s5389_s0, 256 }
   0x3   :  { %s16_s13 = sshll.u32 %s3571_s12, 4  ;;  %p3500_p0 = scmp.ne.s32.totalorder %s5389_s0, %s3499_s16  ;;  %s17_s13 = int_to_ptr.vmem [resolvable:$true] %s16_s13 }
   0x4   :  { %p3503_p1 = scmp.lt.u32.totalorder %s3499_s16, %s5389_s0 }
   0x6   :  { %p3505_p2 = pnand %p3503_p1, %p3500_p0 }
   0x8   :  { %3508 = shalt.err (!%p3505_p2)
}
   0x9   :  { %s3509_s21 = scalar_lea.vmem %s17_s13, 256  ;;  %p3514_p4 = scmp.lt.s32.totalorder %s17_s13, %s17_s13 }
   0xa   :  { %p3510_p3 = scmp.ne.s32.totalorder %s17_s13, %s3509_s21  ;;  %p3515_p5 = scmp.lt.s32.totalorder %s3509_s21, %s3509_s21 }
   0xc   :  { %p3516_p6 = por %p3515_p5, %p3514_p4 }
   0xe   :  { %p3517_p7 = pnand %p3516_p6, %p3510_p3 }
  0x10   :  { %3520 = shalt.err (!%p3517_p7)
}
  0x11   :  { %s3572_s22 = smov 128   ;;  %s3573_s23 = smov 8  }
  0x12   :  { %22 = dma.hbm_to_vmem [thread:$0]  %s5389_s0, 256, %s17_s13, [#allocation4], %s3572_s22, %s3572_s22, %s3573_s23  }
  0x13   :  { %s3574_s26 = smov [#allocation6]   ;;  %s3521_s30 = scalar_lea.hbm %s5390_s1, 8192 }
  0x14   :  { %s28_s27 = sshll.u32 %s3574_s26, 4  ;;  %p3522_p8 = scmp.ne.s32.totalorder %s5390_s1, %s3521_s30  ;;  %s29_s27 = int_to_ptr.vmem [resolvable:$true] %s28_s27 }
  0x15   :  { %p3525_p9 = scmp.lt.u32.totalorder %s3521_s30, %s5390_s1 }
  0x17   :  { %p3527_p10 = pnand %p3525_p9, %p3522_p8 }
  0x19   :  { %3530 = shalt.err (!%p3527_p10)
}
  0x1a   :  { %s3531_s8 = scalar_lea.vmem %s29_s27, 8192  ;;  %p3536_p12 = scmp.lt.s32.totalorder %s29_s27, %s29_s27 }
  0x1b   :  { %p3532_p11 = scmp.ne.s32.totalorder %s29_s27, %s3531_s8  ;;  %p3537_p13 = scmp.lt.s32.totalorder %s3531_s8, %s3531_s8 }
  0x1d   :  { %p3538_p0 = por %p3537_p13, %p3536_p12 }
  0x1f   :  { %p3539_p1 = pnand %p3538_p0, %p3532_p11 }
  0x21   :  { %3542 = shalt.err (!%p3539_p1)
}
  0x22   :  { %34 = dma.hbm_to_vmem [thread:$0]  %s5390_s1, 8192, %s29_s27, [#allocation7], %s3572_s22, %s3572_s22, %s3573_s23  }
  0x23   :  { %3565 = dma.done.wait [#allocation4], 256  }
  0x24   :  { %3566 = vsyncadd [#allocation4], 4294967040 }
  0x25   :  { %3567 = dma.done.wait [#allocation7], 8192  }
  0x26   :  { %3568 = vsyncadd [#allocation7], 4294959104  ;;  %v3635_v0 = vld [vmem:[#allocation3] sm:$0xff]  ;;  %v3637_v1 = vld [vmem:[#allocation3 + $0x8] sm:$0xff]  ;;  %v3575_v47 = vmov 683565275  }
  0x27   :  { %v3639_v2 = vld [vmem:[#allocation6 + $0x80] sm:$0xff]  ;;  %v49_v3 = vand.u32 2147483647, %v3635_v0  ;;  %v52_v4 = vand.u32 2139095040, %v3635_v0  ;;  %v3643_v5 = vld [vmem:[#allocation6 + $0x88] sm:$0xff]  ;;  %v155_v7 = vand.u32 2139095040, %v3637_v1 }
  0x28   :  { %v152_v6 = vand.u32 2147483647, %v3637_v1  ;;  %v3647_v8 = vld [vmem:[#allocation6] sm:$0xff]  ;;  %v805_v11 = vand.u32 4294901760, %v3639_v2  ;;  %v3652_v12 = vld [vmem:[#allocation6 + $0x8] sm:$0xff]  ;;  %v808_v15 = vand.u32 4294901760, %v3643_v5 }
  0x29   :  { %v53_v9 = vshrl.u32 %v52_v4, 23  ;;  %v56_v10 = vand.u32 8388607, %v49_v3  ;;  %v156_v13 = vshrl.u32 %v155_v7, 23  ;;  %v757_v19 = vand.u32 4294901760, %v3647_v8  ;;  %v3675_v27 = vld [vmem:[#allocation6 + $0x90] sm:$0xff] }
  0x2a   :  { %v159_v14 = vand.u32 8388607, %v152_v6  ;;  %v3660_v18 = vsub.f32 %v3639_v2, %v805_v11  ;;  %v3666_v22 = vsub.f32 %v3643_v5, %v808_v15  ;;  %v760_v23 = vand.u32 4294901760, %v3652_v12  ;;  %v3787_v5 = vld [vmem:[#allocation6 + $0xa0] sm:$0xff]  ;;  %s3581_s1 = smov 32   ;;  %s3582_s10 = smov 64  }
  0x2b   :  { %v2612_v16 = vadd.s32 4294967169, %v53_v9  ;;  %v57_v17 = vor.u32 8388608, %v56_v10  ;;  %v2616_v20 = vadd.s32 4294967169, %v156_v13  ;;  %v3673_v26 = vsub.f32 %v3647_v8, %v757_v19  ;;  %s3583_s11 = smov 96  }
  0x2c   :  { %v160_v21 = vor.u32 8388608, %v159_v14  ;;  %v5407_v25 = vand.u32 4294901760, %v3660_v18  ;;  %v5403_v30 = vand.u32 4294901760, %v3666_v22  ;;  %v3683_v31 = vsub.f32 %v3652_v12, %v760_v23 }
  0x2d   :  { %v59_v24 = vadd.s32 1, %v2612_v16  ;;  %v3677_v28 = vshll.u32 %v57_v17, 8  ;;  %v162_v29 = vadd.s32 1, %v2616_v20  ;;  %v5393_v34 = vand.u32 4294901760, %v3673_v26 }
  0x2e   :  { %v3685_v32 = vshll.u32 %v160_v21, 8  ;;  %v3690_v33 = vsub.f32 %v3660_v18, %v5407_v25  ;;  %v3696_v36 = vsub.f32 %v3666_v22, %v5403_v30  ;;  %v811_v37 = vand.u32 4294901760, %v3675_v27  ;;  %v3979_v30 = vld [vmem:[#allocation6 + $0x48] sm:$0xff] }
  0x2f   :  { %vm60_vm0 = vcmp.gt.s32.totalorder %v59_v24, 0  ;;  %vm163_vm1 = vcmp.gt.s32.totalorder %v162_v29, 0  ;;  %v5402_v41 = vand.u32 4294901760, %v3683_v31  ;;  %v3576_v49 = vmov 2475754826  }
  0x30   :  { %v61_v35 = vsel %vm60_vm0, %v59_v24, 0  ;;  %v164_v40 = vsel %vm163_vm1, %v162_v29, 0  ;;  %v1000_v44 = vand.u32 4294901760, %v3690_v33  ;;  %v1007_v45 = vand.u32 4294901760, %v3696_v36  ;;  %v3755_v36 = vld [vmem:[#allocation6 + $0x10] sm:$0xff] }
  0x31   :  { %v62_v38 = vshrl.u32 %v61_v35, 5  ;;  %v63_v39 = vand.u32 31, %v61_v35  ;;  %v3700_v42 = vshrl.u32 %v164_v40, 5  ;;  %v166_v43 = vand.u32 31, %v164_v40 }
  0x32   :  { %v3577_v51 = vmov 2131351028   ;;  %v3578_v53 = vmov 2102212464   ;;  %v3579_v55 = vmov 920167782   ;;  %v3707_v57 = vsub.f32 %v3673_v26, %v5393_v34 }
  0x33   :  { %v64_v46 = vsub.s32 32, %v63_v39  ;;  %v66_v48 = vshll.u32 %v3575_v47, %v63_v39  ;;  %v69_v50 = vshll.u32 %v3576_v49, %v63_v39  ;;  %v72_v52 = vshll.u32 %v3577_v51, %v63_v39 }
  0x34   :  { %v75_v54 = vshll.u32 %v3578_v53, %v63_v39  ;;  %v78_v56 = vshll.u32 %v3579_v55, %v63_v39  ;;  %vm81_vm2 = vcmp.lt.s32.totalorder %v62_v38, 1  ;;  %v3580_v63 = vmov 1326507024  }
  0x35   :  { %v65_v58 = vshrl.u32 %v3575_v47, %v64_v46  ;;  %v67_v59 = vshrl.u32 %v3576_v49, %v64_v46  ;;  %v70_v60 = vshrl.u32 %v3577_v51, %v64_v46  ;;  %v73_v61 = vshrl.u32 %v3578_v53, %v64_v46 }
  0x36   :  { %v76_v62 = vshrl.u32 %v3579_v55, %v64_v46  ;;  %v79_v4 = vshrl.u32 %v3580_v63, %v64_v46  ;;  %vm82_vm3 = vcmp.lt.s32.totalorder %v62_v38, 2  ;;  %vm84_vm4 = vcmp.lt.s32.totalorder %v62_v38, 4 }
  0x37   :  { %v68_v7 = vor.u32 %v67_v59, %v66_v48  ;;  %v71_v9 = vor.u32 %v70_v60, %v69_v50  ;;  %v74_v10 = vor.u32 %v73_v61, %v72_v52  ;;  %v167_v13 = vsub.s32 32, %v166_v43 }
  0x38   :  { %v77_v14 = vor.u32 %v76_v62, %v75_v54  ;;  %v80_v16 = vor.u32 %v79_v4, %v78_v56  ;;  %vm83_vm5 = vcmp.lt.s32.totalorder %v62_v38, 3  ;;  %v169_v17 = vshll.u32 %v3575_v47, %v166_v43 }
  0x39   :  { %v85_v20 = vsel %vm81_vm2, %v65_v58, %v68_v7  ;;  %v86_v21 = vsel %vm84_vm4, %v74_v10, 2102212464  ;;  %v89_v24 = vsel %vm81_vm2, %v68_v7, %v71_v9  ;;  %v93_v29 = vsel %vm81_vm2, %v71_v9, %v74_v10 }
  0x3a   :  { %v87_v35 = vsel %vm83_vm5, %v71_v9, %v86_v21  ;;  %v90_v39 = vsel %vm84_vm4, %v77_v14, 920167782  ;;  %v94_v40 = vsel %vm84_vm4, %v80_v16, 1326507024  ;;  %v172_v46 = vshll.u32 %v3576_v49, %v166_v43 }
  0x3b   :  { %v91_v34 = vsel %vm83_vm5, %v74_v10, %v90_v39  ;;  %v95_v48 = vsel %vm83_vm5, %v77_v14, %v94_v40  ;;  %v168_v50 = vshrl.u32 %v3575_v47, %v167_v13  ;;  %v170_v52 = vshrl.u32 %v3576_v49, %v167_v13 }
  0x3c   :  { %v88_v54 = vsel %vm82_vm3, %v85_v20, %v87_v35  ;;  %v92_v56 = vsel %vm82_vm3, %v89_v24, %v91_v34  ;;  %v96_v59 = vsel %vm82_vm3, %v93_v29, %v95_v48  ;;  %v173_v58 = vshrl.u32 %v3577_v51, %v167_v13 }
  0x3d   :  { %v3716_v60 = vmul.u32.u64.low %v3677_v28, %v96_v59  ;;  %v3717_v61 = vmul.u32.u64.high %v3677_v28, %v96_v59, %v3716_v60  ;;  %v3720_v62 = vmul.u32.u64.low %v3677_v28, %v92_v56  ;;  %v3721_v4 = vmul.u32.u64.high %v3677_v28, %v92_v56, %v3720_v62 }
  0x3e   :  { %v171_v7 = vor.u32 %v170_v52, %v169_v17  ;;  %v174_v9 = vor.u32 %v173_v58, %v172_v46  ;;  %v175_v47 = vshll.u32 %v3577_v51, %v166_v43  ;;  %v176_v49 = vshrl.u32 %v3578_v53, %v167_v13  ;;  %v3741_v52 = vld [vmem:[#allocation6 + $0x98] sm:$0xff] }
  0x3f   :  { %v178_v10 = vshll.u32 %v3578_v53, %v166_v43  ;;  %v179_v14 = vshrl.u32 %v3579_v55, %v167_v13  ;;  %v181_v16 = vshll.u32 %v3579_v55, %v166_v43  ;;  %v182_v34 = vshrl.u32 %v3580_v63, %v167_v13 }
  0x40   :  { %v104_v38 = vmul.u32 %v3677_v28, %v88_v54  ;;  %v177_v20 = vor.u32 %v176_v49, %v175_v47  ;;  %vm184_vm6 = vcmp.lt.s32.totalorder %v3700_v42, 1  ;;  %vm185_vm7 = vcmp.lt.s32.totalorder %v3700_v42, 2 }
  0x41   :  { %vm106_vm8 = vc.u32 %v3717_v61, %v3720_v62  ;;  %v107_v21 = vadd.s32 1, %v3721_v4  ;;  %v180_v17 = vor.u32 %v179_v14, %v178_v10  ;;  %vm186_vm9 = vcmp.lt.s32.totalorder %v3700_v42, 3 }
  0x42   :  { %v183_v51 = vor.u32 %v182_v34, %v181_v16  ;;  %vm187_vm10 = vcmp.lt.s32.totalorder %v3700_v42, 4  ;;  %v188_v43 = vsel %vm184_vm6, %v168_v50, %v171_v7  ;;  %v192_v53 = vsel %vm184_vm6, %v171_v7, %v174_v9 }
  0x43   :  { %v108_v28 = vsel %vm106_vm8, %v107_v21, %v3721_v4  ;;  %v189_v55 = vsel %vm187_vm10, %v177_v20, 2102212464  ;;  %v193_v63 = vsel %vm187_vm10, %v180_v17, 920167782  ;;  %v196_v13 = vsel %vm184_vm6, %v174_v9, %v177_v20 }
  0x44   :  { %v109_v24 = vadd.s32 %v108_v28, %v104_v38  ;;  %v190_v29 = vsel %vm186_vm9, %v174_v9, %v189_v55  ;;  %v194_v35 = vsel %vm186_vm9, %v177_v20, %v193_v63  ;;  %v197_v39 = vsel %vm187_vm10, %v183_v51, 1326507024  ;;  %v3766_v9 = vld [vmem:[#allocation6 + $0x18] sm:$0xff] }
  0x45   :  { %v191_v40 = vsel %vm185_vm7, %v188_v43, %v190_v29  ;;  %v195_v46 = vsel %vm185_vm7, %v192_v53, %v194_v35  ;;  %v198_v48 = vsel %vm186_vm9, %v180_v17, %v197_v39  ;;  %v3117_v50 = vpack.c.bf16 %v1007_v45, %v1000_v44 }
  0x46   :  { %v110_v54 = vadd.s32 536870912, %v109_v24  ;;  %v199_v56 = vsel %vm185_vm7, %v196_v13, %v198_v48  ;;  %v3746_v59 = vmul.u32.u64.low %v3685_v32, %v195_v46  ;;  %v3747_v58 = vmul.u32.u64.high %v3685_v32, %v195_v46, %v3746_v59 }
  0x47   :  { %v3751_v60 = vmul.u32.u64.low %v3685_v32, %v199_v56  ;;  %v3752_v4 = vmul.u32.u64.high %v3685_v32, %v199_v56, %v3751_v60  ;;  %3118 = vmatprep.subr.bf16.mxu1 %v3117_v50  ;;  %v888_v33 = vand.u32 4294901760, %v3707_v57  ;;  %v894_v42 = vsub.f32 %v3683_v31, %v5402_v41 }
  0x48   :  { %v111_v44 = vshrl.u32 %v110_v54, 30  ;;  %v814_v45 = vand.u32 4294901760, %v3741_v52  ;;  %v3764_v7 = vsub.f32 %v3675_v27, %v811_v37  ;;  %v207_v47 = vmul.u32 %v3685_v32, %v191_v40  ;;  %v3809_v40 = vld [vmem:[#allocation6 + $0xa8] sm:$0xff] }
  0x49   :  { %v3773_v57 = vpack.c.bf16 %v808_v15, %v805_v11  ;;  %v210_v10 = vadd.s32 1, %v3747_v58  ;;  %v895_v14 = vand.u32 4294901760, %v894_v42  ;;  %v763_v16 = vand.u32 4294901760, %v3755_v36 }
  0x4a   :  { %v112_v49 = vshll.u32 %v111_v44, 30  ;;  %vm209_vm11 = vc.u32 %v3752_v4, %v3746_v59  ;;  %v5401_v34 = vand.u32 4294901760, %v3764_v7  ;;  %v3783_v32 = vsub.f32 %v3741_v52, %v814_v45 }
  0x4b   :  { %v766_v2 = vand.u32 4294901760, %v3766_v9  ;;  %3086 = vmatprep.subr.bf16.mxu0 %v3773_v57  ;;  %v211_v15 = vsel %vm209_vm11, %v210_v10, %v3747_v58  ;;  %v3119_v38 = vpack.c.bf16 %v895_v14, %v888_v33  ;;  %v3797_v43 = vsub.f32 %v3755_v36, %v763_v16 }
  0x4c   :  { %v113_v11 = vsub.s32 %v109_v24, %v112_v49  ;;  %v212_v20 = vadd.s32 %v211_v15, %v207_v47  ;;  %v1013_v21 = vsub.f32 %v3764_v7, %v5401_v34  ;;  %v5400_v17 = vand.u32 4294901760, %v3783_v32 }
  0x4d   :  { %3120 = vmatpush3.bf16.msra.mxu1 %v3119_v38  ;;  %5525 = vst [vmem:[#allocation12_spill] sm:$0xff] %v3797_v43  ;;  %v817_v53 = vand.u32 4294901760, %v3787_v5  ;;  %v3806_v63 = vsub.f32 %v3766_v9, %v766_v2  ;;  %v5399_v39 = vand.u32 4294901760, %v3797_v43  ;;  %v135_v54 = vsub.s32 4, %v111_v44 }
  0x4e   :  { %v115_v51 = vsub.s32 0, %v113_v11  ;;  %v213_v28 = vadd.s32 536870912, %v212_v20  ;;  %v1020_v55 = vsub.f32 %v3783_v32, %v5400_v17  ;;  %v1014_v24 = vand.u32 4294901760, %v1013_v21 }
  0x4f   :  { %5526 = vst [vmem:[#allocation13_spill] sm:$0xff] %v3806_v63  ;;  %v5397_v48 = vand.u32 4294901760, %v3806_v63  ;;  %v3815_v50 = vsub.f32 %v3787_v5, %v817_v53  ;;  %v901_v33 = vsub.f32 %v3797_v43, %v5399_v39  ;;  %v820_v42 = vand.u32 4294901760, %v3809_v40 }
  0x50   :  { %v2613_v13 = vmin.u32 %v115_v51, %v113_v11  ;;  %v214_v29 = vshrl.u32 %v213_v28, 30  ;;  %v1021_v35 = vand.u32 4294901760, %v1020_v55  ;;  %vm51_vm12 = vcmp.lt.s32.totalorder %v3635_v0, 0 }
  0x51   :  { %5527 = vst [vmem:[#allocation14_spill] sm:$0xff] %v3815_v50  ;;  %v908_v49 = vsub.f32 %v3806_v63, %v5397_v48  ;;  %v5395_v10 = vand.u32 4294901760, %v3815_v50  ;;  %v105_v14 = vadd.s32 %v3720_v62, %v3717_v61  ;;  %v902_v15 = vand.u32 4294901760, %v901_v33  ;;  %v3915_v48 = vld [vmem:[#allocation6 + $0x38] sm:$0xff] }
  0x52   :  { %v117_v46 = vclz %v2613_v13  ;;  %v215_v56 = vshll.u32 %v214_v29, 30  ;;  %v3121_v60 = vpack.c.bf16 %v1021_v35, %v1014_v24  ;;  %v3834_v38 = vpack.c.bf16 %v760_v23, %v757_v19  ;;  %v3849_v23 = vld [vmem:[#allocation6 + $0x20] sm:$0xff] }
  0x53   :  { %v136_v21 = vsel %vm51_vm12, %v135_v54, %v111_v44  ;;  %v909_v28 = vand.u32 4294901760, %v908_v49  ;;  %v3842_v61 = vsub.f32 %v3809_v40, %v820_v42  ;;  %v1027_v19 = vsub.f32 %v3815_v50, %v5395_v10 }
  0x54   :  { %v2614_v58 = vadd.s32 4294967294, %v117_v46  ;;  %v3822_v47 = vsub.s32 %v212_v20, %v215_v56  ;;  %3122 = vmatprep.subr.bf16.mxu1 %v3121_v60  ;;  %3088 = vmatpush3.bf16.msra.mxu0 %v3834_v38  ;;  %vm3853_vm14 = vcmp.le.f32.partialorder %v49_v3, 0.7853982  ;;  %vm154_vm15 = vcmp.lt.s32.totalorder %v3637_v1, 0  ;;  %v3860_v56 = vld [vmem:[#allocation6 + $0x28] sm:$0xff] }
  0x55   :  { %5528 = vst [vmem:[#allocation15_spill] sm:$0xff] %v3842_v61  ;;  %v3123_v12 = vpack.c.bf16 %v909_v28, %v902_v15  ;;  %v138_v35 = vsel %vm3853_vm14, 0, %v136_v21  ;;  %v238_v54 = vsub.s32 4, %v214_v29  ;;  %v5394_v33 = vand.u32 4294901760, %v3842_v61 }
  0x56   :  { %vm2615_vm13 = vcmp.lt.s32.totalorder %v2614_v58, 0  ;;  %v218_v51 = vsub.s32 0, %v3822_v47  ;;  %v769_v3 = vand.u32 4294901760, %v3849_v23  ;;  %vm3866_vm0 = vcmp.le.f32.partialorder %v152_v6, 0.7853982 }
  0x57   :  { %v120_v20 = vsel %vm2615_vm13, 0, %v2614_v58  ;;  %3124 = vmatpush3.bf16.msra.mxu1 %v3123_v12  ;;  %v1034_v28 = vsub.f32 %v3842_v61, %v5394_v33  ;;  %v239_v6 = vsel %vm154_vm15, %v238_v54, %v214_v29  ;;  %v5411_v62 = vand.u32 4294901760, %v3915_v48 }
  0x58   :  { %v121_v55 = vsub.s32 32, %v120_v20  ;;  %v122_v13 = vshll.u32 %v113_v11, %v120_v20  ;;  %v125_v24 = vsub.s32 4294967266, %v120_v20  ;;  %v2617_v8 = vmin.u32 %v218_v51, %v3822_v47 }
  0x59   :  { %v1028_v20 = vand.u32 4294901760, %v1027_v19  ;;  %v241_v54 = vsel %vm3866_vm0, 0, %v239_v6  ;;  %v3965_v41 = vpack.c.bf16 %v814_v45, %v811_v37  ;;  %vm141_vm8 = vweird.f32 %v3635_v0 }
  0x5a   :  { %v123_v44 = vshrl.u32 %v105_v14, %v121_v55  ;;  %v126_v11 = vadd.s32 127, %v125_v24  ;;  %v220_v46 = vclz %v2617_v8  ;;  %v208_v14 = vadd.s32 %v3746_v59, %v3752_v4 }
  0x5b   :  { %v772_v55 = vand.u32 4294901760, %v3860_v56  ;;  %v3881_v24 = vsub.f32 %v3849_v23, %v769_v3  ;;  %v1035_v8 = vand.u32 4294901760, %v1034_v28  ;;  %vm463_vm9 = vcmask 261120   ;;  %3090 = vmatprep.subr.bf16.mxu0 %v3965_v41 }
  0x5c   :  { %v124_v58 = vor.u32 %v123_v44, %v122_v13  ;;  %v127_v60 = vshll.u32 %v126_v11, 23  ;;  %v2618_v15 = vadd.s32 4294967294, %v220_v46  ;;  %v348_v13 = vadd.s32 3, %v138_v35 }
  0x5d   :  { %5533 = vst [vmem:[#allocation16_spill] sm:$0xff] %v3881_v24  ;;  %v3886_v12 = vsub.f32 %v3860_v56, %v772_v55  ;;  %v5396_v46 = vand.u32 4294901760, %v3881_v24  ;;  %v4050_v5 = vpack.c.bf16 %v772_v55, %v769_v3 }
  0x5e   :  { %v128_v21 = vor.u32 4788187, %v127_v60  ;;  %v131_v51 = vcvt.s32.f32 %v124_v58  ;;  %vm2619_vm1 = vcmp.lt.s32.totalorder %v2618_v15, 0  ;;  %v3125_v58 = vpack.c.bf16 %v1035_v8, %v1028_v20  ;;  %v3907_v8 = vld [vmem:[#allocation6 + $0xb8] sm:$0xff] }
  0x5f   :  { %v223_v4 = vsel %vm2619_vm1, 0, %v2618_v15  ;;  %5534 = vst [vmem:[#allocation17_spill] sm:$0xff] %v3886_v12  ;;  %v5398_v60 = vand.u32 4294901760, %v3886_v12  ;;  %v3893_v15 = vand.u32 3, %v138_v35  ;;  %v915_v33 = vsub.f32 %v3881_v24, %v5396_v46  ;;  %v3913_v46 = vld [vmem:[#allocation6 + $0x30] sm:$0xff]  ;;  %5537 = vst [vmem:[#allocation20_spill] sm:$0xff] %v4050_v5 }
  0x60   :  { %v129_v59 = vand.u32 2147483647, %v128_v21  ;;  %v224_v19 = vsub.s32 32, %v223_v4  ;;  %v225_v44 = vshll.u32 %v3822_v47, %v223_v4  ;;  %v228_v11 = vsub.s32 4294967266, %v223_v4  ;;  %3126 = vmatprep.subr.bf16.mxu1 %v3125_v58 }
  0x61   :  { %v3898_v47 = vand.u32 3, %v348_v13  ;;  %v3900_v4 = vand.u32 3, %v241_v54  ;;  %v922_v20 = vsub.f32 %v3886_v12, %v5398_v60  ;;  %v452_v35 = vadd.s32 3, %v241_v54  ;;  %v3947_v60 = vld [vmem:[#allocation6 + $0x40] sm:$0xff] }
  0x62   :  { %v132_v29 = vmul.f32 %v131_v51, %v129_v59  ;;  %v226_v21 = vshrl.u32 %v208_v14, %v224_v19  ;;  %v229_v28 = vadd.s32 127, %v228_v11  ;;  %v916_v59 = vand.u32 4294901760, %v915_v33  ;;  %v3905_v14 = vld [vmem:[#allocation6 + $0xb0] sm:$0xff] }
  0x63   :  { %v923_v13 = vand.u32 4294901760, %v922_v20  ;;  %v823_v11 = vand.u32 4294901760, %v3905_v14  ;;  %v5417_v58 = vand.u32 4294901760, %v3907_v8  ;;  %vm147_vm2 = vcmp.eq.s32.totalorder %v3893_v15, 2 }
  0x64   :  { %v133_v10 = vxor.u32 2147483648, %v132_v29  ;;  %v227_v51 = vor.u32 %v226_v21, %v225_v44  ;;  %v230_v6 = vshll.u32 %v229_v28, 23  ;;  %v5415_v21 = vand.u32 4294901760, %v3913_v46 }
  0x65   :  { %v3127_v28 = vpack.c.bf16 %v923_v13, %v916_v59  ;;  %v3939_v59 = vld [vmem:[#allocation6 + $0xc8] sm:$0xff]  ;;  %vm354_vm3 = vcmp.eq.s32.totalorder %v3898_v47, 2  ;;  %vm144_vm4 = vcmp.eq.s32.totalorder %v3893_v15, 0  ;;  %vm351_vm5 = vcmp.eq.s32.totalorder %v3898_v47, 0 }
  0x66   :  { %v134_v19 = vsel %vm51_vm12, %v133_v10, %v132_v29  ;;  %v231_v44 = vor.u32 4788187, %v230_v6  ;;  %v234_v54 = vcvt.s32.f32 %v227_v51  ;;  %v3924_v10 = vsub.f32 %v3905_v14, %v823_v11  ;;  %v3937_v6 = vld [vmem:[#allocation6 + $0xc0] sm:$0xff] }
  0x67   :  { %v137_v33 = vsel %vm3853_vm14, %v3635_v0, %v134_v19  ;;  %v3929_v29 = vsub.f32 %v3907_v8, %v5417_v58  ;;  %v3935_v51 = vsub.f32 %v3913_v46, %v5415_v21  ;;  %3128 = vmatpush3.bf16.msra.mxu1 %v3127_v28  ;;  %v3951_v17 = vand.u32 3, %v452_v35  ;;  %v4038_v58 = vld [vmem:[#allocation6 + $0xd8] sm:$0xff] }
  0x68   :  { %3491 = vcosq.f32 %v137_v33  ;;  %v232_v20 = vand.u32 2147483647, %v231_v44  ;;  %v5406_v19 = vand.u32 4294901760, %v3924_v10  ;;  %v5408_v44 = vand.u32 4294901760, %v3939_v59 }
  0x69   :  { %3493 = vsinq.f32 %v137_v33  ;;  %v5405_v13 = vand.u32 4294901760, %v3929_v29  ;;  %v5409_v33 = vand.u32 4294901760, %v3937_v6  ;;  %v5404_v34 = vand.u32 4294901760, %v3935_v51 }
  0x6a   :  { %v235_v39 = vmul.f32 %v234_v54, %v232_v20  ;;  %v3957_v28 = vsub.f32 %v3915_v48, %v5411_v62  ;;  %vm143_vm6 = vcmp.lt.s32.totalorder %v3893_v15, 2  ;;  %vm350_vm7 = vcmp.lt.s32.totalorder %v3898_v47, 2 }
  0x6b   :  { %v1041_v35 = vsub.f32 %v3924_v10, %v5406_v19  ;;  %v1048_v54 = vsub.f32 %v3929_v29, %v5405_v13  ;;  %v3977_v20 = vpack.c.bf16 %v766_v2, %v763_v16  ;;  %v929_v37 = vsub.f32 %v3935_v51, %v5404_v34  ;;  %v4005_v19 = vld [vmem:[#allocation6 + $0xd0] sm:$0xff] }
  0x6c   :  { %v236_v27 = vxor.u32 2147483648, %v235_v39  ;;  %v5410_v52 = vand.u32 4294901760, %v3957_v28  ;;  %v5412_v45 = vand.u32 4294901760, %v3947_v60  ;;  %v3991_v16 = vsub.f32 %v3937_v6, %v5409_v33 }
  0x6d   :  { %v1042_v36 = vand.u32 4294901760, %v1041_v35  ;;  %v1049_v9 = vand.u32 4294901760, %v1048_v54  ;;  %v3996_v2 = vsub.f32 %v3939_v59, %v5408_v44  ;;  %3092 = vmatpush3.bf16.msra.mxu0 %v3977_v20  ;;  %v930_v13 = vand.u32 4294901760, %v929_v37 }
  0x6e   :  { %5535 = vst [vmem:[#allocation18_spill] sm:$0xff] %v3991_v16  ;;  %v237_v34 = vsel %vm154_vm15, %v236_v27, %v235_v39  ;;  %v936_v35 = vsub.f32 %v3957_v28, %v5410_v52  ;;  %v5413_v54 = vand.u32 4294901760, %v3979_v30  ;;  %v5414_v33 = vand.u32 4294901760, %v3991_v16 }
  0x6f   :  { %5536 = vst [vmem:[#allocation19_spill] sm:$0xff] %v3996_v2  ;;  %v240_v25 = vsel %vm3866_vm0, %v3637_v1, %v237_v34  ;;  %v3129_v44 = vpack.c.bf16 %v1049_v9, %v1042_v36  ;;  %v5416_v39 = vand.u32 4294901760, %v3996_v2  ;;  %v4015_v37 = vsub.f32 %v3947_v60, %v5412_v45 }
  0x70   :  { %3495 = vcosq.f32 %v240_v25  ;;  %v937_v27 = vand.u32 4294901760, %v936_v35  ;;  %v4020_v52 = vsub.f32 %v3979_v30, %v5413_v54  ;;  %v1055_v34 = vsub.f32 %v3991_v16, %v5414_v33 }
  0x71   :  { %3497 = vsinq.f32 %v240_v25  ;;  %3130 = vmatprep.subr.bf16.mxu1 %v3129_v44  ;;  %v1062_v49 = vsub.f32 %v3996_v2, %v5416_v39  ;;  %vm250_vm10 = vcmp.eq.s32.totalorder %v3900_v4, 2  ;;  %v5421_v54 = vand.u32 4294901760, %v4015_v37 }
  0x72   :  { %v3492_v62 = vpop.eup %3491  ;;  %v3131_v45 = vpack.c.bf16 %v937_v27, %v930_v13  ;;  %v5418_v25 = vand.u32 4294901760, %v4020_v52  ;;  %v4036_v33 = vpack.c.bf16 %v820_v42, %v817_v53  ;;  %v1056_v21 = vand.u32 4294901760, %v1055_v34 }
  0x73   :  { %v3494_v9 = vpop.eup %3493  ;;  %v148_v35 = vxor.u32 2147483648, %v3492_v62  ;;  %v1063_v39 = vand.u32 4294901760, %v1062_v49  ;;  %vm247_vm11 = vcmp.eq.s32.totalorder %v3900_v4, 0  ;;  %vm455_vm12 = vcmp.eq.s32.totalorder %v3951_v17, 0 }
  0x74   :  { %v145_v44 = vxor.u32 2147483648, %v3494_v9  ;;  %3132 = vmatpush3.bf16.msra.mxu1 %v3131_v45  ;;  %v943_v53 = vsub.f32 %v4015_v37, %v5421_v54  ;;  %3094 = vmatprep.subr.bf16.mxu0 %v4036_v33  ;;  %v950_v23 = vsub.f32 %v4020_v52, %v5418_v25  ;;  %vm246_vm13 = vcmp.lt.s32.totalorder %v3900_v4, 2  ;;  %v4081_v45 = vld [vmem:[#allocation6 + $0x50] sm:$0xff] }
  0x75   :  { %v356_v36 = vsel %vm354_vm3, %v148_v35, %v3494_v9  ;;  %v149_v13 = vsel %vm147_vm2, %v148_v35, %v3494_v9  ;;  %v3133_v27 = vpack.c.bf16 %v1063_v39, %v1056_v21  ;;  %vm454_vm14 = vcmp.lt.s32.totalorder %v3951_v17, 2  ;;  %3096 = vmatpush3.bf16.msra.mxu0 %v4050_v5  ;;  %v4083_v39 = vld [vmem:[#allocation6 + $0x58] sm:$0xff] }
  0x76   :  { %v353_v40 = vsel %vm351_vm5, %v3492_v62, %v145_v44  ;;  %v146_v42 = vsel %vm144_vm4, %v3492_v62, %v145_v44  ;;  %v944_v55 = vand.u32 4294901760, %v943_v53  ;;  %v5424_v62 = vand.u32 4294901760, %v4038_v58 }
  0x77   :  { %v357_v56 = vsel %vm350_vm7, %v353_v40, %v356_v36  ;;  %v150_v3 = vsel %vm143_vm6, %v146_v42, %v149_v13  ;;  %vm244_vm15 = vweird.f32 %v3637_v1  ;;  %vm458_vm0 = vcmp.eq.s32.totalorder %v3951_v17, 2  ;;  %3134 = vmatprep.subr.bf16.mxu1 %v3133_v27 }
  0x78   :  { %v4073_v21 = vsel %vm141_vm8, nan, %v357_v56  ;;  %v4077_v47 = vsel %vm141_vm8, nan, %v150_v3  ;;  %v951_v15 = vand.u32 4294901760, %v950_v23  ;;  %v5538_v36 = vand.u32 4294901760, %v3907_v8 }
  0x79   :  { %468 = vrot.lane.b32.xlu0 %v4073_v21, %s3581_s1  ;;  %v477_v34 = vmul.f32 %v4077_v47, %v4077_v47  ;;  %v479_v0 = vmul.f32 %v4073_v21, %v4073_v21  ;;  %v483_v49 = vmul.f32 %v4073_v21, %v4077_v47  ;;  %464 = vst.msk [vmem:[#allocation2] sm:$0xff] %vm463_vm9, %v4077_v47  ;;  %v5540_v44 = vand.u32 4294901760, %v4005_v19 }
  0x7a   :  { %v4099_v9 = vpack.c.bf16 %v5538_v36, %v823_v11  ;;  %v3135_v35 = vpack.c.bf16 %v951_v15, %v944_v55  ;;  %v4109_v53 = vsub.f32 %v4038_v58, %v5424_v62  ;;  %v5541_v40 = vand.u32 4294901760, %v3913_v46  ;;  %v3496_v8 = vpop.eup %3495 }
  0x7b   :  { %v4104_v13 = vsub.f32 %v4005_v19, %v5540_v44  ;;  %v5542_v42 = vand.u32 4294901760, %v3915_v48  ;;  %v481_v11 = vsub.f32 %v477_v34, %v479_v0  ;;  %v4117_v27 = vadd.f32 %v483_v49, %v483_v49  ;;  %v3498_v3 = vpop.eup %3497 }
  0x7c   :  { %5539 = vst [vmem:[#allocation21_spill] sm:$0xff] %v4099_v9  ;;  %3098 = vmatprep.subr.bf16.mxu0 %v4099_v9  ;;  %v5423_v23 = vand.u32 4294901760, %v4081_v45  ;;  %v5422_v56 = vand.u32 4294901760, %v4083_v39  ;;  %v251_v55 = vxor.u32 2147483648, %v3496_v8  ;;  %3136 = vmatpush3.bf16.msra.mxu1 %v3135_v35  ;;  %v5420_v46 = vand.u32 4294901760, %v4109_v53 }
  0x7d   :  { %v4115_v14 = vpack.c.bf16 %v5542_v42, %v5541_v40  ;;  %v5419_v15 = vand.u32 4294901760, %v4104_v13  ;;  %v5544_v48 = vand.u32 4294901760, %v3937_v6  ;;  %v5545_v34 = vand.u32 4294901760, %v3939_v59  ;;  %489 = vrot.lane.b32.xlu1 %v481_v11, %s3582_s10 }
  0x7e   :  { %v509_v49 = vmul.f32 %v481_v11, %v4077_v47  ;;  %v515_v36 = vmul.f32 %v4117_v27, %v4077_v47  ;;  %v517_v35 = vmul.f32 %v481_v11, %v4073_v21  ;;  %v511_v44 = vmul.f32 %v4117_v27, %v4073_v21 }
  0x7f   :  { %5543 = vst [vmem:[#allocation22_spill] sm:$0xff] %v4115_v14  ;;  %3100 = vmatpush3.bf16.msra.mxu0 %v4115_v14  ;;  %v4129_v0 = vpack.c.bf16 %v5545_v34, %v5544_v48  ;;  %v248_v40 = vxor.u32 2147483648, %v3498_v3  ;;  %v252_v6 = vsel %vm250_vm10, %v251_v55, %v3498_v3  ;;  %v460_v59 = vsel %vm458_vm0, %v251_v55, %v3498_v3 }
  0x80   :  { %v1069_v42 = vsub.f32 %v4104_v13, %v5419_v15  ;;  %v519_v48 = vadd.f32 %v517_v35, %v515_v36  ;;  %v513_v34 = vsub.f32 %v509_v49, %v511_v44  ;;  %v1076_v11 = vsub.f32 %v4109_v53, %v5420_v46 }
  0x81   :  { %5546 = vst [vmem:[#allocation23_spill] sm:$0xff] %v4129_v0  ;;  %3102 = vmatprep.subr.bf16.mxu0 %v4129_v0  ;;  %v4152_v25 = vsub.f32 %v4081_v45, %v5423_v23  ;;  %v249_v3 = vsel %vm247_vm11, %v3496_v8, %v248_v40  ;;  %v457_v55 = vsel %vm455_vm12, %v3496_v8, %v248_v40  ;;  %vm474_vm1 = vcmask 523520  }
  0x82   :  { %v1070_v15 = vand.u32 4294901760, %v1069_v42  ;;  %v4161_v49 = vsub.f32 %v4083_v39, %v5422_v56  ;;  %525 = vrot.lane.b32.xlu0 %v519_v48, %s3581_s1  ;;  %v533_v36 = vmul.f32 %v513_v34, %v4077_v47  ;;  %v535_v35 = vmul.f32 %v519_v48, %v4073_v21  ;;  %521 = vst.msk [vmem:[#allocation2 + $0x8] sm:$0xff] %vm463_vm9, %v513_v34 }
  0x83   :  { %v539_v44 = vmul.f32 %v519_v48, %v4077_v47  ;;  %v541_v46 = vmul.f32 %v513_v34, %v4073_v21  ;;  %v253_v8 = vsel %vm246_vm13, %v249_v3, %v252_v6  ;;  %v461_v40 = vsel %vm454_vm14, %v457_v55, %v460_v59  ;;  %v4190_v59 = vld [vmem:[#allocation6 + $0xe0] sm:$0xff]  ;;  %v4192_v34 = vld [vmem:[#allocation6 + $0xe8] sm:$0xff] }
  0x84   :  { %v1077_v42 = vand.u32 4294901760, %v1076_v11  ;;  %v5428_v54 = vand.u32 4294901760, %v4152_v25  ;;  %v537_v56 = vsub.f32 %v533_v36, %v535_v35  ;;  %v4176_v62 = vsel %vm244_vm15, nan, %v253_v8 }
  0x85   :  { %v543_v23 = vadd.f32 %v541_v46, %v539_v44  ;;  %v4180_v48 = vsel %vm244_vm15, nan, %v461_v40  ;;  %v478_v4 = vmul.f32 %v4176_v62, %v4176_v62  ;;  %465 = vst.msk [vmem:[#allocation2 + $0x20] sm:$0xff] %vm463_vm9, %v4176_v62  ;;  %v5427_v55 = vand.u32 4294901760, %v4161_v49 }
  0x86   :  { %v480_v17 = vmul.f32 %v4180_v48, %v4180_v48  ;;  %v484_v6 = vmul.f32 %v4180_v48, %v4176_v62  ;;  %v3137_v46 = vpack.c.bf16 %v1077_v42, %v1070_v15  ;;  %547 = vrot.lane.b32.xlu1 %v537_v56, %s3582_s10  ;;  %v565_v1 = vmul.f32 %v537_v56, %v4077_v47 }
  0x87   :  { %v573_v11 = vmul.f32 %v537_v56, %v4073_v21  ;;  %557 = vrot.lane.b32.xlu0 %v543_v23, %s3583_s11  ;;  %v567_v3 = vmul.f32 %v543_v23, %v4073_v21  ;;  %v571_v36 = vmul.f32 %v543_v23, %v4077_v47  ;;  %v957_v44 = vsub.f32 %v4152_v25, %v5428_v54 }
  0x88   :  { %v482_v15 = vsub.f32 %v478_v4, %v480_v17  ;;  %v4201_v35 = vadd.f32 %v484_v6, %v484_v6  ;;  %3138 = vmatprep.subr.bf16.mxu1 %v3137_v46  ;;  %v964_v56 = vsub.f32 %v4161_v49, %v5427_v55  ;;  %v5433_v40 = vand.u32 4294901760, %v4190_v59 }
  0x89   :  { %v569_v8 = vsub.f32 %v565_v1, %v567_v3  ;;  %v4211_v0 = vadd.f32 %v573_v11, %v571_v36  ;;  %v958_v11 = vand.u32 4294901760, %v957_v44  ;;  %v5547_v14 = vand.u32 4294901760, %v4192_v34 }
  0x8a   :  { %v516_v23 = vmul.f32 %v4201_v35, %v4176_v62  ;;  %v518_v4 = vmul.f32 %v482_v15, %v4180_v48  ;;  %v510_v17 = vmul.f32 %v482_v15, %v4176_v62  ;;  %500 = vrot.lane.b32.xlu1 %v4117_v27, %s3583_s11  ;;  %v512_v6 = vmul.f32 %v4201_v35, %v4180_v48 }
  0x8b   :  { %v589_v46 = vmul.f32 %v569_v8, %v4077_v47  ;;  %v597_v1 = vmul.f32 %v569_v8, %v4073_v21  ;;  %577 = vst.msk [vmem:[#allocation2 + $0x10] sm:$0xff] %vm463_vm9, %v569_v8  ;;  %v591_v36 = vmul.f32 %v4211_v0, %v4073_v21  ;;  %v595_v55 = vmul.f32 %v4211_v0, %v4077_v47 }
  0x8c   :  { %v520_v3 = vadd.f32 %v518_v4, %v516_v23  ;;  %v965_v54 = vand.u32 4294901760, %v964_v56  ;;  %v514_v42 = vsub.f32 %v510_v17, %v512_v6  ;;  %v4231_v27 = vsub.f32 %v4190_v59, %v5433_v40 }
  0x8d   :  { %v4236_v12 = vsub.f32 %v4192_v34, %v5547_v14  ;;  %v5548_v44 = vand.u32 4294901760, %v3947_v60  ;;  %v5549_v8 = vand.u32 4294901760, %v3979_v30  ;;  %v4247_v17 = vsub.f32 %v589_v46, %v591_v36  ;;  %v4260_v46 = vld [vmem:[#allocation6 + $0x68] sm:$0xff] }
  0x8e   :  { %527 = vrot.lane.b32.xlu0 %v520_v3, %s3581_s1  ;;  %v536_v56 = vmul.f32 %v520_v3, %v4180_v48  ;;  %v540_v4 = vmul.f32 %v520_v3, %v4176_v62  ;;  %v4249_v6 = vadd.f32 %v597_v1, %v595_v55  ;;  %470 = vrot.lane.b32.xlu1 %v4180_v48, %s3581_s1  ;;  %v5448_v50 = vand.u32 4294901760, %v4260_v46 }
  0x8f   :  { %v4242_v23 = vpack.c.bf16 %v5549_v8, %v5548_v44  ;;  %v534_v14 = vmul.f32 %v514_v42, %v4176_v62  ;;  %v542_v60 = vmul.f32 %v514_v42, %v4180_v48  ;;  %522 = vst.msk [vmem:[#allocation2 + $0x28] sm:$0xff] %vm463_vm9, %v514_v42  ;;  %v3139_v30 = vpack.c.bf16 %v965_v54, %v958_v11  ;;  %v4258_v8 = vld [vmem:[#allocation6 + $0x60] sm:$0xff] }
  0x90   :  { %v5447_v44 = vand.u32 4294901760, %v4231_v27  ;;  %v627_v55 = vmul.f32 %v4249_v6, %v4077_v47  ;;  %v629_v1 = vmul.f32 %v4247_v17, %v4073_v21  ;;  %v621_v3 = vmul.f32 %v4247_v17, %v4077_v47 }
  0x91   :  { %5550 = vst [vmem:[#allocation24_spill] sm:$0xff] %v4242_v23  ;;  %3104 = vmatpush3.bf16.msra.mxu0 %v4242_v23  ;;  %v623_v54 = vmul.f32 %v4249_v6, %v4073_v21  ;;  %v538_v42 = vsub.f32 %v534_v14, %v536_v56  ;;  %v544_v11 = vadd.f32 %v542_v60, %v540_v4  ;;  %v5446_v40 = vand.u32 4294901760, %v4236_v12 }
  0x92   :  { %3140 = vmatpush3.bf16.msra.mxu1 %v3139_v30  ;;  %v1083_v36 = vsub.f32 %v4231_v27, %v5447_v44  ;;  %v631_v23 = vadd.f32 %v629_v1, %v627_v55  ;;  %v5449_v61 = vand.u32 4294901760, %v4258_v8  ;;  %491 = vrot.lane.b32.xlu1 %v482_v15, %s3582_s10  ;;  %v5555_v44 = vand.u32 4294901760, %v4083_v39 }
  0x93   :  { %v625_v24 = vsub.f32 %v621_v3, %v623_v54  ;;  %v566_v9 = vmul.f32 %v538_v42, %v4176_v62  ;;  %v574_v63 = vmul.f32 %v538_v42, %v4180_v48  ;;  %549 = vrot.lane.b32.xlu0 %v538_v42, %s3582_s10  ;;  %v568_v56 = vmul.f32 %v544_v11, %v4180_v48 }
  0x94   :  { %v1084_v4 = vand.u32 4294901760, %v1083_v36  ;;  %v572_v14 = vmul.f32 %v544_v11, %v4176_v62  ;;  %v647_v30 = vmul.f32 %v631_v23, %v4073_v21  ;;  %v651_v55 = vmul.f32 %v631_v23, %v4077_v47 }
  0x95   :  { %v645_v60 = vmul.f32 %v625_v24, %v4077_v47  ;;  %633 = vst.msk [vmem:[#allocation2 + $0x18] sm:$0xff] %vm463_vm9, %v625_v24  ;;  %v570_v1 = vsub.f32 %v566_v9, %v568_v56  ;;  %v653_v3 = vmul.f32 %v625_v24, %v4073_v21  ;;  %v1090_v15 = vsub.f32 %v4236_v12, %v5446_v40  ;;  %v4308_v56 = vld [vmem:[#allocation6 + $0xf0] sm:$0xff]  ;;  %v4310_v40 = vld [vmem:[#allocation6 + $0xf8] sm:$0xff] }
  0x96   :  { %v4293_v54 = vsub.f32 %v4258_v8, %v5449_v61  ;;  %v4295_v42 = vadd.f32 %v574_v63, %v572_v14  ;;  %v4300_v47 = vsub.f32 %v4260_v46, %v5448_v50  ;;  %v5551_v9 = vand.u32 4294901760, %v4005_v19  ;;  %502 = vrot.lane.b32.xlu1 %v4201_v35, %s3583_s11  ;;  %v699_v35 = vld [vmem:[#allocation6 + $0x70] sm:$0xff] }
  0x97   :  { %v649_v36 = vsub.f32 %v645_v60, %v647_v30  ;;  %v5552_v24 = vand.u32 4294901760, %v4038_v58  ;;  %559 = vrot.lane.b32.xlu0 %v544_v11, %s3583_s11  ;;  %v655_v63 = vadd.f32 %v653_v3, %v651_v55  ;;  %v590_v14 = vmul.f32 %v570_v1, %v4176_v62  ;;  %578 = vst.msk [vmem:[#allocation2 + $0x30] sm:$0xff] %vm463_vm9, %v570_v1  ;;  %v700_v55 = vld [vmem:[#allocation6 + $0x78] sm:$0xff] }
  0x98   :  { %v598_v60 = vmul.f32 %v570_v1, %v4180_v48  ;;  %v1091_v19 = vand.u32 4294901760, %v1090_v15  ;;  %v592_v58 = vmul.f32 %v4295_v42, %v4180_v48  ;;  %v596_v30 = vmul.f32 %v4295_v42, %v4176_v62 }
  0x99   :  { %v4306_v21 = vpack.c.bf16 %v5552_v24, %v5551_v9  ;;  %v847_v24 = vand.u32 4294901760, %v4308_v56  ;;  %v850_v1 = vand.u32 4294901760, %v4310_v40  ;;  %v5554_v15 = vand.u32 4294901760, %v4081_v45 }
  0x9a   :  { %v3141_v3 = vpack.c.bf16 %v1091_v19, %v1084_v4  ;;  %v4333_v61 = vsub.f32 %v590_v14, %v592_v58  ;;  %v4335_v9 = vadd.f32 %v598_v60, %v596_v30  ;;  %v5557_v11 = vand.u32 4294901760, %v4293_v54  ;;  %581 = vrot.lane.b32.xlu1 %v4211_v0, %s3581_s1 }
  0x9b   :  { %5553 = vst [vmem:[#allocation25_spill] sm:$0xff] %v4306_v21  ;;  %3106 = vmatprep.subr.bf16.mxu0 %v4306_v21  ;;  %v4331_v50 = vpack.c.bf16 %v5555_v44, %v5554_v15  ;;  %v5558_v4 = vand.u32 4294901760, %v4300_v47  ;;  %637 = vrot.lane.b32.xlu0 %v631_v23, %s3581_s1  ;;  %v4347_v45 = vsub.f32 %v4308_v56, %v847_v24  ;;  %v799_v44 = vand.u32 4294901760, %v699_v35 }
  0x9c   :  { %v971_v21 = vsub.f32 %v4293_v54, %v5557_v11  ;;  %v4350_v39 = vsub.f32 %v4310_v40, %v850_v1  ;;  %v802_v14 = vand.u32 4294901760, %v700_v55  ;;  %v628_v60 = vmul.f32 %v4335_v9, %v4176_v62  ;;  %3142 = vmatprep.subr.bf16.mxu1 %v3141_v3 }
  0x9d   :  { %5556 = vst [vmem:[#allocation26_spill] sm:$0xff] %v4331_v50  ;;  %v978_v19 = vsub.f32 %v4300_v47, %v5558_v4  ;;  %v630_v58 = vmul.f32 %v4333_v61, %v4180_v48  ;;  %v622_v23 = vmul.f32 %v4333_v61, %v4176_v62  ;;  %v624_v0 = vmul.f32 %v4335_v9, %v4180_v48 }
  0x9e   :  { %v972_v56 = vand.u32 4294901760, %v971_v21  ;;  %v1096_v40 = vand.u32 4294901760, %v4347_v45  ;;  %v5456_v11 = vand.u32 4294901760, %v4350_v39  ;;  %3108 = vmatpush3.bf16.msra.mxu0 %v4331_v50  ;;  %v4363_v43 = vsub.f32 %v699_v35, %v799_v44  ;;  %603 = vrot.lane.b32.xlu1 %v4247_v17, %s3582_s10 }
  0x9f   :  { %v979_v30 = vand.u32 4294901760, %v978_v19  ;;  %v632_v15 = vadd.f32 %v630_v58, %v628_v60  ;;  %v626_v4 = vsub.f32 %v622_v23, %v624_v0  ;;  %v4365_v5 = vsub.f32 %v700_v55, %v802_v14  ;;  %659 = vrot.lane.b32.xlu0 %v649_v36, %s3582_s10 }
  0xa0   :  { %v1097_v21 = vsub.f32 %v4347_v45, %v1096_v40  ;;  %v1104_v19 = vsub.f32 %v4350_v39, %v5456_v11  ;;  %v984_v60 = vand.u32 4294901760, %v4363_v43  ;;  %v5559_v23 = vand.u32 4294901760, %v4190_v59 }
  0xa1   :  { %v3143_v3 = vpack.c.bf16 %v979_v30, %v972_v56  ;;  %634 = vst.msk [vmem:[#allocation2 + $0x38] sm:$0xff] %vm463_vm9, %v626_v4  ;;  %v991_v36 = vand.u32 4294901760, %v4365_v5  ;;  %v646_v17 = vmul.f32 %v626_v4, %v4176_v62  ;;  %v648_v58 = vmul.f32 %v632_v15, %v4180_v48 }
  0xa2   :  { %v1098_v35 = vand.u32 4294901760, %v1097_v21  ;;  %v1105_v55 = vand.u32 4294901760, %v1104_v19  ;;  %v5560_v0 = vand.u32 4294901760, %v4192_v34  ;;  %v5562_v30 = vand.u32 4294901760, %v4258_v8  ;;  %613 = vrot.lane.b32.xlu1 %v4249_v6, %s3583_s11 }
  0xa3   :  { %3144 = vmatpush3.bf16.msra.mxu1 %v3143_v3  ;;  %v5563_v3 = vand.u32 4294901760, %v4260_v46  ;;  %669 = vrot.lane.b32.xlu0 %v655_v63, %s3583_s11  ;;  %v985_v11 = vsub.f32 %v4363_v43, %v984_v60  ;;  %v992_v59 = vsub.f32 %v4365_v5, %v991_v36  ;;  %v652_v34 = vmul.f32 %v632_v15, %v4176_v62  ;;  %v5587_v62 = vld [vmem:[#allocation17_spill] sm:$0xff] }
  0xa4   :  { %v4385_v56 = vpack.c.bf16 %v5560_v0, %v5559_v23  ;;  %v3145_v19 = vpack.c.bf16 %v1105_v55, %v1098_v35  ;;  %v4400_v23 = vpack.c.bf16 %v850_v1, %v847_v24  ;;  %v654_v8 = vmul.f32 %v626_v4, %v4180_v48 }
  0xa5   :  { %v4391_v21 = vpack.c.bf16 %v5563_v3, %v5562_v30  ;;  %v986_v46 = vand.u32 4294901760, %v985_v11  ;;  %v993_v0 = vand.u32 4294901760, %v992_v59  ;;  %v4404_v63 = vpack.c.bf16 %v802_v14, %v799_v44 }
  0xa6   :  { %5561 = vst [vmem:[#allocation27_spill] sm:$0xff] %v4385_v56  ;;  %3110 = vmatprep.subr.bf16.mxu0 %v4385_v56  ;;  %5564 = vst [vmem:[#allocation28_spill] sm:$0xff] %v4400_v23  ;;  %3146 = vmatprep.subr.bf16.mxu1 %v3145_v19  ;;  %v650_v6 = vsub.f32 %v646_v17, %v648_v58  ;;  %v3149_v35 = vpack.c.bf16 %v3666_v22, %v3660_v18  ;;  %v5565_v58 = vand.u32 4294901760, %v4152_v25  ;;  %vm495_vm2 = vcmask 785920  }
  0xa7   :  { %3112 = vmatpush3.bf16.msra.mxu0 %v4391_v21  ;;  %639 = vrot.lane.b32.xlu0 %v632_v15, %s3581_s1  ;;  %v3147_v48 = vpack.c.bf16 %v993_v0, %v986_v46  ;;  %v5566_v30 = vand.u32 4294901760, %v4161_v49  ;;  %v5569_v19 = vand.u32 4294901760, %v4236_v12  ;;  %vm506_vm3 = vcmask 1048320   ;;  %v5579_v15 = vld [vmem:[#allocation12_spill] sm:$0xff] }
  0xa8   :  { %3114 = vmatprep.subr.bf16.mxu0 %v4400_v23  ;;  %583 = vrot.lane.b32.xlu1 %v4295_v42, %s3581_s1  ;;  %v656_v42 = vadd.f32 %v654_v8, %v652_v34  ;;  %v5571_v34 = vand.u32 4294901760, %v4293_v54  ;;  %v5572_v8 = vand.u32 4294901760, %v4300_v47 }
  0xa9   :  { %3148 = vmatpush3.bf16.msra.mxu1 %v3147_v48  ;;  %v4444_v3 = vpack.c.bf16 %v5566_v30, %v5565_v58 }
  0xaa   :  { %3182 = vmatprep.subr.bf16.mxu1 %v3773_v57  ;;  %v4456_v46 = vpack.c.bf16 %v5572_v8, %v5571_v34 }
  0xab   :  { %3116 = vmatpush3.bf16.msra.mxu0 %v4404_v63  ;;  %661 = vrot.lane.b32.xlu0 %v650_v6, %s3582_s10  ;;  %5567 = vst [vmem:[#allocation29_spill] sm:$0xff] %v4444_v3  ;;  %v4464_v6 = vpack.c.bf16 %v991_v36, %v984_v60 }
  0xac   :  { %3150 = vmatprep.subr.bf16.mxu0 %v3149_v35  ;;  %605 = vrot.lane.b32.xlu1 %v4333_v61, %s3582_s10  ;;  %v5568_v61 = vand.u32 4294901760, %v4231_v27  ;;  %5573 = vst [vmem:[#allocation31_spill] sm:$0xff] %v4456_v46 }
  0xad   :  { %5576 = vst [vmem:[#allocation33_spill] sm:$0xff] %v4464_v6 }
  0xae   :  { %v4450_v59 = vpack.c.bf16 %v5569_v19, %v5568_v61 }
  0xaf   :  { %671 = vrot.lane.b32.xlu0 %v656_v42, %s3583_s11 }
  0xb0   :  { %615 = vrot.lane.b32.xlu1 %v4335_v9, %s3583_s11  ;;  %5570 = vst [vmem:[#allocation30_spill] sm:$0xff] %v4450_v59  ;;  %v5574_v9 = vand.u32 4294901760, %v4350_v39  ;;  %v5592_v59 = vld [vmem:[#allocation24_spill] sm:$0xff] }
  0xb2   :  { %v4462_v0 = vpack.c.bf16 %v5574_v9, %v1096_v40 }
  0xb4   :  { %5575 = vst [vmem:[#allocation32_spill] sm:$0xff] %v4462_v0 }
  0xeb   :  { %v469_v35 = vpop.permute.xlu0 %468 }
  0xec   :  { %475 = vst.msk [vmem:[#allocation2] sm:$0xff] %vm474_vm1, %v469_v35 }
  0xef   :  { %v490_v48 = vpop.permute.xlu1 %489 }
  0xf0   :  { %496 = vst.msk [vmem:[#allocation2] sm:$0xff] %vm495_vm2, %v490_v48 }
  0xf4   :  { %v526_v42 = vpop.permute.xlu0 %525 }
  0xf5   :  { %531 = vst.msk [vmem:[#allocation2 + $0x8] sm:$0xff] %vm474_vm1, %v526_v42 }
  0xf8   :  { %v548_v58 = vpop.permute.xlu1 %547 }
  0xf9   :  { %v558_v30 = vpop.permute.xlu0 %557  ;;  %553 = vst.msk [vmem:[#allocation2 + $0x8] sm:$0xff] %vm495_vm2, %v548_v58 }
  0xfa   :  { %563 = vst.msk [vmem:[#allocation2 + $0x8] sm:$0xff] %vm506_vm3, %v558_v30 }
  0xfc   :  { %v501_v40 = vpop.permute.xlu1 %500 }
  0xfd   :  { %507 = vst.msk [vmem:[#allocation2] sm:$0xff] %vm506_vm3, %v501_v40 }
 0x100   :  { %v528_v60 = vpop.permute.xlu0 %527  ;;  %v471_v36 = vpop.permute.xlu1 %470 }
 0x101   :  { %532 = vst.msk [vmem:[#allocation2 + $0x28] sm:$0xff] %vm474_vm1, %v528_v60  ;;  %476 = vst.msk [vmem:[#allocation2 + $0x20] sm:$0xff] %vm474_vm1, %v471_v36  ;;  %v678_v61 = vld [vmem:[#allocation2 + $0x8] sm:$0xff] }
 0x102   :  { %v4474_v19 = vand.u32 4294901760, %v678_v61 }
 0x104   :  { %v492_v8 = vpop.permute.xlu1 %491  ;;  %1108 = vmatprep.mubr.f32.mxu1 %v4474_v19  ;;  %v677_v9 = vld [vmem:[#allocation2] sm:$0xff]  ;;  %v4478_v35 = vsub.f32 %v678_v61, %v4474_v19 }
 0x105   :  { %v550_v34 = vpop.permute.xlu0 %549  ;;  %497 = vst.msk [vmem:[#allocation2 + $0x20] sm:$0xff] %vm495_vm2, %v492_v8  ;;  %v4482_v48 = vand.u32 4294901760, %v677_v9  ;;  %v3151_v8 = vpack.c.bf16 %v3683_v31, %v3673_v26 }
 0x106   :  { %554 = vst.msk [vmem:[#allocation2 + $0x28] sm:$0xff] %vm495_vm2, %v550_v34  ;;  %v854_v42 = vand.u32 4294901760, %v4478_v35 }
 0x107   :  { %5577 = vst [vmem:[#allocation34_spill] sm:$0xff] %v4482_v48  ;;  %1110 = vmatmul.mubr.f32.vlgmr.msra.gmra.mrb[0].mxu1 %v4482_v48  ;;  %v4487_v58 = vsub.f32 %v677_v9, %v4482_v48 }
 0x108   :  { %3184 = vmatpush3.bf16.msra.mxu1 %v3834_v38  ;;  %v503_v40 = vpop.permute.xlu1 %502  ;;  %v855_v60 = vsub.f32 %v4478_v35, %v854_v42 }
 0x109   :  { %v560_v30 = vpop.permute.xlu0 %559  ;;  %508 = vst.msk [vmem:[#allocation2 + $0x20] sm:$0xff] %vm506_vm3, %v503_v40  ;;  %3186 = vmatprep.subr.bf16.mxu1 %v3965_v41  ;;  %v5457_v36 = vand.u32 4294901760, %v4487_v58  ;;  %v3153_v40 = vpack.c.bf16 %v3783_v32, %v3764_v7 }
 0x10a   :  { %564 = vst.msk [vmem:[#allocation2 + $0x28] sm:$0xff] %vm506_vm3, %v560_v30  ;;  %v856_v61 = vand.u32 4294901760, %v855_v60  ;;  %v5578_v60 = vld [vmem:[#allocation20_spill] sm:$0xff] }
 0x10b   :  { %v861_v34 = vsub.f32 %v4487_v58, %v5457_v36  ;;  %v5580_v36 = vld [vmem:[#allocation13_spill] sm:$0xff] }
 0x10c   :  { %3188 = vmatpush3.bf16.msra.mxu1 %v3977_v20  ;;  %857 = vmatprep.mubr.f32.mxu0 %v856_v61  ;;  %v582_v17 = vpop.permute.xlu1 %581  ;;  %v3155_v4 = vpack.c.bf16 %v5580_v36, %v5579_v15 }
 0x10d   :  { %v638_v9 = vpop.permute.xlu0 %637  ;;  %3190 = vmatprep.subr.bf16.mxu1 %v4036_v33  ;;  %v862_v30 = vand.u32 4294901760, %v861_v34  ;;  %587 = vst.msk [vmem:[#allocation2 + $0x10] sm:$0xff] %vm474_vm1, %v582_v17  ;;  %v5582_v34 = vld [vmem:[#allocation21_spill] sm:$0xff]  ;;  %v5584_v17 = vld [vmem:[#allocation14_spill] sm:$0xff] }
 0x10e   :  { %643 = vst.msk [vmem:[#allocation2 + $0x18] sm:$0xff] %vm474_vm1, %v638_v9 }
 0x10f   :  { %863 = vmatmul.mubr.f32.vlgmr.msra.gmra.mrb[0].mxu0 %v862_v30 }
 0x110   :  { %3152 = vmatpush3.bf16.msra.mxu0 %v3151_v8  ;;  %3192 = vmatpush3.bf16.msra.mxu1 %v5578_v60  ;;  %v681_v55 = vld [vmem:[#allocation2 + $0x20] sm:$0xff]  ;;  %v604_v14 = vpop.permute.xlu1 %603  ;;  %v5585_v8 = vld [vmem:[#allocation15_spill] sm:$0xff] }
 0x111   :  { %v682_v61 = vld [vmem:[#allocation2 + $0x28] sm:$0xff]  ;;  %v660_v11 = vpop.permute.xlu0 %659  ;;  %3154 = vmatprep.subr.bf16.mxu0 %v3153_v40  ;;  %3194 = vmatprep.subr.bf16.mxu1 %v5582_v34  ;;  %v4512_v1 = vand.u32 4294901760, %v681_v55  ;;  %609 = vst.msk [vmem:[#allocation2 + $0x10] sm:$0xff] %vm495_vm2, %v604_v14  ;;  %v3157_v9 = vpack.c.bf16 %v5585_v8, %v5584_v17  ;;  %v5586_v40 = vld [vmem:[#allocation16_spill] sm:$0xff]  ;;  %v5588_v14 = vld [vmem:[#allocation22_spill] sm:$0xff] }
 0x112   :  { %v4509_v44 = vand.u32 4294901760, %v682_v61  ;;  %665 = vst.msk [vmem:[#allocation2 + $0x18] sm:$0xff] %vm495_vm2, %v660_v11  ;;  %v3159_v6 = vpack.c.bf16 %v5587_v62, %v5586_v40 }
 0x113   :  { %5583 = vst [vmem:[#allocation12_spill] sm:$0xff] %v4512_v1  ;;  %v4523_v24 = vsub.f32 %v681_v55, %v4512_v1  ;;  %v5589_v55 = vld [vmem:[#allocation23_spill] sm:$0xff] }
 0x114   :  { %5581 = vst [vmem:[#allocation20_spill] sm:$0xff] %v4509_v44  ;;  %1115 = vmatprep.mubr.f32.mxu1 %v4509_v44  ;;  %v4520_v30 = vsub.f32 %v682_v61, %v4509_v44  ;;  %3156 = vmatpush3.bf16.msra.mxu0 %v3155_v4  ;;  %v614_v0 = vpop.permute.xlu1 %613  ;;  %v4534_v4 = vld [vmem:[#allocation6 + $0x150] sm:$0xff]  ;;  %v4536_v61 = vld [vmem:[#allocation6 + $0x158] sm:$0xff] }
 0x115   :  { %1117 = vmatmul.mubr.f32.gmra.mrb[2].mxu1 %v4512_v1  ;;  %v670_v11 = vpop.permute.xlu0 %669  ;;  %v5465_v48 = vand.u32 4294901760, %v4523_v24  ;;  %619 = vst.msk [vmem:[#allocation2 + $0x10] sm:$0xff] %vm506_vm3, %v614_v0  ;;  %3158 = vmatprep.subr.bf16.mxu0 %v3157_v9  ;;  %5590 = vst [vmem:[#allocation13_spill] sm:$0xff] %v4534_v4  ;;  %v5593_v9 = vpack.c.bf16 %v3929_v29, %v3924_v10 }
 0x116   :  { %3196 = vmatpush3.bf16.msra.mxu1 %v5588_v14  ;;  %1368 = vmatprep.mubr.f32.mxu1 %v854_v42  ;;  %v5464_v46 = vand.u32 4294901760, %v4520_v30  ;;  %675 = vst.msk [vmem:[#allocation2 + $0x18] sm:$0xff] %vm506_vm3, %v670_v11  ;;  %5591 = vst [vmem:[#allocation21_spill] sm:$0xff] %v4536_v61  ;;  %v5596_v14 = vld [vmem:[#allocation25_spill] sm:$0xff] }
 0x117   :  { %3198 = vmatprep.subr.bf16.mxu1 %v5589_v55  ;;  %v876_v42 = vsub.f32 %v4523_v24, %v5465_v48  ;;  %v4552_v48 = vld [vmem:[#allocation6 + $0x1e0] sm:$0xff]  ;;  %v5599_v55 = vpack.c.bf16 %v3957_v28, %v3935_v51 }
 0x118   :  { %v870_v1 = vsub.f32 %v4520_v30, %v5464_v46  ;;  %3160 = vmatpush3.bf16.msra.mxu0 %v3159_v6  ;;  %v5466_v46 = vand.u32 4294901760, %v4534_v4  ;;  %5594 = vst [vmem:[#allocation14_spill] sm:$0xff] %v4552_v48  ;;  %v4554_v6 = vld [vmem:[#allocation6 + $0x1e8] sm:$0xff] }
 0x119   :  { %v640_v44 = vpop.permute.xlu0 %639  ;;  %3162 = vmatprep.subr.bf16.mxu0 %v5593_v9  ;;  %v877_v3 = vand.u32 4294901760, %v876_v42  ;;  %5595 = vst [vmem:[#allocation15_spill] sm:$0xff] %v4554_v6  ;;  %v5606_v9 = vand.u32 4294901760, %v4552_v48 }
 0x11a   :  { %v584_v11 = vpop.permute.xlu1 %583  ;;  %3200 = vmatpush3.bf16.msra.mxu1 %v5592_v59  ;;  %v871_v0 = vand.u32 4294901760, %v870_v1  ;;  %644 = vst.msk [vmem:[#allocation2 + $0x38] sm:$0xff] %vm474_vm1, %v640_v44  ;;  %v4557_v1 = vld [vmem:[#allocation6 + $0x160] sm:$0xff]  ;;  %v4559_v59 = vld [vmem:[#allocation6 + $0x168] sm:$0xff] }
 0x11b   :  { %588 = vst.msk [vmem:[#allocation2 + $0x30] sm:$0xff] %vm474_vm1, %v584_v11  ;;  %3202 = vmatprep.subr.bf16.mxu1 %v5596_v14  ;;  %5597 = vst [vmem:[#allocation16_spill] sm:$0xff] %v4557_v1  ;;  %v4580_v14 = vld [vmem:[#allocation6 + $0x1f0] sm:$0xff] }
 0x11c   :  { %872 = vmatprep.mubr.f32.mxu0 %v871_v0  ;;  %5598 = vst [vmem:[#allocation17_spill] sm:$0xff] %v4559_v59  ;;  %3164 = vmatpush3.bf16.msra.mxu0 %v5599_v55  ;;  %v5600_v0 = vand.u32 4294901760, %v4536_v61  ;;  %5601 = vst [vmem:[#allocation35_spill] sm:$0xff] %v4580_v14  ;;  %v4582_v55 = vld [vmem:[#allocation6 + $0x1f8] sm:$0xff] }
 0x11d   :  { %878 = vmatmul.mubr.f32.gmra.mrb[2].mxu0 %v877_v3  ;;  %v662_v42 = vpop.permute.xlu0 %661  ;;  %v4572_v3 = vsub.f32 %v4534_v4, %v5466_v46  ;;  %5602 = vst [vmem:[#allocation36_spill] sm:$0xff] %v4582_v55  ;;  %v4590_v46 = vld [vmem:[#allocation6 + $0x170] sm:$0xff]  ;;  %v4597_v4 = vsub.f32 %v4552_v48, %v5606_v9  ;;  %v4663_v48 = vld [vmem:[#allocation6 + $0x108] sm:$0xff] }
 0x11e   :  { %v606_v44 = vpop.permute.xlu1 %605  ;;  %3204 = vmatpush3.bf16.msra.mxu1 %v4331_v50  ;;  %666 = vst.msk [vmem:[#allocation2 + $0x38] sm:$0xff] %vm495_vm2, %v662_v42  ;;  %v4577_v11 = vsub.f32 %v4536_v61, %v5600_v0  ;;  %1252 = vmatprep.mubr.f32.mxu0 %v4478_v35  ;;  %v5603_v42 = vpack.c.bf16 %v3996_v2, %v3991_v16  ;;  %5604 = vst [vmem:[#allocation37_spill] sm:$0xff] %v4590_v46  ;;  %v4592_v0 = vld [vmem:[#allocation6 + $0x178] sm:$0xff]  ;;  %v5607_v35 = vand.u32 4294901760, %v4554_v6 }
 0x11f   :  { %610 = vst.msk [vmem:[#allocation2 + $0x30] sm:$0xff] %vm495_vm2, %v606_v44  ;;  %3206 = vmatprep.subr.bf16.mxu1 %v4385_v56  ;;  %5605 = vst [vmem:[#allocation38_spill] sm:$0xff] %v4592_v0  ;;  %v5608_v2 = vpack.c.bf16 %v4020_v52, %v4015_v37  ;;  %v5610_v56 = vpack.c.bf16 %v4109_v53, %v4104_v13  ;;  %v5612_v9 = vand.u32 4294901760, %v4572_v3 }
 0x120   :  { %3166 = vmatprep.subr.bf16.mxu0 %v5603_v42  ;;  %v4602_v50 = vsub.f32 %v4554_v6, %v5607_v35  ;;  %v5609_v35 = vand.u32 4294901760, %v4557_v1  ;;  %v4636_v6 = vld [vmem:[#allocation6 + $0x180] sm:$0xff] }
 0x121   :  { %v672_v61 = vpop.permute.xlu0 %671  ;;  %3168 = vmatpush3.bf16.msra.mxu0 %v5608_v2  ;;  %v5611_v2 = vand.u32 4294901760, %v4559_v59 }
 0x122   :  { %v616_v42 = vpop.permute.xlu1 %615  ;;  %3208 = vmatpush3.bf16.msra.mxu1 %v4391_v21  ;;  %676 = vst.msk [vmem:[#allocation2 + $0x38] sm:$0xff] %vm506_vm3, %v672_v61  ;;  %v4617_v44 = vsub.f32 %v4557_v1, %v5609_v35  ;;  %3170 = vmatprep.subr.bf16.mxu0 %v5610_v56  ;;  %v5613_v35 = vand.u32 4294901760, %v4577_v11  ;;  %v4638_v56 = vld [vmem:[#allocation6 + $0x188] sm:$0xff] }
 0x123   :  { %620 = vst.msk [vmem:[#allocation2 + $0x30] sm:$0xff] %vm506_vm3, %v616_v42  ;;  %3210 = vmatprep.subr.bf16.mxu1 %v4400_v23  ;;  %v4626_v16 = vsub.f32 %v4559_v59, %v5611_v2  ;;  %v5615_v2 = vand.u32 4294901760, %v4580_v14  ;;  %v5616_v42 = vand.u32 4294901760, %v4582_v55  ;;  %v5618_v23 = vpack.c.bf16 %v4236_v12, %v4231_v27 }
 0x124   :  { %v4634_v1 = vpack.c.bf16 %v5613_v35, %v5612_v9  ;;  %v5617_v9 = vpack.c.bf16 %v4161_v49, %v4152_v25  ;;  %v5620_v49 = vand.u32 4294901760, %v4592_v0  ;;  %v5621_v12 = vand.u32 4294901760, %v4597_v4 }
 0x125   :  { %v4645_v61 = vsub.f32 %v4580_v14, %v5615_v2  ;;  %v4650_v59 = vsub.f32 %v4582_v55, %v5616_v42  ;;  %v4661_v2 = vld [vmem:[#allocation6 + $0x100] sm:$0xff]  ;;  %v5624_v35 = vand.u32 4294901760, %v4487_v58 }
 0x126   :  { %5614 = vst [vmem:[#allocation39_spill] sm:$0xff] %v4634_v1  ;;  %3172 = vmatpush3.bf16.msra.mxu0 %v5617_v9  ;;  %3212 = vmatpush3.bf16.msra.mxu1 %v4404_v63  ;;  %v5619_v1 = vand.u32 4294901760, %v4590_v46  ;;  %v4674_v9 = vsub.f32 %v4592_v0, %v5620_v49  ;;  %v5625_v49 = vand.u32 4294901760, %v4617_v44  ;;  %v5626_v0 = vand.u32 4294901760, %v4626_v16 }
 0x127   :  { %3174 = vmatprep.subr.bf16.mxu0 %v5618_v23  ;;  %3246 = vmatprep.subr.bf16.mxu1 %v3773_v57  ;;  %v5622_v57 = vand.u32 4294901760, %v4602_v50  ;;  %v4701_v23 = vld [vmem:[#allocation6 + $0x190] sm:$0xff] }
 0x128   :  { %v4669_v25 = vsub.f32 %v4590_v46, %v5619_v1  ;;  %v5481_v1 = vand.u32 4294901760, %v4645_v61  ;;  %v4692_v55 = vpack.c.bf16 %v5626_v0, %v5625_v49  ;;  %v4703_v46 = vld [vmem:[#allocation6 + $0x198] sm:$0xff]  ;;  %v5630_v0 = vpack.c.bf16 %v4350_v39, %v4347_v45  ;;  %v4732_v39 = vld [vmem:[#allocation6 + $0x110] sm:$0xff] }
 0x129   :  { %v4680_v27 = vpack.c.bf16 %v5622_v57, %v5621_v12  ;;  %1372 = vmatmul.mubr.f32.vlgmr.msra.gmra.mrb[4].mxu1 %v5624_v35  ;;  %v5628_v12 = vpack.c.bf16 %v4300_v47, %v4293_v54  ;;  %v5629_v57 = vand.u32 4294901760, %v4520_v30  ;;  %v5631_v54 = vand.u32 4294901760, %v3660_v18 }
 0x12a   :  { %5627 = vst [vmem:[#allocation41_spill] sm:$0xff] %v4692_v55  ;;  %3248 = vmatpush3.bf16.msra.mxu1 %v3834_v38  ;;  %v5632_v47 = vand.u32 4294901760, %v3666_v22  ;;  %v5633_v35 = vand.u32 4294901760, %v4650_v59  ;;  %v5635_v38 = vand.u32 4294901760, %v4636_v6  ;;  %v5637_v18 = vand.u32 4294901760, %v4638_v56  ;;  %v4941_v55 = vld [vmem:[#allocation6 + $0x1d8] sm:$0xff] }
 0x12b   :  { %5623 = vst [vmem:[#allocation40_spill] sm:$0xff] %v4680_v27  ;;  %3176 = vmatpush3.bf16.msra.mxu0 %v5628_v12  ;;  %1379 = vmatprep.mubr.f32.mxu1 %v5629_v57  ;;  %v5487_v12 = vand.u32 4294901760, %v4669_v25  ;;  %v5482_v57 = vand.u32 4294901760, %v4674_v9 }
 0x12c   :  { %3178 = vmatprep.subr.bf16.mxu0 %v5630_v0  ;;  %v3213_v49 = vpack.c.bf16 %v5632_v47, %v5631_v54  ;;  %v4719_v42 = vpack.c.bf16 %v5633_v35, %v5481_v1  ;;  %3250 = vmatprep.subr.bf16.mxu1 %v3965_v41  ;;  %v4725_v45 = vsub.f32 %v4636_v6, %v5635_v38  ;;  %v5639_v0 = vand.u32 4294901760, %v4523_v24 }
 0x12d   :  { %v4730_v22 = vsub.f32 %v4638_v56, %v5637_v18  ;;  %v4742_v41 = vpack.c.bf16 %v5482_v57, %v5487_v12  ;;  %v5641_v47 = vpack.c.bf16 %v4365_v5, %v4363_v43  ;;  %v5642_v38 = vand.u32 4294901760, %v3673_v26 }
 0x12e   :  { %5634 = vst [vmem:[#allocation42_spill] sm:$0xff] %v4719_v42  ;;  %5636 = vst [vmem:[#allocation43_spill] sm:$0xff] %v4725_v45  ;;  %1383 = vmatmul.mubr.f32.gmra.mrb[6].mxu1 %v5639_v0  ;;  %v5643_v18 = vand.u32 4294901760, %v3683_v31  ;;  %v5644_v1 = vand.u32 4294901760, %v4661_v2  ;;  %v5646_v35 = vand.u32 4294901760, %v4663_v48  ;;  %v5648_v43 = vand.u32 4294901760, %v3764_v7 }
 0x12f   :  { %5638 = vst [vmem:[#allocation44_spill] sm:$0xff] %v4730_v22  ;;  %5640 = vst [vmem:[#allocation45_spill] sm:$0xff] %v4742_v41  ;;  %3180 = vmatpush3.bf16.msra.mxu0 %v5641_v47  ;;  %1660 = vmatprep.mubr.f32.mxu1 %v4474_v19  ;;  %v5649_v26 = vand.u32 4294901760, %v3783_v32  ;;  %v5488_v31 = vand.u32 4294901760, %v4732_v39  ;;  %v5483_v47 = vand.u32 4294901760, %v4730_v22  ;;  %v5652_v7 = vand.u32 4294901760, %v4703_v46 }
 0x130   :  { %v3215_v0 = vpack.c.bf16 %v5643_v18, %v5642_v38  ;;  %v4755_v54 = vsub.f32 %v4661_v2, %v5644_v1  ;;  %v4760_v57 = vsub.f32 %v4663_v48, %v5646_v35  ;;  %3252 = vmatpush3.bf16.msra.mxu1 %v3977_v20  ;;  %3214 = vmatprep.subr.bf16.mxu0 %v3213_v49  ;;  %v5484_v1 = vand.u32 4294901760, %v4725_v45  ;;  %v4771_v38 = vld [vmem:[#allocation6 + $0x118] sm:$0xff] }
 0x131   :  { %v3217_v5 = vpack.c.bf16 %v5649_v26, %v5648_v43  ;;  %3254 = vmatprep.subr.bf16.mxu1 %v4036_v33  ;;  %v5650_v20 = vand.u32 4294901760, %v4701_v23  ;;  %v4782_v32 = vsub.f32 %v4703_v46, %v5652_v7  ;;  %v5654_v33 = vand.u32 4294901760, %v5579_v15  ;;  %v4791_v26 = vld [vmem:[#allocation6 + $0x1a0] sm:$0xff]  ;;  %v4895_v42 = vld [vmem:[#allocation6 + $0x138] sm:$0xff] }
 0x132   :  { %5645 = vst [vmem:[#allocation46_spill] sm:$0xff] %v4755_v54  ;;  %5647 = vst [vmem:[#allocation47_spill] sm:$0xff] %v4760_v57  ;;  %1255 = vmatmul.mubr.f32.vlgmr.msra.gmra.mrb[4].mxu0 %v4487_v58  ;;  %v5655_v35 = vand.u32 4294901760, %v5580_v36  ;;  %v5486_v58 = vand.u32 4294901760, %v4755_v54  ;;  %v5485_v43 = vand.u32 4294901760, %v4760_v57  ;;  %v5657_v7 = vand.u32 4294901760, %v5585_v8 }
 0x133   :  { %v4777_v49 = vsub.f32 %v4701_v23, %v5650_v20  ;;  %5653 = vst [vmem:[#allocation49_spill] sm:$0xff] %v4782_v32  ;;  %1261 = vmatprep.mubr.f32.mxu0 %v4520_v30  ;;  %3216 = vmatpush3.bf16.msra.mxu0 %v3215_v0  ;;  %v5656_v20 = vand.u32 4294901760, %v5584_v17  ;;  %v5492_v0 = vand.u32 4294901760, %v4771_v38  ;;  %v4802_v15 = vsub.f32 %v4732_v39, %v5488_v31  ;;  %v4804_v36 = vld [vmem:[#allocation6 + $0x1a8] sm:$0xff] }
 0x134   :  { %v3219_v18 = vpack.c.bf16 %v5655_v35, %v5654_v33  ;;  %3256 = vmatpush3.bf16.msra.mxu1 %v5578_v60  ;;  %3218 = vmatprep.subr.bf16.mxu0 %v3217_v5  ;;  %v1917_v60 = vsub.f32 %v4725_v45, %v5484_v1  ;;  %v1924_v17 = vsub.f32 %v4730_v22, %v5483_v47  ;;  %v5489_v5 = vand.u32 4294901760, %v4782_v32  ;;  %v4829_v1 = vld [vmem:[#allocation6 + $0x120] sm:$0xff] }
 0x135   :  { %5651 = vst [vmem:[#allocation48_spill] sm:$0xff] %v4777_v49  ;;  %v3221_v30 = vpack.c.bf16 %v5657_v7, %v5656_v20  ;;  %5658 = vst [vmem:[#allocation50_spill] sm:$0xff] %v4802_v15  ;;  %3258 = vmatprep.subr.bf16.mxu1 %v5582_v34  ;;  %v5490_v8 = vand.u32 4294901760, %v4777_v49  ;;  %v5491_v33 = vand.u32 4294901760, %v4791_v26  ;;  %v5659_v34 = vand.u32 4294901760, %v5586_v40 }
 0x136   :  { %1264 = vmatmul.mubr.f32.gmra.mrb[6].mxu0 %v4523_v24  ;;  %v5660_v35 = vand.u32 4294901760, %v5587_v62  ;;  %v1805_v7 = vsub.f32 %v4755_v54, %v5486_v58  ;;  %v1812_v24 = vsub.f32 %v4760_v57, %v5485_v43  ;;  %v5493_v47 = vand.u32 4294901760, %v4804_v36  ;;  %v4842_v43 = vld [vmem:[#allocation6 + $0x128] sm:$0xff] }
 0x137   :  { %3220 = vmatpush3.bf16.msra.mxu0 %v3219_v18  ;;  %1549 = vmatprep.mubr.f32.mxu0 %v4474_v19  ;;  %v5661_v18 = vld [vmem:[#allocation22_spill] sm:$0xff]  ;;  %v5662_v19 = vand.u32 4294901760, %v3924_v10  ;;  %v5663_v62 = vand.u32 4294901760, %v3929_v29  ;;  %v5665_v58 = vld [vmem:[#allocation23_spill] sm:$0xff]  ;;  %v5666_v12 = vand.u32 4294901760, %v3935_v51  ;;  %v1918_v10 = vand.u32 4294901760, %v1917_v60 }
 0x138   :  { %v3223_v20 = vpack.c.bf16 %v5660_v35, %v5659_v34  ;;  %3260 = vmatpush3.bf16.msra.mxu1 %v5661_v18  ;;  %3222 = vmatprep.subr.bf16.mxu0 %v3221_v30  ;;  %v4840_v35 = vsub.f32 %v4771_v38, %v5492_v0  ;;  %v5667_v30 = vand.u32 4294901760, %v3957_v28  ;;  %v1925_v31 = vand.u32 4294901760, %v1924_v17  ;;  %v4863_v28 = vld [vmem:[#allocation6 + $0x1b8] sm:$0xff]  ;;  %v5673_v0 = vld [vmem:[#allocation19_spill] sm:$0xff] }
 0x139   :  { %v3225_v40 = vpack.c.bf16 %v5663_v62, %v5662_v19  ;;  %3262 = vmatprep.subr.bf16.mxu1 %v5665_v58  ;;  %v1931_v29 = vsub.f32 %v4777_v49, %v5490_v8  ;;  %v1938_v19 = vsub.f32 %v4782_v32, %v5489_v5  ;;  %v4858_v62 = vsub.f32 %v4791_v26, %v5491_v33  ;;  %v4861_v58 = vld [vmem:[#allocation6 + $0x1b0] sm:$0xff]  ;;  %v5671_v8 = vld [vmem:[#allocation18_spill] sm:$0xff] }
 0x13a   :  { %5664 = vst [vmem:[#allocation22_spill] sm:$0xff] %v4840_v35  ;;  %v3227_v18 = vpack.c.bf16 %v5667_v30, %v5666_v12  ;;  %v1806_v12 = vand.u32 4294901760, %v1805_v7  ;;  %v1813_v60 = vand.u32 4294901760, %v1812_v24  ;;  %v4868_v17 = vsub.f32 %v4804_v36, %v5493_v47  ;;  %v5670_v5 = vld [vmem:[#allocation24_spill] sm:$0xff]  ;;  %v5676_v24 = vld [vmem:[#allocation25_spill] sm:$0xff] }
 0x13b   :  { %5668 = vst [vmem:[#allocation23_spill] sm:$0xff] %v4858_v62  ;;  %3224 = vmatpush3.bf16.msra.mxu0 %v3223_v20  ;;  %v5672_v33 = vand.u32 4294901760, %v5671_v8  ;;  %v5674_v51 = vand.u32 4294901760, %v5673_v0  ;;  %v5675_v41 = vand.u32 4294901760, %v4802_v15  ;;  %v5677_v47 = vand.u32 4294901760, %v4015_v37  ;;  %v4915_v37 = vld [vmem:[#allocation6 + $0x140] sm:$0xff] }
 0x13c   :  { %5669 = vst [vmem:[#allocation51_spill] sm:$0xff] %v4868_v17  ;;  %3264 = vmatpush3.bf16.msra.mxu1 %v5670_v5  ;;  %3226 = vmatprep.subr.bf16.mxu0 %v3225_v40  ;;  %v5678_v30 = vand.u32 4294901760, %v4020_v52  ;;  %v5679_v40 = vand.u32 4294901760, %v4104_v13  ;;  %v5680_v8 = vand.u32 4294901760, %v4109_v53  ;;  %v1932_v7 = vand.u32 4294901760, %v1931_v29  ;;  %v4903_v13 = vld [vmem:[#allocation6 + $0x1c0] sm:$0xff] }
 0x13d   :  { %v3229_v34 = vpack.c.bf16 %v5674_v51, %v5672_v33  ;;  %v4879_v20 = vsub.f32 %v4802_v15, %v5675_v41  ;;  %3266 = vmatprep.subr.bf16.mxu1 %v5676_v24  ;;  %v4893_v41 = vld [vmem:[#allocation6 + $0x130] sm:$0xff]  ;;  %v1939_v24 = vand.u32 4294901760, %v1938_v19  ;;  %v5681_v52 = vand.u32 4294901760, %v4829_v1  ;;  %v4905_v53 = vld [vmem:[#allocation6 + $0x1c8] sm:$0xff]  ;;  %v5685_v51 = vld [vmem:[#allocation26_spill] sm:$0xff]  ;;  %5691 = vst [vmem:[#allocation25_spill] sm:$0xff] %v4941_v55 }
 0x13e   :  { %v3231_v5 = vpack.c.bf16 %v5678_v30, %v5677_v47  ;;  %v3233_v0 = vpack.c.bf16 %v5680_v8, %v5679_v40  ;;  %v3309_v30 = vpack.c.bf16 %v1925_v31, %v1918_v10  ;;  %v4907_v40 = vpack.c.bf16 %v1813_v60, %v1806_v12  ;;  %v4924_v12 = vld [vmem:[#allocation6 + $0x148] sm:$0xff]  ;;  %v4939_v10 = vld [vmem:[#allocation6 + $0x1d0] sm:$0xff] }
 0x13f   :  { %v4901_v47 = vsub.f32 %v4829_v1, %v5681_v52  ;;  %3228 = vmatpush3.bf16.msra.mxu0 %v3227_v18  ;;  %v5683_v29 = vand.u32 4294901760, %v4842_v43  ;;  %v1820_v52 = vand.u32 4294901760, %v4879_v20  ;;  %v5686_v33 = vand.u32 4294901760, %v4840_v35  ;;  %v680_v60 = vld [vmem:[#allocation2 + $0x18] sm:$0xff]  ;;  %v5696_v32 = vld [vmem:[#allocation28_spill] sm:$0xff] }
 0x140   :  { %3268 = vmatpush3.bf16.msra.mxu1 %v5685_v51  ;;  %3230 = vmatprep.subr.bf16.mxu0 %v3229_v34  ;;  %v5688_v8 = vand.u32 4294901760, %v4861_v58  ;;  %v5690_v34 = vand.u32 4294901760, %v4863_v28  ;;  %v3313_v27 = vpack.c.bf16 %v1939_v24, %v1932_v7  ;;  %v4953_v49 = vand.u32 4294901760, %v680_v60 }
 0x141   :  { %5682 = vst [vmem:[#allocation24_spill] sm:$0xff] %v4901_v47  ;;  %v4913_v19 = vsub.f32 %v4842_v43, %v5683_v29  ;;  %v1826_v31 = vsub.f32 %v4840_v35, %v5686_v33  ;;  %v5687_v29 = vld [vmem:[#allocation27_spill] sm:$0xff]  ;;  %v5694_v7 = vand.u32 4294901760, %v4893_v41  ;;  %v5699_v18 = vand.u32 4294901760, %v4901_v47 }
 0x142   :  { %3270 = vmatprep.subr.bf16.mxu1 %v5687_v29  ;;  %v4930_v51 = vsub.f32 %v4861_v58, %v5688_v8  ;;  %v4935_v20 = vsub.f32 %v4863_v28, %v5690_v34  ;;  %v5692_v29 = vand.u32 4294901760, %v4858_v62  ;;  %v5693_v34 = vand.u32 4294901760, %v4868_v17 }
 0x143   :  { %5684 = vst [vmem:[#allocation18_spill] sm:$0xff] %v4913_v19  ;;  %3232 = vmatpush3.bf16.msra.mxu0 %v3231_v5  ;;  %v4959_v24 = vsub.f32 %v4893_v41, %v5694_v7  ;;  %v5695_v5 = vand.u32 4294901760, %v4895_v42  ;;  %v5698_v8 = vand.u32 4294901760, %v4905_v53  ;;  %v5700_v15 = vand.u32 4294901760, %v4915_v37 }
 0x144   :  { %5689 = vst [vmem:[#allocation19_spill] sm:$0xff] %v4930_v51  ;;  %v1945_v35 = vsub.f32 %v4858_v62, %v5692_v29  ;;  %v1952_v33 = vsub.f32 %v4868_v17, %v5693_v34  ;;  %3272 = vmatpush3.bf16.msra.mxu1 %v4391_v21  ;;  %3234 = vmatprep.subr.bf16.mxu0 %v3233_v0  ;;  %v5697_v0 = vand.u32 4294901760, %v4903_v13  ;;  %v1827_v17 = vand.u32 4294901760, %v1826_v31  ;;  %v5701_v62 = vld [vmem:[#allocation29_spill] sm:$0xff] }
 0x145   :  { %v4964_v29 = vsub.f32 %v4895_v42, %v5695_v5  ;;  %3274 = vmatprep.subr.bf16.mxu1 %v5696_v32  ;;  %v4979_v5 = vsub.f32 %v4905_v53, %v5698_v8  ;;  %v1833_v32 = vsub.f32 %v4901_v47, %v5699_v18  ;;  %v4987_v21 = vsub.f32 %v4915_v37, %v5700_v15  ;;  %v5704_v18 = vld [vmem:[#allocation30_spill] sm:$0xff] }
 0x146   :  { %v4974_v7 = vsub.f32 %v4903_v13, %v5697_v0  ;;  %v1946_v34 = vand.u32 4294901760, %v1945_v35  ;;  %v1953_v0 = vand.u32 4294901760, %v1952_v33  ;;  %v5702_v57 = vand.u32 4294901760, %v4913_v19 }
 0x147   :  { %3236 = vmatpush3.bf16.msra.mxu0 %v5701_v62  ;;  %v5703_v8 = vand.u32 4294901760, %v4924_v12  ;;  %v4999_v31 = vsub.f32 %v680_v60, %v4953_v49  ;;  %v5705_v33 = vand.u32 4294901760, %v4939_v10  ;;  %v5707_v60 = vand.u32 4294901760, %v4930_v51 }
 0x148   :  { %v1840_v54 = vsub.f32 %v4913_v19, %v5702_v57  ;;  %3276 = vmatpush3.bf16.msra.mxu1 %v4404_v63  ;;  %3238 = vmatprep.subr.bf16.mxu0 %v5704_v18  ;;  %v5706_v19 = vand.u32 4294901760, %v4941_v55  ;;  %v5708_v18 = vand.u32 4294901760, %v4935_v20  ;;  %v5709_v22 = vand.u32 4294901760, %v4636_v6 }
 0x149   :  { %v4996_v35 = vsub.f32 %v4924_v12, %v5703_v8  ;;  %v5008_v57 = vsub.f32 %v4939_v10, %v5705_v33  ;;  %3310 = vmatprep.subr.bf16.mxu1 %v3309_v30  ;;  %v1959_v63 = vsub.f32 %v4930_v51, %v5707_v60  ;;  %v3315_v33 = vpack.c.bf16 %v1827_v17, %v1820_v52  ;;  %v5712_v60 = vld [vmem:[#allocation31_spill] sm:$0xff]  ;;  %v5713_v17 = vld [vmem:[#allocation20_spill] sm:$0xff] }
 0x14a   :  { %v5013_v8 = vsub.f32 %v4941_v55, %v5706_v19  ;;  %v1966_v15 = vsub.f32 %v4935_v20, %v5708_v18  ;;  %v5710_v45 = vand.u32 4294901760, %v4638_v56  ;;  %v1834_v30 = vand.u32 4294901760, %v1833_v32  ;;  %v5711_v55 = vld [vmem:[#allocation34_spill] sm:$0xff] }
 0x14b   :  { %v5522_v14 = vand.u32 4294901760, %v4987_v21  ;;  %1662 = vmatmul.mubr.f32.vlgmr.msra.gmra.mrb[8].mxu1 %v5711_v55  ;;  %3240 = vmatpush3.bf16.msra.mxu0 %v5712_v60  ;;  %v3317_v51 = vpack.c.bf16 %v1953_v0, %v1946_v34  ;;  %v1841_v18 = vand.u32 4294901760, %v1840_v54  ;;  %v5714_v6 = vand.u32 4294901760, %v4959_v24  ;;  %v5716_v34 = vld [vmem:[#allocation32_spill] sm:$0xff] }
 0x14c   :  { %v5027_v19 = vpack.c.bf16 %v5710_v45, %v5709_v22  ;;  %1667 = vmatprep.mubr.f32.mxu1 %v5713_v17  ;;  %3312 = vmatpush3.bf16.msra.mxu1 %v4907_v40  ;;  %v5715_v45 = vand.u32 4294901760, %v4964_v29  ;;  %v1960_v32 = vand.u32 4294901760, %v1959_v63  ;;  %v1967_v0 = vand.u32 4294901760, %v1966_v15 }
 0x14d   :  { %v1847_v56 = vsub.f32 %v4959_v24, %v5714_v6  ;;  %3242 = vmatprep.subr.bf16.mxu0 %v5716_v34  ;;  %3314 = vmatprep.subr.bf16.mxu1 %v3313_v27  ;;  %v5717_v60 = vand.u32 4294901760, %v4974_v7  ;;  %v5718_v47 = vand.u32 4294901760, %v4979_v5  ;;  %v5719_v62 = vand.u32 4294901760, %v4661_v2  ;;  %v5723_v34 = vld [vmem:[#allocation12_spill] sm:$0xff] }
 0x14e   :  { %v1854_v22 = vsub.f32 %v4964_v29, %v5715_v45  ;;  %v5720_v45 = vand.u32 4294901760, %v4663_v48  ;;  %v5721_v54 = vand.u32 4294901760, %v4701_v23  ;;  %v5722_v27 = vand.u32 4294901760, %v4703_v46 }
 0x14f   :  { %v1973_v40 = vsub.f32 %v4974_v7, %v5717_v60  ;;  %v1980_v6 = vsub.f32 %v4979_v5, %v5718_v47  ;;  %v1861_v15 = vsub.f32 %v4987_v21, %v5522_v14  ;;  %1669 = vmatmul.mubr.f32.gmra.mrb[10].mxu1 %v5723_v34  ;;  %v5724_v60 = vld [vmem:[#allocation33_spill] sm:$0xff]  ;;  %v3319_v47 = vpack.c.bf16 %v1841_v18, %v1834_v30 }
 0x150   :  { %v5055_v52 = vpack.c.bf16 %v5720_v45, %v5719_v62  ;;  %v5061_v63 = vpack.c.bf16 %v5722_v27, %v5721_v54  ;;  %3244 = vmatpush3.bf16.msra.mxu0 %v5724_v60  ;;  %v5725_v2 = vand.u32 4294901760, %v4996_v35  ;;  %v5726_v62 = vand.u32 4294901760, %v4999_v31  ;;  %3316 = vmatpush3.bf16.msra.mxu1 %v3315_v33 }
 0x151   :  { %3278 = vmatprep.subr.bf16.mxu0 %v5027_v19  ;;  %v1848_v46 = vand.u32 4294901760, %v1847_v56  ;;  %v1855_v54 = vand.u32 4294901760, %v1854_v22  ;;  %v5727_v45 = vand.u32 4294901760, %v5008_v57  ;;  %v5728_v60 = vand.u32 4294901760, %v5013_v8  ;;  %3318 = vmatprep.subr.bf16.mxu1 %v3317_v51 }
 0x152   :  { %v1868_v48 = vsub.f32 %v4996_v35, %v5725_v2  ;;  %v1773_v23 = vsub.f32 %v4999_v31, %v5726_v62  ;;  %v3321_v18 = vpack.c.bf16 %v1967_v0, %v1960_v32  ;;  %v1974_v2 = vand.u32 4294901760, %v1973_v40  ;;  %2026 = vmatprep.mubr.f32.mxu1 %v4953_v49 }
 0x153   :  { %v1987_v27 = vsub.f32 %v5008_v57, %v5727_v45  ;;  %v1994_v30 = vsub.f32 %v5013_v8, %v5728_v60  ;;  %v1981_v14 = vand.u32 4294901760, %v1980_v6  ;;  %1551 = vmatmul.mubr.f32.vlgmr.msra.gmra.mrb[8].mxu0 %v5711_v55  ;;  %v5729_v33 = vand.u32 4294901760, %v4732_v39 }
 0x154   :  { %v5730_v56 = vand.u32 4294901760, %v4771_v38  ;;  %v1862_v62 = vand.u32 4294901760, %v1861_v15  ;;  %1556 = vmatprep.mubr.f32.mxu0 %v5713_v17  ;;  %3280 = vmatpush3.bf16.msra.mxu0 %v5055_v52  ;;  %v1869_v45 = vand.u32 4294901760, %v1868_v48  ;;  %v5731_v51 = vand.u32 4294901760, %v4572_v3 }
 0x155   :  { %v5732_v0 = vand.u32 4294901760, %v4577_v11  ;;  %v1774_v40 = vand.u32 4294901760, %v1773_v23  ;;  %3320 = vmatpush3.bf16.msra.mxu1 %v3319_v47  ;;  %3282 = vmatprep.subr.bf16.mxu0 %v5061_v63  ;;  %v3323_v39 = vpack.c.bf16 %v1855_v54, %v1848_v46  ;;  %v5733_v38 = vand.u32 4294901760, %v4791_v26 }
 0x156   :  { %v5087_v22 = vpack.c.bf16 %v5730_v56, %v5729_v33  ;;  %v1875_v32 = vsub.f32 %v4572_v3, %v5731_v51  ;;  %v5734_v17 = vand.u32 4294901760, %v4804_v36  ;;  %v1988_v15 = vand.u32 4294901760, %v1987_v27  ;;  %3322 = vmatprep.subr.bf16.mxu1 %v3321_v18 }
 0x157   :  { %v1882_v55 = vsub.f32 %v4577_v11, %v5732_v0  ;;  %v1995_v48 = vand.u32 4294901760, %v1994_v30  ;;  %v3325_v60 = vpack.c.bf16 %v1981_v14, %v1974_v2  ;;  %v5735_v33 = vand.u32 4294901760, %v4597_v4  ;;  %1558 = vmatmul.mubr.f32.gmra.mrb[10].mxu0 %v5723_v34 }
 0x158   :  { %v5102_v6 = vpack.c.bf16 %v5734_v17, %v5733_v38  ;;  %v5736_v23 = vand.u32 4294901760, %v4602_v50  ;;  %v5737_v26 = vand.u32 4294901760, %v4829_v1  ;;  %v5738_v36 = vand.u32 4294901760, %v4842_v43  ;;  %3284 = vmatpush3.bf16.msra.mxu0 %v5087_v22  ;;  %1775 = vmatprep.mubr.f32.mxu0 %v1774_v40 }
 0x159   :  { %v2001_v56 = vsub.f32 %v4597_v4, %v5735_v33  ;;  %v3327_v54 = vpack.c.bf16 %v1869_v45, %v1862_v62  ;;  %v5739_v14 = vand.u32 4294901760, %v4861_v58  ;;  %v5740_v27 = vand.u32 4294901760, %v4863_v28  ;;  %3324 = vmatpush3.bf16.msra.mxu1 %v3323_v39 }
 0x15a   :  { %v2008_v47 = vsub.f32 %v4602_v50, %v5736_v23  ;;  %v5115_v46 = vpack.c.bf16 %v5738_v36, %v5737_v26  ;;  %v1876_v18 = vand.u32 4294901760, %v1875_v32  ;;  %v1883_v2 = vand.u32 4294901760, %v1882_v55  ;;  %3286 = vmatprep.subr.bf16.mxu0 %v5102_v6  ;;  %3326 = vmatprep.subr.bf16.mxu1 %v3325_v60  ;;  %v684_v26 = vld [vmem:[#allocation2 + $0x38] sm:$0xff] }
 0x15b   :  { %v5122_v30 = vpack.c.bf16 %v5740_v27, %v5739_v14  ;;  %v3329_v1 = vpack.c.bf16 %v1995_v48, %v1988_v15  ;;  %v5741_v43 = vand.u32 4294901760, %v4617_v44  ;;  %v5742_v51 = vand.u32 4294901760, %v4626_v16  ;;  %v679_v14 = vld [vmem:[#allocation2 + $0x10] sm:$0xff] }
 0x15c   :  { %v2002_v58 = vand.u32 4294901760, %v2001_v56  ;;  %v2009_v28 = vand.u32 4294901760, %v2008_v47  ;;  %v5743_v45 = vand.u32 4294901760, %v4645_v61  ;;  %v5744_v0 = vand.u32 4294901760, %v4650_v59  ;;  %3288 = vmatpush3.bf16.msra.mxu0 %v5115_v46 }
 0x15d   :  { %v1889_v34 = vsub.f32 %v4617_v44, %v5741_v43  ;;  %v1896_v62 = vsub.f32 %v4626_v16, %v5742_v51  ;;  %v5745_v40 = vand.u32 4294901760, %v4893_v41  ;;  %v5746_v39 = vand.u32 4294901760, %v4895_v42  ;;  %3328 = vmatpush3.bf16.msra.mxu1 %v3327_v54  ;;  %3290 = vmatprep.subr.bf16.mxu0 %v5122_v30  ;;  %v5754_v43 = vld [vmem:[#allocation25_spill] sm:$0xff] }
 0x15e   :  { %v2015_v32 = vsub.f32 %v4645_v61, %v5743_v45  ;;  %v2022_v55 = vsub.f32 %v4650_v59, %v5744_v0  ;;  %v3331_v17 = vpack.c.bf16 %v1883_v2, %v1876_v18  ;;  %v5747_v15 = vand.u32 4294901760, %v4903_v13  ;;  %3330 = vmatprep.subr.bf16.mxu1 %v3329_v1  ;;  %v683_v1 = vld [vmem:[#allocation2 + $0x30] sm:$0xff] }
 0x15f   :  { %v5142_v38 = vpack.c.bf16 %v5746_v39, %v5745_v40  ;;  %v5748_v48 = vand.u32 4294901760, %v4905_v53  ;;  %v1890_v33 = vand.u32 4294901760, %v1889_v34  ;;  %v1897_v56 = vand.u32 4294901760, %v1896_v62 }
 0x160   :  { %v5749_v23 = vand.u32 4294901760, %v4669_v25  ;;  %v5750_v42 = vand.u32 4294901760, %v4674_v9  ;;  %v3333_v13 = vpack.c.bf16 %v2009_v28, %v2002_v58  ;;  %v2016_v36 = vand.u32 4294901760, %v2015_v32 }
 0x161   :  { %v5148_v60 = vpack.c.bf16 %v5748_v48, %v5747_v15  ;;  %v2023_v53 = vand.u32 4294901760, %v2022_v55  ;;  %3292 = vmatpush3.bf16.msra.mxu0 %v5142_v38  ;;  %v5751_v54 = vand.u32 4294901760, %v4915_v37  ;;  %v5752_v27 = vand.u32 4294901760, %v4924_v12  ;;  %3332 = vmatpush3.bf16.msra.mxu1 %v3331_v17  ;;  %v5758_v55 = vld [vmem:[#allocation21_spill] sm:$0xff]  ;;  %v5760_v48 = vld [vmem:[#allocation14_spill] sm:$0xff] }
 0x162   :  { %v1903_v41 = vsub.f32 %v4669_v25, %v5749_v23  ;;  %v1910_v47 = vsub.f32 %v4674_v9, %v5750_v42  ;;  %v5753_v2 = vand.u32 4294901760, %v4939_v10  ;;  %v5755_v34 = vand.u32 4294901760, %v5754_v43  ;;  %3334 = vmatprep.subr.bf16.mxu1 %v3333_v13  ;;  %v5756_v10 = vld [vmem:[#allocation13_spill] sm:$0xff] }
 0x163   :  { %v5162_v18 = vpack.c.bf16 %v5752_v27, %v5751_v54  ;;  %v5170_v62 = vand.u32 4294901760, %v684_v26  ;;  %3294 = vmatprep.subr.bf16.mxu0 %v5148_v60  ;;  %v3335_v58 = vpack.c.bf16 %v1897_v56, %v1890_v33  ;;  %v5173_v37 = vand.u32 4294901760, %v679_v14  ;;  %v5762_v56 = vld [vmem:[#allocation15_spill] sm:$0xff] }
 0x164   :  { %v5168_v51 = vpack.c.bf16 %v5755_v34, %v5753_v2  ;;  %v1904_v28 = vand.u32 4294901760, %v1903_v41  ;;  %v1911_v45 = vand.u32 4294901760, %v1910_v47  ;;  %v3337_v12 = vpack.c.bf16 %v2023_v53, %v2016_v36  ;;  %v5766_v36 = vld [vmem:[#allocation17_spill] sm:$0xff]  ;;  %v5768_v2 = vld [vmem:[#allocation35_spill] sm:$0xff]  ;;  %v5770_v34 = vld [vmem:[#allocation36_spill] sm:$0xff] }
 0x165   :  { %v5175_v32 = vand.u32 4294901760, %v683_v1  ;;  %3296 = vmatpush3.bf16.msra.mxu0 %v5162_v18  ;;  %v5757_v0 = vand.u32 4294901760, %v5756_v10  ;;  %v5759_v40 = vand.u32 4294901760, %v5758_v55  ;;  %v5185_v17 = vsub.f32 %v684_v26, %v5170_v62  ;;  %3336 = vmatpush3.bf16.msra.mxu1 %v3335_v58  ;;  %v5764_v26 = vld [vmem:[#allocation16_spill] sm:$0xff]  ;;  %v5774_v10 = vld [vmem:[#allocation38_spill] sm:$0xff] }
 0x166   :  { %3298 = vmatprep.subr.bf16.mxu0 %v5168_v51  ;;  %v3339_v15 = vpack.c.bf16 %v1911_v45, %v1904_v28  ;;  %v5761_v33 = vand.u32 4294901760, %v5760_v48  ;;  %v5763_v23 = vand.u32 4294901760, %v5762_v56  ;;  %v5195_v42 = vsub.f32 %v679_v14, %v5173_v37  ;;  %3338 = vmatprep.subr.bf16.mxu1 %v3337_v12  ;;  %v5772_v45 = vld [vmem:[#allocation37_spill] sm:$0xff]  ;;  %v5776_v48 = vld [vmem:[#allocation43_spill] sm:$0xff] }
 0x167   :  { %v5182_v39 = vpack.c.bf16 %v5759_v40, %v5757_v0  ;;  %v5198_v47 = vsub.f32 %v683_v1, %v5175_v32  ;;  %v5765_v13 = vand.u32 4294901760, %v5764_v26  ;;  %v5767_v53 = vand.u32 4294901760, %v5766_v36  ;;  %v5778_v26 = vld [vmem:[#allocation46_spill] sm:$0xff] }
 0x168   :  { %v5192_v41 = vpack.c.bf16 %v5763_v23, %v5761_v33  ;;  %v5524_v27 = vand.u32 4294901760, %v5185_v17  ;;  %v1778_v14 = vand.u32 4294901760, %v5195_v42  ;;  %v5769_v43 = vand.u32 4294901760, %v5768_v2  ;;  %v5777_v33 = vld [vmem:[#allocation44_spill] sm:$0xff] }
 0x169   :  { %3300 = vmatpush3.bf16.msra.mxu0 %v5182_v39  ;;  %v5205_v54 = vpack.c.bf16 %v5767_v53, %v5765_v13  ;;  %3340 = vmatpush3.bf16.msra.mxu1 %v3339_v15  ;;  %v5771_v1 = vand.u32 4294901760, %v5770_v34  ;;  %v5523_v28 = vand.u32 4294901760, %v5198_v47  ;;  %v5773_v12 = vand.u32 4294901760, %v5772_v45  ;;  %v5779_v13 = vld [vmem:[#allocation47_spill] sm:$0xff]  ;;  %v5781_v34 = vld [vmem:[#allocation48_spill] sm:$0xff] }
 0x16a   :  { %3302 = vmatprep.subr.bf16.mxu0 %v5192_v41  ;;  %3374 = vmatprep.subr.bf16.mxu1 %v5027_v19  ;;  %v5775_v0 = vand.u32 4294901760, %v5774_v10  ;;  %v1788_v40 = vsub.f32 %v5185_v17, %v5524_v27  ;;  %v1779_v15 = vsub.f32 %v5195_v42, %v1778_v14  ;;  %v3341_v56 = vpack.c.bf16 %v5777_v33, %v5776_v48  ;;  %v5783_v10 = vld [vmem:[#allocation50_spill] sm:$0xff]  ;;  %v5786_v27 = vld [vmem:[#allocation51_spill] sm:$0xff] }
 0x16b   :  { %v5215_v58 = vpack.c.bf16 %v5771_v1, %v5769_v43  ;;  %v1794_v23 = vsub.f32 %v5198_v47, %v5523_v28  ;;  %v3343_v36 = vpack.c.bf16 %v5779_v13, %v5778_v26  ;;  %v5780_v2 = vand.u32 4294901760, %v4999_v31  ;;  %v5782_v1 = vld [vmem:[#allocation49_spill] sm:$0xff] }
 0x16c   :  { %2028 = vmatmul.mubr.f32.vlgmr.msra.gmra.mrb[12].mxu1 %v5173_v37  ;;  %v5224_v55 = vpack.c.bf16 %v5775_v0, %v5773_v12  ;;  %v1789_v53 = vand.u32 4294901760, %v1788_v40  ;;  %v1780_v43 = vand.u32 4294901760, %v1779_v15  ;;  %v3345_v45 = vpack.c.bf16 %v5782_v1, %v5781_v34  ;;  %v5784_v0 = vld [vmem:[#allocation22_spill] sm:$0xff]  ;;  %v5785_v40 = vld [vmem:[#allocation23_spill] sm:$0xff]  ;;  %v5787_v15 = vld [vmem:[#allocation24_spill] sm:$0xff] }
 0x16d   :  { %3304 = vmatpush3.bf16.msra.mxu0 %v5205_v54  ;;  %3376 = vmatpush3.bf16.msra.mxu1 %v5055_v52  ;;  %v1795_v12 = vand.u32 4294901760, %v1794_v23  ;;  %v3347_v28 = vpack.c.bf16 %v5784_v0, %v5783_v10 }
 0x16e   :  { %2033 = vmatprep.mubr.f32.mxu1 %v5170_v62  ;;  %3306 = vmatprep.subr.bf16.mxu0 %v5215_v58 }
 0x16f   :  { %3378 = vmatprep.subr.bf16.mxu1 %v5061_v63 }
 0x170   :  { %2035 = vmatmul.mubr.f32.gmra.mrb[14].mxu1 %v5175_v32 }
 0x171   :  { %3308 = vmatpush3.bf16.msra.mxu0 %v5224_v55  ;;  %3380 = vmatpush3.bf16.msra.mxu1 %v5087_v22 }
 0x172   :  { %2286 = vmatprep.mubr.f32.mxu1 %v5780_v2  ;;  %3342 = vmatprep.subr.bf16.mxu0 %v3341_v56  ;;  %v3349_v2 = vpack.c.bf16 %v5786_v27, %v5785_v40  ;;  %v5788_v56 = vld [vmem:[#allocation18_spill] sm:$0xff] }
 0x173   :  { %3382 = vmatprep.subr.bf16.mxu1 %v5102_v6  ;;  %v3351_v23 = vpack.c.bf16 %v5788_v56, %v5787_v15 }
 0x174   :  { %1781 = vmatmul.mubr.f32.vlgmr.msra.gmra.mrb[12].mxu0 %v1780_v43  ;;  %v3355_v43 = vpack.c.bf16 %v4964_v29, %v4959_v24 }
 0x175   :  { %3344 = vmatpush3.bf16.msra.mxu0 %v3343_v36  ;;  %1790 = vmatprep.mubr.f32.mxu0 %v1789_v53  ;;  %v5789_v36 = vld [vmem:[#allocation19_spill] sm:$0xff] }
 0x176   :  { %3384 = vmatpush3.bf16.msra.mxu1 %v5115_v46  ;;  %3346 = vmatprep.subr.bf16.mxu0 %v3345_v45  ;;  %v3353_v53 = vpack.c.bf16 %v4935_v20, %v5789_v36  ;;  %v3361_v45 = vpack.c.bf16 %v5013_v8, %v5008_v57 }
 0x177   :  { %3386 = vmatprep.subr.bf16.mxu1 %v5122_v30 }
 0x178   :  { %1796 = vmatmul.mubr.f32.gmra.mrb[14].mxu0 %v1795_v12  ;;  %v3363_v12 = vpack.c.bf16 %v4577_v11, %v4572_v3  ;;  %v3369_v11 = vpack.c.bf16 %v4650_v59, %v4645_v61  ;;  %v5792_v3 = vand.u32 4294901760, %v5777_v33  ;;  %v5794_v61 = vand.u32 4294901760, %v5778_v26 }
 0x179   :  { %3348 = vmatpush3.bf16.msra.mxu0 %v3347_v28  ;;  %2170 = vmatprep.mubr.f32.mxu0 %v4999_v31  ;;  %v3357_v31 = vpack.c.bf16 %v4979_v5, %v4974_v7  ;;  %v3359_v28 = vpack.c.bf16 %v4996_v35, %v4987_v21  ;;  %v5800_v33 = vand.u32 4294901760, %v5785_v40  ;;  %v5801_v26 = vand.u32 4294901760, %v5786_v27 }
 0x17a   :  { %3388 = vmatpush3.bf16.msra.mxu1 %v5142_v38  ;;  %3350 = vmatprep.subr.bf16.mxu0 %v3349_v2  ;;  %v3365_v2 = vpack.c.bf16 %v4602_v50, %v4597_v4  ;;  %v3371_v50 = vpack.c.bf16 %v4674_v9, %v4669_v25  ;;  %v5790_v4 = vand.u32 4294901760, %v5185_v17  ;;  %v5795_v25 = vand.u32 4294901760, %v5779_v13 }
 0x17b   :  { %3390 = vmatprep.subr.bf16.mxu1 %v5148_v60  ;;  %v3413_v13 = vpack.c.bf16 %v5801_v26, %v5800_v33  ;;  %v5805_v27 = vand.u32 4294901760, %v4935_v20  ;;  %v5810_v20 = vand.u32 4294901760, %v4987_v21  ;;  %v5814_v21 = vld [vmem:[#allocation39_spill] sm:$0xff] }
 0x17c   :  { %v3407_v9 = vpack.c.bf16 %v5795_v25, %v5794_v61 }
 0x17d   :  { %3352 = vmatpush3.bf16.msra.mxu0 %v3351_v23  ;;  %v3367_v23 = vpack.c.bf16 %v4626_v16, %v4617_v44  ;;  %v5791_v16 = vand.u32 4294901760, %v5776_v48  ;;  %v5793_v44 = vand.u32 4294901760, %v5198_v47  ;;  %v5799_v48 = vand.u32 4294901760, %v5784_v0 }
 0x17e   :  { %3392 = vmatpush3.bf16.msra.mxu1 %v5162_v18  ;;  %3354 = vmatprep.subr.bf16.mxu0 %v3353_v53 }
 0x17f   :  { %3394 = vmatprep.subr.bf16.mxu1 %v5168_v51  ;;  %v3405_v59 = vpack.c.bf16 %v5792_v3, %v5791_v16 }
 0x181   :  { %3356 = vmatpush3.bf16.msra.mxu0 %v3355_v43 }
 0x182   :  { %3396 = vmatpush3.bf16.msra.mxu1 %v5182_v39  ;;  %3358 = vmatprep.subr.bf16.mxu0 %v3357_v31 }
 0x183   :  { %3398 = vmatprep.subr.bf16.mxu1 %v5192_v41 }
 0x185   :  { %3360 = vmatpush3.bf16.msra.mxu0 %v3359_v28 }
 0x186   :  { %3400 = vmatpush3.bf16.msra.mxu1 %v5205_v54  ;;  %3362 = vmatprep.subr.bf16.mxu0 %v3361_v45 }
 0x187   :  { %3402 = vmatprep.subr.bf16.mxu1 %v5215_v58 }
 0x189   :  { %3364 = vmatpush3.bf16.msra.mxu0 %v3363_v12 }
 0x18a   :  { %3404 = vmatpush3.bf16.msra.mxu1 %v5224_v55  ;;  %3366 = vmatprep.subr.bf16.mxu0 %v3365_v2 }
 0x18b   :  { %3438 = vmatprep.subr.bf16.mxu1 %v5027_v19  ;;  %v5796_v19 = vand.u32 4294901760, %v5781_v34 }
 0x18d   :  { %2290 = vmatmul.mubr.f32.vlgmr.msra.gmra.mrb[16].mxu1 %v1778_v14  ;;  %3368 = vmatpush3.bf16.msra.mxu0 %v3367_v23  ;;  %v5798_v14 = vand.u32 4294901760, %v5783_v10 }
 0x18e   :  { %2297 = vmatprep.mubr.f32.mxu1 %v5790_v4  ;;  %3440 = vmatpush3.bf16.msra.mxu1 %v5055_v52  ;;  %v5797_v52 = vand.u32 4294901760, %v5782_v1  ;;  %v5808_v1 = vand.u32 4294901760, %v4974_v7  ;;  %v5815_v7 = vld [vmem:[#allocation40_spill] sm:$0xff] }
 0x18f   :  { %3370 = vmatprep.subr.bf16.mxu0 %v3369_v11  ;;  %3442 = vmatprep.subr.bf16.mxu1 %v5061_v63 }
 0x190   :  { %v3409_v63 = vpack.c.bf16 %v5797_v52, %v5796_v19 }
 0x191   :  { %2301 = vmatmul.mubr.f32.gmra.mrb[18].mxu1 %v5793_v44  ;;  %3372 = vmatpush3.bf16.msra.mxu0 %v3371_v50 }
 0x192   :  { %3444 = vmatpush3.bf16.msra.mxu1 %v5087_v22  ;;  %2578 = vmatprep.mubr.f32.mxu1 %v4953_v49  ;;  %v3411_v22 = vpack.c.bf16 %v5799_v48, %v5798_v14 }
 0x193   :  { %3406 = vmatprep.subr.bf16.mxu0 %v3405_v59  ;;  %3446 = vmatprep.subr.bf16.mxu1 %v5102_v6  ;;  %v5802_v6 = vand.u32 4294901760, %v5787_v15 }
 0x194   :  { %2173 = vmatmul.mubr.f32.vlgmr.msra.gmra.mrb[16].mxu0 %v5195_v42 }
 0x195   :  { %2179 = vmatprep.mubr.f32.mxu0 %v5185_v17  ;;  %3408 = vmatpush3.bf16.msra.mxu0 %v3407_v9  ;;  %v5803_v17 = vand.u32 4294901760, %v5788_v56 }
 0x196   :  { %3448 = vmatpush3.bf16.msra.mxu1 %v5115_v46  ;;  %3410 = vmatprep.subr.bf16.mxu0 %v3409_v63  ;;  %v5804_v46 = vand.u32 4294901760, %v5789_v36 }
 0x197   :  { %3450 = vmatprep.subr.bf16.mxu1 %v5122_v30  ;;  %v3415_v42 = vpack.c.bf16 %v5803_v17, %v5802_v6  ;;  %v5806_v30 = vand.u32 4294901760, %v4959_v24  ;;  %v5812_v24 = vand.u32 4294901760, %v5008_v57  ;;  %v5818_v57 = vld [vmem:[#allocation45_spill] sm:$0xff] }
 0x198   :  { %2182 = vmatmul.mubr.f32.gmra.mrb[18].mxu0 %v5198_v47  ;;  %v3417_v34 = vpack.c.bf16 %v5805_v27, %v5804_v46 }
 0x199   :  { %3412 = vmatpush3.bf16.msra.mxu0 %v3411_v22  ;;  %2467 = vmatprep.mubr.f32.mxu0 %v4953_v49  ;;  %v5807_v49 = vand.u32 4294901760, %v4964_v29  ;;  %v5813_v29 = vand.u32 4294901760, %v5013_v8 }
 0x19a   :  { %3452 = vmatpush3.bf16.msra.mxu1 %v5142_v38  ;;  %3414 = vmatprep.subr.bf16.mxu0 %v3413_v13  ;;  %v5809_v38 = vand.u32 4294901760, %v4979_v5  ;;  %v5816_v5 = vld [vmem:[#allocation41_spill] sm:$0xff] }
 0x19b   :  { %3454 = vmatprep.subr.bf16.mxu1 %v5148_v60  ;;  %v3419_v47 = vpack.c.bf16 %v5807_v49, %v5806_v30  ;;  %v5811_v60 = vand.u32 4294901760, %v4996_v35  ;;  %v5817_v35 = vld [vmem:[#allocation42_spill] sm:$0xff] }
 0x19c   :  { %v3421_v10 = vpack.c.bf16 %v5809_v38, %v5808_v1 }
 0x19d   :  { %3416 = vmatpush3.bf16.msra.mxu0 %v3415_v42  ;;  %v3423_v0 = vpack.c.bf16 %v5811_v60, %v5810_v20 }
 0x19e   :  { %3456 = vmatpush3.bf16.msra.mxu1 %v5162_v18  ;;  %3418 = vmatprep.subr.bf16.mxu0 %v3417_v34  ;;  %v3425_v18 = vpack.c.bf16 %v5813_v29, %v5812_v24 }
 0x19f   :  { %3458 = vmatprep.subr.bf16.mxu1 %v5168_v51 }
 0x1a1   :  { %3420 = vmatpush3.bf16.msra.mxu0 %v3419_v47 }
 0x1a2   :  { %3460 = vmatpush3.bf16.msra.mxu1 %v5182_v39  ;;  %3422 = vmatprep.subr.bf16.mxu0 %v3421_v10 }
 0x1a3   :  { %3462 = vmatprep.subr.bf16.mxu1 %v5192_v41 }
 0x1a5   :  { %3424 = vmatpush3.bf16.msra.mxu0 %v3423_v0 }
 0x1a6   :  { %3464 = vmatpush3.bf16.msra.mxu1 %v5205_v54  ;;  %3426 = vmatprep.subr.bf16.mxu0 %v3425_v18  ;;  %v2628_v54 = vld [vmem:[%s5391_s2] ss:$0 sm:$0xff]  ;;  %s3584_s2 = smov [#allocation8]  }
 0x1a7   :  { %3466 = vmatprep.subr.bf16.mxu1 %v5215_v58  ;;  %s2599_s14 = sshll.u32 %s3584_s2, 4  ;;  %s2600_s14 = int_to_ptr.vmem [resolvable:$true] %s2599_s14 }
 0x1a8   :  { %s3543_s15 = scalar_lea.vmem %s2600_s14, 256  ;;  %p3548_p3 = scmp.lt.s32.totalorder %s2600_s14, %s2600_s14 }
 0x1a9   :  { %3428 = vmatpush3.bf16.msra.mxu0 %v5814_v21  ;;  %p3544_p2 = scmp.ne.s32.totalorder %s2600_s14, %s3543_s15  ;;  %p3549_p4 = scmp.lt.s32.totalorder %s3543_s15, %s3543_s15 }
 0x1aa   :  { %3468 = vmatpush3.bf16.msra.mxu1 %v5224_v55  ;;  %3430 = vmatprep.subr.bf16.mxu0 %v5815_v7 }
 0x1ab   :  { %p3550_p5 = por %p3549_p4, %p3548_p3 }
 0x1ad   :  { %2580 = vmatmul.mubr.f32.vlgmr.msra.gmra.mrb[20].mxu1 %v5173_v37  ;;  %3432 = vmatpush3.bf16.msra.mxu0 %v5816_v5  ;;  %p3551_p6 = pnand %p3550_p5, %p3544_p2 }
 0x1ae   :  { %2585 = vmatprep.mubr.f32.mxu1 %v5170_v62  ;;  %3434 = vmatprep.subr.bf16.mxu0 %v5817_v35 }
 0x1b1   :  { %2587 = vmatmul.mubr.f32.gmra.mrb[22].mxu1 %v5175_v32  ;;  %3436 = vmatpush3.bf16.msra.mxu0 %v5818_v57 }
 0x1b4   :  { %2469 = vmatmul.mubr.f32.vlgmr.msra.gmra.mrb[20].mxu0 %v5173_v37 }
 0x1b5   :  { %2474 = vmatprep.mubr.f32.mxu0 %v5170_v62 }
 0x1b8   :  { %2476 = vmatmul.mubr.f32.gmra.mrb[22].mxu0 %v5175_v32 }
 0x1da   :  { %v2699_v8 = vpop.f32.mrb[0].mxu1 }
 0x1db   :  { %v2700_v51 = vpop.f32.mrb[1].mxu1 }
 0x1dc   :  { %v2701_v39 = vadd.f32 %v2700_v51, %v2699_v8 }
 0x1e2   :  { %v2661_v41 = vpop.f32.mrb[0].mxu0 }
 0x1e3   :  { %v2662_v58 = vpop.f32.mrb[1].mxu0 }
 0x1e4   :  { %v2663_v55 = vadd.f32 %v2662_v58, %v2661_v41 }
 0x1e6   :  { %v865_v40 = vadd.f32 %v2663_v55, %v2628_v54 }
 0x1e8   :  { %v2702_v15 = vpop.f32.mrb[2].mxu1  ;;  %v1112_v36 = vadd.f32 %v2701_v39, %v865_v40 }
 0x1e9   :  { %v2703_v56 = vpop.f32.mrb[3].mxu1 }
 0x1ea   :  { %v2704_v53 = vadd.f32 %v2703_v56, %v2702_v15 }
 0x1f0   :  { %v2664_v37 = vpop.f32.mrb[2].mxu0 }
 0x1f1   :  { %v2665_v43 = vpop.f32.mrb[3].mxu0 }
 0x1f2   :  { %v2666_v62 = vadd.f32 %v2665_v43, %v2664_v37 }
 0x1f4   :  { %v880_v31 = vadd.f32 %v2666_v62, %v2628_v54 }
 0x1f6   :  { %v1119_v32 = vadd.f32 %v2704_v53, %v880_v31 }
 0x1fc   :  { %v2775_v28 = vpop.f32.mrb[4].mxu1 }
 0x1fd   :  { %v2776_v45 = vpop.f32.mrb[5].mxu1 }
 0x1fe   :  { %v2777_v12 = vadd.f32 %v2776_v45, %v2775_v28 }
 0x201   :  { %v2778_v2 = vpop.f32.mrb[6].mxu1 }
 0x202   :  { %v2779_v23 = vpop.f32.mrb[7].mxu1 }
 0x203   :  { %v2780_v11 = vadd.f32 %v2779_v23, %v2778_v2 }
 0x205   :  { %v2737_v50 = vpop.f32.mrb[4].mxu0 }
 0x206   :  { %v2738_v4 = vpop.f32.mrb[5].mxu0 }
 0x207   :  { %v2739_v16 = vadd.f32 %v2738_v4, %v2737_v50 }
 0x209   :  { %v1257_v3 = vadd.f32 %v2739_v16, %v1112_v36  ;;  %v2740_v59 = vpop.f32.mrb[6].mxu0 }
 0x20a   :  { %v2741_v44 = vpop.f32.mrb[7].mxu0 }
 0x20b   :  { %v2742_v61 = vadd.f32 %v2741_v44, %v2740_v59  ;;  %v1374_v25 = vadd.f32 %v2777_v12, %v1257_v3 }
 0x20d   :  { %v1266_v9 = vadd.f32 %v2742_v61, %v1119_v32 }
 0x20f   :  { %v1385_v19 = vadd.f32 %v2780_v11, %v1266_v9 }
 0x21e   :  { %v2851_v52 = vpop.f32.mrb[8].mxu1 }
 0x21f   :  { %v2852_v63 = vpop.f32.mrb[9].mxu1 }
 0x220   :  { %v2853_v14 = vadd.f32 %v2852_v63, %v2851_v52 }
 0x222   :  { %v2854_v48 = vpop.f32.mrb[10].mxu1 }
 0x223   :  { %v2855_v22 = vpop.f32.mrb[11].mxu1 }
 0x224   :  { %v2856_v33 = vadd.f32 %v2855_v22, %v2854_v48 }
 0x226   :  { %v2813_v26 = vpop.f32.mrb[8].mxu0 }
 0x227   :  { %v2814_v13 = vpop.f32.mrb[9].mxu0 }
 0x228   :  { %v2815_v6 = vadd.f32 %v2814_v13, %v2813_v26 }
 0x22a   :  { %v1553_v17 = vadd.f32 %v2815_v6, %v1374_v25  ;;  %v2816_v42 = vpop.f32.mrb[10].mxu0 }
 0x22b   :  { %v2817_v46 = vpop.f32.mrb[11].mxu0 }
 0x22c   :  { %v2818_v27 = vadd.f32 %v2817_v46, %v2816_v42  ;;  %v1664_v34 = vadd.f32 %v2853_v14, %v1553_v17 }
 0x22e   :  { %v1560_v30 = vadd.f32 %v2818_v27, %v1385_v19 }
 0x230   :  { %v1671_v49 = vadd.f32 %v2856_v33, %v1560_v30 }
 0x23f   :  { %v2927_v47 = vpop.f32.mrb[12].mxu1 }
 0x240   :  { %v2928_v1 = vpop.f32.mrb[13].mxu1 }
 0x241   :  { %v2929_v38 = vadd.f32 %v2928_v1, %v2927_v47 }
 0x243   :  { %v2930_v10 = vpop.f32.mrb[14].mxu1 }
 0x244   :  { %v2931_v20 = vpop.f32.mrb[15].mxu1 }
 0x245   :  { %v2932_v60 = vadd.f32 %v2931_v20, %v2930_v10 }
 0x247   :  { %v2889_v0 = vpop.f32.mrb[12].mxu0 }
 0x248   :  { %v2890_v24 = vpop.f32.mrb[13].mxu0 }
 0x249   :  { %v2891_v29 = vadd.f32 %v2890_v24, %v2889_v0 }
 0x24b   :  { %v1783_v18 = vadd.f32 %v2891_v29, %v1664_v34  ;;  %v2892_v21 = vpop.f32.mrb[14].mxu0 }
 0x24c   :  { %v2893_v7 = vpop.f32.mrb[15].mxu0 }
 0x24d   :  { %v2894_v5 = vadd.f32 %v2893_v7, %v2892_v21  ;;  %v2030_v35 = vadd.f32 %v2929_v38, %v1783_v18 }
 0x24f   :  { %v1798_v57 = vadd.f32 %v2894_v5, %v1671_v49 }
 0x251   :  { %v2037_v8 = vadd.f32 %v2932_v60, %v1798_v57 }
 0x260   :  { %v3003_v51 = vpop.f32.mrb[16].mxu1 }
 0x261   :  { %v3004_v39 = vpop.f32.mrb[17].mxu1 }
 0x262   :  { %v3005_v41 = vadd.f32 %v3004_v39, %v3003_v51 }
 0x264   :  { %v3006_v54 = vpop.f32.mrb[18].mxu1 }
 0x265   :  { %v3007_v58 = vpop.f32.mrb[19].mxu1 }
 0x266   :  { %v3008_v55 = vadd.f32 %v3007_v58, %v3006_v54 }
 0x267   :  { %v2965_v40 = vpop.f32.mrb[16].mxu0 }
 0x268   :  { %v2966_v15 = vpop.f32.mrb[17].mxu0 }
 0x269   :  { %v2967_v56 = vadd.f32 %v2966_v15, %v2965_v40 }
 0x26b   :  { %v2175_v36 = vadd.f32 %v2967_v56, %v2030_v35  ;;  %v2968_v53 = vpop.f32.mrb[18].mxu0 }
 0x26c   :  { %v2969_v37 = vpop.f32.mrb[19].mxu0 }
 0x26d   :  { %v2970_v43 = vadd.f32 %v2969_v37, %v2968_v53  ;;  %v2292_v62 = vadd.f32 %v3005_v41, %v2175_v36 }
 0x26f   :  { %v2184_v31 = vadd.f32 %v2970_v43, %v2037_v8 }
 0x271   :  { %v2303_v32 = vadd.f32 %v3008_v55, %v2184_v31 }
 0x280   :  { %v3079_v28 = vpop.f32.mrb[20].mxu1 }
 0x281   :  { %v3080_v45 = vpop.f32.mrb[21].mxu1 }
 0x282   :  { %v3081_v12 = vadd.f32 %v3080_v45, %v3079_v28 }
 0x284   :  { %v3082_v2 = vpop.f32.mrb[22].mxu1 }
 0x285   :  { %v3083_v23 = vpop.f32.mrb[23].mxu1 }
 0x286   :  { %v3084_v11 = vadd.f32 %v3083_v23, %v3082_v2 }
 0x287   :  { %v3041_v50 = vpop.f32.mrb[20].mxu0 }
 0x288   :  { %v3042_v4 = vpop.f32.mrb[21].mxu0 }
 0x289   :  { %v3043_v16 = vadd.f32 %v3042_v4, %v3041_v50 }
 0x28b   :  { %v2471_v3 = vadd.f32 %v3043_v16, %v2292_v62  ;;  %v3044_v59 = vpop.f32.mrb[22].mxu0 }
 0x28c   :  { %v3045_v44 = vpop.f32.mrb[23].mxu0 }
 0x28d   :  { %v2582_v61 = vadd.f32 %v3081_v12, %v2471_v3  ;;  %v3046_v25 = vadd.f32 %v3045_v44, %v3044_v59 }
 0x28f   :  { %2592 = vst [vmem:[#allocation8] sm:$0xff] %v2582_v61  ;;  %v2478_v9 = vadd.f32 %v3046_v25, %v2303_v32 }
 0x291   :  { %v2589_v19 = vadd.f32 %v3084_v11, %v2478_v9 }
 0x293   :  { %2593 = vst [vmem:[#allocation8 + $0x8] sm:$0xff] %v2589_v19 }
 0x294   :  { %3554 = shalt.err (!%p3551_p6)
}
 0x295   :  { %s3555_s18 = scalar_lea.hbm %s5392_s3, 256 }
 0x296   :  { %p3556_p7 = scmp.ne.s32.totalorder %s5392_s3, %s3555_s18  ;;  %p3559_p8 = scmp.lt.u32.totalorder %s3555_s18, %s5392_s3 }
 0x298   :  { %p3561_p9 = pnand %p3559_p8, %p3556_p7 }
 0x29a   :  { %3564 = shalt.err (!%p3561_p9)
}
 0x29b   :  { %2605 = dma.vmem_to_hbm [thread:$0]  %s2600_s14, 256, %s5392_s3, [#allocation5], %s3572_s22, %s3572_s22, %s3573_s23  }
 0x29c   :  { %3569 = dma.done.wait [#allocation5], 256  }
 0x29d   :  { %3570 = vsyncadd [#allocation5], 4294967040 }
 0x29e   :  { %2609 = vsyncpa [#allocation4], 1 }
 0x29f   :  { %2610 = vsyncpa [#allocation7], 1 }
 0x2a0   :  { %2611 = vsyncpa [#allocation5], 1 }

// kernel: tpu_custom_call.1
= control target key start
LH: loop header
LB: loop body
LE: loop exit
PB: predicated region body
PF: predicated region fallthrough
CT: control target
= control target key end

     0   :  { %8 = vsyncpa [#allocation4], 0  ;;  %s5389_s0 = inlined_call_operand.hbm [shape: f32[16,32], index: 0, kind: input, shape index: {}]   ;;  %s5390_s1 = inlined_call_operand.hbm [shape: f32[512,128], index: 1, kind: input, shape index: {}]   ;;  %s5391_s2 = inlined_call_operand.vmem [shape: f32[1,128], index: 2, kind: input, shape index: {}]   ;;  %s5392_s3 = inlined_call_operand.hbm [shape: f32[16,128], index: 3, kind: output, shape index: {}]  }
   0x1   :  { %9 = vsyncpa [#allocation7], 0 }
   0x2   :  { %10 = vsyncpa [#allocation5], 0  ;;  %s3571_s12 = smov [#allocation3]   ;;  %s3499_s16 = scalar_lea.hbm %s5389_s0, 256 }
   0x3   :  { %s16_s13 = sshll.u32 %s3571_s12, 4  ;;  %p3500_p0 = scmp.ne.s32.totalorder %s5389_s0, %s3499_s16  ;;  %s17_s13 = int_to_ptr.vmem [resolvable:$true] %s16_s13 }
   0x4   :  { %p3503_p1 = scmp.lt.u32.totalorder %s3499_s16, %s5389_s0 }
   0x6   :  { %p3505_p2 = pnand %p3503_p1, %p3500_p0 }
   0x8   :  { %3508 = shalt.err (!%p3505_p2)
}
   0x9   :  { %s3509_s21 = scalar_lea.vmem %s17_s13, 256  ;;  %p3514_p4 = scmp.lt.s32.totalorder %s17_s13, %s17_s13 }
   0xa   :  { %p3510_p3 = scmp.ne.s32.totalorder %s17_s13, %s3509_s21  ;;  %p3515_p5 = scmp.lt.s32.totalorder %s3509_s21, %s3509_s21 }
   0xc   :  { %p3516_p6 = por %p3515_p5, %p3514_p4 }
   0xe   :  { %p3517_p7 = pnand %p3516_p6, %p3510_p3 }
  0x10   :  { %3520 = shalt.err (!%p3517_p7)
}
  0x11   :  { %s3572_s22 = smov 128   ;;  %s3573_s23 = smov 8  }
  0x12   :  { %22 = dma.hbm_to_vmem [thread:$0]  %s5389_s0, 256, %s17_s13, [#allocation4], %s3572_s22, %s3572_s22, %s3573_s23  }
  0x13   :  { %s3574_s26 = smov [#allocation6]   ;;  %s3521_s30 = scalar_lea.hbm %s5390_s1, 8192 }
  0x14   :  { %s28_s27 = sshll.u32 %s3574_s26, 4  ;;  %p3522_p8 = scmp.ne.s32.totalorder %s5390_s1, %s3521_s30  ;;  %s29_s27 = int_to_ptr.vmem [resolvable:$true] %s28_s27 }
  0x15   :  { %p3525_p9 = scmp.lt.u32.totalorder %s3521_s30, %s5390_s1 }
  0x17   :  { %p3527_p10 = pnand %p3525_p9, %p3522_p8 }
  0x19   :  { %3530 = shalt.err (!%p3527_p10)
}
  0x1a   :  { %s3531_s8 = scalar_lea.vmem %s29_s27, 8192  ;;  %p3536_p12 = scmp.lt.s32.totalorder %s29_s27, %s29_s27 }
  0x1b   :  { %p3532_p11 = scmp.ne.s32.totalorder %s29_s27, %s3531_s8  ;;  %p3537_p13 = scmp.lt.s32.totalorder %s3531_s8, %s3531_s8 }
  0x1d   :  { %p3538_p0 = por %p3537_p13, %p3536_p12 }
  0x1f   :  { %p3539_p1 = pnand %p3538_p0, %p3532_p11 }
  0x21   :  { %3542 = shalt.err (!%p3539_p1)
}
  0x22   :  { %34 = dma.hbm_to_vmem [thread:$0]  %s5390_s1, 8192, %s29_s27, [#allocation7], %s3572_s22, %s3572_s22, %s3573_s23  }
  0x23   :  { %3565 = dma.done.wait [#allocation4], 256  }
  0x24   :  { %3566 = vsyncadd [#allocation4], 4294967040 }
  0x25   :  { %3567 = dma.done.wait [#allocation7], 8192  }
  0x26   :  { %3568 = vsyncadd [#allocation7], 4294959104  ;;  %v3635_v0 = vld [vmem:[#allocation3] sm:$0xff]  ;;  %v3637_v1 = vld [vmem:[#allocation3 + $0x8] sm:$0xff]  ;;  %v3575_v47 = vmov 683565275  }
  0x27   :  { %v3639_v2 = vld [vmem:[#allocation6 + $0x80] sm:$0xff]  ;;  %v49_v3 = vand.u32 2147483647, %v3635_v0  ;;  %v52_v4 = vand.u32 2139095040, %v3635_v0  ;;  %v3643_v5 = vld [vmem:[#allocation6 + $0x88] sm:$0xff]  ;;  %v155_v7 = vand.u32 2139095040, %v3637_v1 }
  0x28   :  { %v152_v6 = vand.u32 2147483647, %v3637_v1  ;;  %v3647_v8 = vld [vmem:[#allocation6] sm:$0xff]  ;;  %v805_v11 = vand.u32 4294901760, %v3639_v2  ;;  %v3652_v12 = vld [vmem:[#allocation6 + $0x8] sm:$0xff]  ;;  %v808_v15 = vand.u32 4294901760, %v3643_v5 }
  0x29   :  { %v53_v9 = vshrl.u32 %v52_v4, 23  ;;  %v56_v10 = vand.u32 8388607, %v49_v3  ;;  %v156_v13 = vshrl.u32 %v155_v7, 23  ;;  %v757_v19 = vand.u32 4294901760, %v3647_v8  ;;  %v3675_v27 = vld [vmem:[#allocation6 + $0x90] sm:$0xff] }
  0x2a   :  { %v159_v14 = vand.u32 8388607, %v152_v6  ;;  %v3660_v18 = vsub.f32 %v3639_v2, %v805_v11  ;;  %v3666_v22 = vsub.f32 %v3643_v5, %v808_v15  ;;  %v760_v23 = vand.u32 4294901760, %v3652_v12  ;;  %v3787_v5 = vld [vmem:[#allocation6 + $0xa0] sm:$0xff]  ;;  %s3581_s1 = smov 32   ;;  %s3582_s10 = smov 64  }
  0x2b   :  { %v2612_v16 = vadd.s32 4294967169, %v53_v9  ;;  %v57_v17 = vor.u32 8388608, %v56_v10  ;;  %v2616_v20 = vadd.s32 4294967169, %v156_v13  ;;  %v3673_v26 = vsub.f32 %v3647_v8, %v757_v19  ;;  %s3583_s11 = smov 96  }
  0x2c   :  { %v160_v21 = vor.u32 8388608, %v159_v14  ;;  %v5407_v25 = vand.u32 4294901760, %v3660_v18  ;;  %v5403_v30 = vand.u32 4294901760, %v3666_v22  ;;  %v3683_v31 = vsub.f32 %v3652_v12, %v760_v23 }
  0x2d   :  { %v59_v24 = vadd.s32 1, %v2612_v16  ;;  %v3677_v28 = vshll.u32 %v57_v17, 8  ;;  %v162_v29 = vadd.s32 1, %v2616_v20  ;;  %v5393_v34 = vand.u32 4294901760, %v3673_v26 }
  0x2e   :  { %v3685_v32 = vshll.u32 %v160_v21, 8  ;;  %v3690_v33 = vsub.f32 %v3660_v18, %v5407_v25  ;;  %v3696_v36 = vsub.f32 %v3666_v22, %v5403_v30  ;;  %v811_v37 = vand.u32 4294901760, %v3675_v27  ;;  %v3979_v30 = vld [vmem:[#allocation6 + $0x48] sm:$0xff] }
  0x2f   :  { %vm60_vm0 = vcmp.gt.s32.totalorder %v59_v24, 0  ;;  %vm163_vm1 = vcmp.gt.s32.totalorder %v162_v29, 0  ;;  %v5402_v41 = vand.u32 4294901760, %v3683_v31  ;;  %v3576_v49 = vmov 2475754826  }
  0x30   :  { %v61_v35 = vsel %vm60_vm0, %v59_v24, 0  ;;  %v164_v40 = vsel %vm163_vm1, %v162_v29, 0  ;;  %v1000_v44 = vand.u32 4294901760, %v3690_v33  ;;  %v1007_v45 = vand.u32 4294901760, %v3696_v36  ;;  %v3755_v36 = vld [vmem:[#allocation6 + $0x10] sm:$0xff] }
  0x31   :  { %v62_v38 = vshrl.u32 %v61_v35, 5  ;;  %v63_v39 = vand.u32 31, %v61_v35  ;;  %v3700_v42 = vshrl.u32 %v164_v40, 5  ;;  %v166_v43 = vand.u32 31, %v164_v40 }
  0x32   :  { %v3577_v51 = vmov 2131351028   ;;  %v3578_v53 = vmov 2102212464   ;;  %v3579_v55 = vmov 920167782   ;;  %v3707_v57 = vsub.f32 %v3673_v26, %v5393_v34 }
  0x33   :  { %v64_v46 = vsub.s32 32, %v63_v39  ;;  %v66_v48 = vshll.u32 %v3575_v47, %v63_v39  ;;  %v69_v50 = vshll.u32 %v3576_v49, %v63_v39  ;;  %v72_v52 = vshll.u32 %v3577_v51, %v63_v39 }
  0x34   :  { %v75_v54 = vshll.u32 %v3578_v53, %v63_v39  ;;  %v78_v56 = vshll.u32 %v3579_v55, %v63_v39  ;;  %vm81_vm2 = vcmp.lt.s32.totalorder %v62_v38, 1  ;;  %v3580_v63 = vmov 1326507024  }
  0x35   :  { %v65_v58 = vshrl.u32 %v3575_v47, %v64_v46  ;;  %v67_v59 = vshrl.u32 %v3576_v49, %v64_v46  ;;  %v70_v60 = vshrl.u32 %v3577_v51, %v64_v46  ;;  %v73_v61 = vshrl.u32 %v3578_v53, %v64_v46 }
  0x36   :  { %v76_v62 = vshrl.u32 %v3579_v55, %v64_v46  ;;  %v79_v4 = vshrl.u32 %v3580_v63, %v64_v46  ;;  %vm82_vm3 = vcmp.lt.s32.totalorder %v62_v38, 2  ;;  %vm84_vm4 = vcmp.lt.s32.totalorder %v62_v38, 4 }
  0x37   :  { %v68_v7 = vor.u32 %v67_v59, %v66_v48  ;;  %v71_v9 = vor.u32 %v70_v60, %v69_v50  ;;  %v74_v10 = vor.u32 %v73_v61, %v72_v52  ;;  %v167_v13 = vsub.s32 32, %v166_v43 }
  0x38   :  { %v77_v14 = vor.u32 %v76_v62, %v75_v54  ;;  %v80_v16 = vor.u32 %v79_v4, %v78_v56  ;;  %vm83_vm5 = vcmp.lt.s32.totalorder %v62_v38, 3  ;;  %v169_v17 = vshll.u32 %v3575_v47, %v166_v43 }
  0x39   :  { %v85_v20 = vsel %vm81_vm2, %v65_v58, %v68_v7  ;;  %v86_v21 = vsel %vm84_vm4, %v74_v10, 2102212464  ;;  %v89_v24 = vsel %vm81_vm2, %v68_v7, %v71_v9  ;;  %v93_v29 = vsel %vm81_vm2, %v71_v9, %v74_v10 }
  0x3a   :  { %v87_v35 = vsel %vm83_vm5, %v71_v9, %v86_v21  ;;  %v90_v39 = vsel %vm84_vm4, %v77_v14, 920167782  ;;  %v94_v40 = vsel %vm84_vm4, %v80_v16, 1326507024  ;;  %v172_v46 = vshll.u32 %v3576_v49, %v166_v43 }
  0x3b   :  { %v91_v34 = vsel %vm83_vm5, %v74_v10, %v90_v39  ;;  %v95_v48 = vsel %vm83_vm5, %v77_v14, %v94_v40  ;;  %v168_v50 = vshrl.u32 %v3575_v47, %v167_v13  ;;  %v170_v52 = vshrl.u32 %v3576_v49, %v167_v13 }
  0x3c   :  { %v88_v54 = vsel %vm82_vm3, %v85_v20, %v87_v35  ;;  %v92_v56 = vsel %vm82_vm3, %v89_v24, %v91_v34  ;;  %v96_v59 = vsel %vm82_vm3, %v93_v29, %v95_v48  ;;  %v173_v58 = vshrl.u32 %v3577_v51, %v167_v13 }
  0x3d   :  { %v3716_v60 = vmul.u32.u64.low %v3677_v28, %v96_v59  ;;  %v3717_v61 = vmul.u32.u64.high %v3677_v28, %v96_v59, %v3716_v60  ;;  %v3720_v62 = vmul.u32.u64.low %v3677_v28, %v92_v56  ;;  %v3721_v4 = vmul.u32.u64.high %v3677_v28, %v92_v56, %v3720_v62 }
  0x3e   :  { %v171_v7 = vor.u32 %v170_v52, %v169_v17  ;;  %v174_v9 = vor.u32 %v173_v58, %v172_v46  ;;  %v175_v47 = vshll.u32 %v3577_v51, %v166_v43  ;;  %v176_v49 = vshrl.u32 %v3578_v53, %v167_v13  ;;  %v3741_v52 = vld [vmem:[#allocation6 + $0x98] sm:$0xff] }
  0x3f   :  { %v178_v10 = vshll.u32 %v3578_v53, %v166_v43  ;;  %v179_v14 = vshrl.u32 %v3579_v55, %v167_v13  ;;  %v181_v16 = vshll.u32 %v3579_v55, %v166_v43  ;;  %v182_v34 = vshrl.u32 %v3580_v63, %v167_v13 }
  0x40   :  { %v104_v38 = vmul.u32 %v3677_v28, %v88_v54  ;;  %v177_v20 = vor.u32 %v176_v49, %v175_v47  ;;  %vm184_vm6 = vcmp.lt.s32.totalorder %v3700_v42, 1  ;;  %vm185_vm7 = vcmp.lt.s32.totalorder %v3700_v42, 2 }
  0x41   :  { %vm106_vm8 = vc.u32 %v3717_v61, %v3720_v62  ;;  %v107_v21 = vadd.s32 1, %v3721_v4  ;;  %v180_v17 = vor.u32 %v179_v14, %v178_v10  ;;  %vm186_vm9 = vcmp.lt.s32.totalorder %v3700_v42, 3 }
  0x42   :  { %v183_v51 = vor.u32 %v182_v34, %v181_v16  ;;  %vm187_vm10 = vcmp.lt.s32.totalorder %v3700_v42, 4  ;;  %v188_v43 = vsel %vm184_vm6, %v168_v50, %v171_v7  ;;  %v192_v53 = vsel %vm184_vm6, %v171_v7, %v174_v9 }
  0x43   :  { %v108_v28 = vsel %vm106_vm8, %v107_v21, %v3721_v4  ;;  %v189_v55 = vsel %vm187_vm10, %v177_v20, 2102212464  ;;  %v193_v63 = vsel %vm187_vm10, %v180_v17, 920167782  ;;  %v196_v13 = vsel %vm184_vm6, %v174_v9, %v177_v20 }
  0x44   :  { %v109_v24 = vadd.s32 %v108_v28, %v104_v38  ;;  %v190_v29 = vsel %vm186_vm9, %v174_v9, %v189_v55  ;;  %v194_v35 = vsel %vm186_vm9, %v177_v20, %v193_v63  ;;  %v197_v39 = vsel %vm187_vm10, %v183_v51, 1326507024  ;;  %v3766_v9 = vld [vmem:[#allocation6 + $0x18] sm:$0xff] }
  0x45   :  { %v191_v40 = vsel %vm185_vm7, %v188_v43, %v190_v29  ;;  %v195_v46 = vsel %vm185_vm7, %v192_v53, %v194_v35  ;;  %v198_v48 = vsel %vm186_vm9, %v180_v17, %v197_v39  ;;  %v3117_v50 = vpack.c.bf16 %v1007_v45, %v1000_v44 }
  0x46   :  { %v110_v54 = vadd.s32 536870912, %v109_v24  ;;  %v199_v56 = vsel %vm185_vm7, %v196_v13, %v198_v48  ;;  %v3746_v59 = vmul.u32.u64.low %v3685_v32, %v195_v46  ;;  %v3747_v58 = vmul.u32.u64.high %v3685_v32, %v195_v46, %v3746_v59 }
  0x47   :  { %v3751_v60 = vmul.u32.u64.low %v3685_v32, %v199_v56  ;;  %v3752_v4 = vmul.u32.u64.high %v3685_v32, %v199_v56, %v3751_v60  ;;  %3118 = vmatprep.subr.bf16.mxu1 %v3117_v50  ;;  %v888_v33 = vand.u32 4294901760, %v3707_v57  ;;  %v894_v42 = vsub.f32 %v3683_v31, %v5402_v41 }
  0x48   :  { %v111_v44 = vshrl.u32 %v110_v54, 30  ;;  %v814_v45 = vand.u32 4294901760, %v3741_v52  ;;  %v3764_v7 = vsub.f32 %v3675_v27, %v811_v37  ;;  %v207_v47 = vmul.u32 %v3685_v32, %v191_v40  ;;  %v3809_v40 = vld [vmem:[#allocation6 + $0xa8] sm:$0xff] }
  0x49   :  { %v3773_v57 = vpack.c.bf16 %v808_v15, %v805_v11  ;;  %v210_v10 = vadd.s32 1, %v3747_v58  ;;  %v895_v14 = vand.u32 4294901760, %v894_v42  ;;  %v763_v16 = vand.u32 4294901760, %v3755_v36 }
  0x4a   :  { %v112_v49 = vshll.u32 %v111_v44, 30  ;;  %vm209_vm11 = vc.u32 %v3752_v4, %v3746_v59  ;;  %v5401_v34 = vand.u32 4294901760, %v3764_v7  ;;  %v3783_v32 = vsub.f32 %v3741_v52, %v814_v45 }
  0x4b   :  { %v766_v2 = vand.u32 4294901760, %v3766_v9  ;;  %3086 = vmatprep.subr.bf16.mxu0 %v3773_v57  ;;  %v211_v15 = vsel %vm209_vm11, %v210_v10, %v3747_v58  ;;  %v3119_v38 = vpack.c.bf16 %v895_v14, %v888_v33  ;;  %v3797_v43 = vsub.f32 %v3755_v36, %v763_v16 }
  0x4c   :  { %v113_v11 = vsub.s32 %v109_v24, %v112_v49  ;;  %v212_v20 = vadd.s32 %v211_v15, %v207_v47  ;;  %v1013_v21 = vsub.f32 %v3764_v7, %v5401_v34  ;;  %v5400_v17 = vand.u32 4294901760, %v3783_v32 }
  0x4d   :  { %3120 = vmatpush3.bf16.msra.mxu1 %v3119_v38  ;;  %5525 = vst [vmem:[#allocation12_spill] sm:$0xff] %v3797_v43  ;;  %v817_v53 = vand.u32 4294901760, %v3787_v5  ;;  %v3806_v63 = vsub.f32 %v3766_v9, %v766_v2  ;;  %v5399_v39 = vand.u32 4294901760, %v3797_v43  ;;  %v135_v54 = vsub.s32 4, %v111_v44 }
  0x4e   :  { %v115_v51 = vsub.s32 0, %v113_v11  ;;  %v213_v28 = vadd.s32 536870912, %v212_v20  ;;  %v1020_v55 = vsub.f32 %v3783_v32, %v5400_v17  ;;  %v1014_v24 = vand.u32 4294901760, %v1013_v21 }
  0x4f   :  { %5526 = vst [vmem:[#allocation13_spill] sm:$0xff] %v3806_v63  ;;  %v5397_v48 = vand.u32 4294901760, %v3806_v63  ;;  %v3815_v50 = vsub.f32 %v3787_v5, %v817_v53  ;;  %v901_v33 = vsub.f32 %v3797_v43, %v5399_v39  ;;  %v820_v42 = vand.u32 4294901760, %v3809_v40 }
  0x50   :  { %v2613_v13 = vmin.u32 %v115_v51, %v113_v11  ;;  %v214_v29 = vshrl.u32 %v213_v28, 30  ;;  %v1021_v35 = vand.u32 4294901760, %v1020_v55  ;;  %vm51_vm12 = vcmp.lt.s32.totalorder %v3635_v0, 0 }
  0x51   :  { %5527 = vst [vmem:[#allocation14_spill] sm:$0xff] %v3815_v50  ;;  %v908_v49 = vsub.f32 %v3806_v63, %v5397_v48  ;;  %v5395_v10 = vand.u32 4294901760, %v3815_v50  ;;  %v105_v14 = vadd.s32 %v3720_v62, %v3717_v61  ;;  %v902_v15 = vand.u32 4294901760, %v901_v33  ;;  %v3915_v48 = vld [vmem:[#allocation6 + $0x38] sm:$0xff] }
  0x52   :  { %v117_v46 = vclz %v2613_v13  ;;  %v215_v56 = vshll.u32 %v214_v29, 30  ;;  %v3121_v60 = vpack.c.bf16 %v1021_v35, %v1014_v24  ;;  %v3834_v38 = vpack.c.bf16 %v760_v23, %v757_v19  ;;  %v3849_v23 = vld [vmem:[#allocation6 + $0x20] sm:$0xff] }
  0x53   :  { %v136_v21 = vsel %vm51_vm12, %v135_v54, %v111_v44  ;;  %v909_v28 = vand.u32 4294901760, %v908_v49  ;;  %v3842_v61 = vsub.f32 %v3809_v40, %v820_v42  ;;  %v1027_v19 = vsub.f32 %v3815_v50, %v5395_v10 }
  0x54   :  { %v2614_v58 = vadd.s32 4294967294, %v117_v46  ;;  %v3822_v47 = vsub.s32 %v212_v20, %v215_v56  ;;  %3122 = vmatprep.subr.bf16.mxu1 %v3121_v60  ;;  %3088 = vmatpush3.bf16.msra.mxu0 %v3834_v38  ;;  %vm3853_vm14 = vcmp.le.f32.partialorder %v49_v3, 0.7853982  ;;  %vm154_vm15 = vcmp.lt.s32.totalorder %v3637_v1, 0  ;;  %v3860_v56 = vld [vmem:[#allocation6 + $0x28] sm:$0xff] }
  0x55   :  { %5528 = vst [vmem:[#allocation15_spill] sm:$0xff] %v3842_v61  ;;  %v3123_v12 = vpack.c.bf16 %v909_v28, %v902_v15  ;;  %v138_v35 = vsel %vm3853_vm14, 0, %v136_v21  ;;  %v238_v54 = vsub.s32 4, %v214_v29  ;;  %v5394_v33 = vand.u32 4294901760, %v3842_v61 }
  0x56   :  { %vm2615_vm13 = vcmp.lt.s32.totalorder %v2614_v58, 0  ;;  %v218_v51 = vsub.s32 0, %v3822_v47  ;;  %v769_v3 = vand.u32 4294901760, %v3849_v23  ;;  %vm3866_vm0 = vcmp.le.f32.partialorder %v152_v6, 0.7853982 }
  0x57   :  { %v120_v20 = vsel %vm2615_vm13, 0, %v2614_v58  ;;  %3124 = vmatpush3.bf16.msra.mxu1 %v3123_v12  ;;  %v1034_v28 = vsub.f32 %v3842_v61, %v5394_v33  ;;  %v239_v6 = vsel %vm154_vm15, %v238_v54, %v214_v29  ;;  %v5411_v62 = vand.u32 4294901760, %v3915_v48 }
  0x58   :  { %v121_v55 = vsub.s32 32, %v120_v20  ;;  %v122_v13 = vshll.u32 %v113_v11, %v120_v20  ;;  %v125_v24 = vsub.s32 4294967266, %v120_v20  ;;  %v2617_v8 = vmin.u32 %v218_v51, %v3822_v47 }
  0x59   :  { %v1028_v20 = vand.u32 4294901760, %v1027_v19  ;;  %v241_v54 = vsel %vm3866_vm0, 0, %v239_v6  ;;  %v3965_v41 = vpack.c.bf16 %v814_v45, %v811_v37  ;;  %vm141_vm8 = vweird.f32 %v3635_v0 }
  0x5a   :  { %v123_v44 = vshrl.u32 %v105_v14, %v121_v55  ;;  %v126_v11 = vadd.s32 127, %v125_v24  ;;  %v220_v46 = vclz %v2617_v8  ;;  %v208_v14 = vadd.s32 %v3746_v59, %v3752_v4 }
  0x5b   :  { %v772_v55 = vand.u32 4294901760, %v3860_v56  ;;  %v3881_v24 = vsub.f32 %v3849_v23, %v769_v3  ;;  %v1035_v8 = vand.u32 4294901760, %v1034_v28  ;;  %vm463_vm9 = vcmask 261120   ;;  %3090 = vmatprep.subr.bf16.mxu0 %v3965_v41 }
  0x5c   :  { %v124_v58 = vor.u32 %v123_v44, %v122_v13  ;;  %v127_v60 = vshll.u32 %v126_v11, 23  ;;  %v2618_v15 = vadd.s32 4294967294, %v220_v46  ;;  %v348_v13 = vadd.s32 3, %v138_v35 }
  0x5d   :  { %5533 = vst [vmem:[#allocation16_spill] sm:$0xff] %v3881_v24  ;;  %v3886_v12 = vsub.f32 %v3860_v56, %v772_v55  ;;  %v5396_v46 = vand.u32 4294901760, %v3881_v24  ;;  %v4050_v5 = vpack.c.bf16 %v772_v55, %v769_v3 }
  0x5e   :  { %v128_v21 = vor.u32 4788187, %v127_v60  ;;  %v131_v51 = vcvt.s32.f32 %v124_v58  ;;  %vm2619_vm1 = vcmp.lt.s32.totalorder %v2618_v15, 0  ;;  %v3125_v58 = vpack.c.bf16 %v1035_v8, %v1028_v20  ;;  %v3907_v8 = vld [vmem:[#allocation6 + $0xb8] sm:$0xff] }
  0x5f   :  { %v223_v4 = vsel %vm2619_vm1, 0, %v2618_v15  ;;  %5534 = vst [vmem:[#allocation17_spill] sm:$0xff] %v3886_v12  ;;  %v5398_v60 = vand.u32 4294901760, %v3886_v12  ;;  %v3893_v15 = vand.u32 3, %v138_v35  ;;  %v915_v33 = vsub.f32 %v3881_v24, %v5396_v46  ;;  %v3913_v46 = vld [vmem:[#allocation6 + $0x30] sm:$0xff]  ;;  %5537 = vst [vmem:[#allocation20_spill] sm:$0xff] %v4050_v5 }
  0x60   :  { %v129_v59 = vand.u32 2147483647, %v128_v21  ;;  %v224_v19 = vsub.s32 32, %v223_v4  ;;  %v225_v44 = vshll.u32 %v3822_v47, %v223_v4  ;;  %v228_v11 = vsub.s32 4294967266, %v223_v4  ;;  %3126 = vmatprep.subr.bf16.mxu1 %v3125_v58 }
  0x61   :  { %v3898_v47 = vand.u32 3, %v348_v13  ;;  %v3900_v4 = vand.u32 3, %v241_v54  ;;  %v922_v20 = vsub.f32 %v3886_v12, %v5398_v60  ;;  %v452_v35 = vadd.s32 3, %v241_v54  ;;  %v3947_v60 = vld [vmem:[#allocation6 + $0x40] sm:$0xff] }
  0x62   :  { %v132_v29 = vmul.f32 %v131_v51, %v129_v59  ;;  %v226_v21 = vshrl.u32 %v208_v14, %v224_v19  ;;  %v229_v28 = vadd.s32 127, %v228_v11  ;;  %v916_v59 = vand.u32 4294901760, %v915_v33  ;;  %v3905_v14 = vld [vmem:[#allocation6 + $0xb0] sm:$0xff] }
  0x63   :  { %v923_v13 = vand.u32 4294901760, %v922_v20  ;;  %v823_v11 = vand.u32 4294901760, %v3905_v14  ;;  %v5417_v58 = vand.u32 4294901760, %v3907_v8  ;;  %vm147_vm2 = vcmp.eq.s32.totalorder %v3893_v15, 2 }
  0x64   :  { %v133_v10 = vxor.u32 2147483648, %v132_v29  ;;  %v227_v51 = vor.u32 %v226_v21, %v225_v44  ;;  %v230_v6 = vshll.u32 %v229_v28, 23  ;;  %v5415_v21 = vand.u32 4294901760, %v3913_v46 }
  0x65   :  { %v3127_v28 = vpack.c.bf16 %v923_v13, %v916_v59  ;;  %v3939_v59 = vld [vmem:[#allocation6 + $0xc8] sm:$0xff]  ;;  %vm354_vm3 = vcmp.eq.s32.totalorder %v3898_v47, 2  ;;  %vm144_vm4 = vcmp.eq.s32.totalorder %v3893_v15, 0  ;;  %vm351_vm5 = vcmp.eq.s32.totalorder %v3898_v47, 0 }
  0x66   :  { %v134_v19 = vsel %vm51_vm12, %v133_v10, %v132_v29  ;;  %v231_v44 = vor.u32 4788187, %v230_v6  ;;  %v234_v54 = vcvt.s32.f32 %v227_v51  ;;  %v3924_v10 = vsub.f32 %v3905_v14, %v823_v11  ;;  %v3937_v6 = vld [vmem:[#allocation6 + $0xc0] sm:$0xff] }
  0x67   :  { %v137_v33 = vsel %vm3853_vm14, %v3635_v0, %v134_v19  ;;  %v3929_v29 = vsub.f32 %v3907_v8, %v5417_v58  ;;  %v3935_v51 = vsub.f32 %v3913_v46, %v5415_v21  ;;  %3128 = vmatpush3.bf16.msra.mxu1 %v3127_v28  ;;  %v3951_v17 = vand.u32 3, %v452_v35  ;;  %v4038_v58 = vld [vmem:[#allocation6 + $0xd8] sm:$0xff] }
  0x68   :  { %3491 = vcosq.f32 %v137_v33  ;;  %v232_v20 = vand.u32 2147483647, %v231_v44  ;;  %v5406_v19 = vand.u32 4294901760, %v3924_v10  ;;  %v5408_v44 = vand.u32 4294901760, %v3939_v59 }
  0x69   :  { %3493 = vsinq.f32 %v137_v33  ;;  %v5405_v13 = vand.u32 4294901760, %v3929_v29  ;;  %v5409_v33 = vand.u32 4294901760, %v3937_v6  ;;  %v5404_v34 = vand.u32 4294901760, %v3935_v51 }
  0x6a   :  { %v235_v39 = vmul.f32 %v234_v54, %v232_v20  ;;  %v3957_v28 = vsub.f32 %v3915_v48, %v5411_v62  ;;  %vm143_vm6 = vcmp.lt.s32.totalorder %v3893_v15, 2  ;;  %vm350_vm7 = vcmp.lt.s32.totalorder %v3898_v47, 2 }
  0x6b   :  { %v1041_v35 = vsub.f32 %v3924_v10, %v5406_v19  ;;  %v1048_v54 = vsub.f32 %v3929_v29, %v5405_v13  ;;  %v3977_v20 = vpack.c.bf16 %v766_v2, %v763_v16  ;;  %v929_v37 = vsub.f32 %v3935_v51, %v5404_v34  ;;  %v4005_v19 = vld [vmem:[#allocation6 + $0xd0] sm:$0xff] }
  0x6c   :  { %v236_v27 = vxor.u32 2147483648, %v235_v39  ;;  %v5410_v52 = vand.u32 4294901760, %v3957_v28  ;;  %v5412_v45 = vand.u32 4294901760, %v3947_v60  ;;  %v3991_v16 = vsub.f32 %v3937_v6, %v5409_v33 }
  0x6d   :  { %v1042_v36 = vand.u32 4294901760, %v1041_v35  ;;  %v1049_v9 = vand.u32 4294901760, %v1048_v54  ;;  %v3996_v2 = vsub.f32 %v3939_v59, %v5408_v44  ;;  %3092 = vmatpush3.bf16.msra.mxu0 %v3977_v20  ;;  %v930_v13 = vand.u32 4294901760, %v929_v37 }
  0x6e   :  { %5535 = vst [vmem:[#allocation18_spill] sm:$0xff] %v3991_v16  ;;  %v237_v34 = vsel %vm154_vm15, %v236_v27, %v235_v39  ;;  %v936_v35 = vsub.f32 %v3957_v28, %v5410_v52  ;;  %v5413_v54 = vand.u32 4294901760, %v3979_v30  ;;  %v5414_v33 = vand.u32 4294901760, %v3991_v16 }
  0x6f   :  { %5536 = vst [vmem:[#allocation19_spill] sm:$0xff] %v3996_v2  ;;  %v240_v25 = vsel %vm3866_vm0, %v3637_v1, %v237_v34  ;;  %v3129_v44 = vpack.c.bf16 %v1049_v9, %v1042_v36  ;;  %v5416_v39 = vand.u32 4294901760, %v3996_v2  ;;  %v4015_v37 = vsub.f32 %v3947_v60, %v5412_v45 }
  0x70   :  { %3495 = vcosq.f32 %v240_v25  ;;  %v937_v27 = vand.u32 4294901760, %v936_v35  ;;  %v4020_v52 = vsub.f32 %v3979_v30, %v5413_v54  ;;  %v1055_v34 = vsub.f32 %v3991_v16, %v5414_v33 }
  0x71   :  { %3497 = vsinq.f32 %v240_v25  ;;  %3130 = vmatprep.subr.bf16.mxu1 %v3129_v44  ;;  %v1062_v49 = vsub.f32 %v3996_v2, %v5416_v39  ;;  %vm250_vm10 = vcmp.eq.s32.totalorder %v3900_v4, 2  ;;  %v5421_v54 = vand.u32 4294901760, %v4015_v37 }
  0x72   :  { %v3492_v62 = vpop.eup %3491  ;;  %v3131_v45 = vpack.c.bf16 %v937_v27, %v930_v13  ;;  %v5418_v25 = vand.u32 4294901760, %v4020_v52  ;;  %v4036_v33 = vpack.c.bf16 %v820_v42, %v817_v53  ;;  %v1056_v21 = vand.u32 4294901760, %v1055_v34 }
  0x73   :  { %v3494_v9 = vpop.eup %3493  ;;  %v148_v35 = vxor.u32 2147483648, %v3492_v62  ;;  %v1063_v39 = vand.u32 4294901760, %v1062_v49  ;;  %vm247_vm11 = vcmp.eq.s32.totalorder %v3900_v4, 0  ;;  %vm455_vm12 = vcmp.eq.s32.totalorder %v3951_v17, 0 }
  0x74   :  { %v145_v44 = vxor.u32 2147483648, %v3494_v9  ;;  %3132 = vmatpush3.bf16.msra.mxu1 %v3131_v45  ;;  %v943_v53 = vsub.f32 %v4015_v37, %v5421_v54  ;;  %3094 = vmatprep.subr.bf16.mxu0 %v4036_v33  ;;  %v950_v23 = vsub.f32 %v4020_v52, %v5418_v25  ;;  %vm246_vm13 = vcmp.lt.s32.totalorder %v3900_v4, 2  ;;  %v4081_v45 = vld [vmem:[#allocation6 + $0x50] sm:$0xff] }
  0x75   :  { %v356_v36 = vsel %vm354_vm3, %v148_v35, %v3494_v9  ;;  %v149_v13 = vsel %vm147_vm2, %v148_v35, %v3494_v9  ;;  %v3133_v27 = vpack.c.bf16 %v1063_v39, %v1056_v21  ;;  %vm454_vm14 = vcmp.lt.s32.totalorder %v3951_v17, 2  ;;  %3096 = vmatpush3.bf16.msra.mxu0 %v4050_v5  ;;  %v4083_v39 = vld [vmem:[#allocation6 + $0x58] sm:$0xff] }
  0x76   :  { %v353_v40 = vsel %vm351_vm5, %v3492_v62, %v145_v44  ;;  %v146_v42 = vsel %vm144_vm4, %v3492_v62, %v145_v44  ;;  %v944_v55 = vand.u32 4294901760, %v943_v53  ;;  %v5424_v62 = vand.u32 4294901760, %v4038_v58 }
  0x77   :  { %v357_v56 = vsel %vm350_vm7, %v353_v40, %v356_v36  ;;  %v150_v3 = vsel %vm143_vm6, %v146_v42, %v149_v13  ;;  %vm244_vm15 = vweird.f32 %v3637_v1  ;;  %vm458_vm0 = vcmp.eq.s32.totalorder %v3951_v17, 2  ;;  %3134 = vmatprep.subr.bf16.mxu1 %v3133_v27 }
  0x78   :  { %v4073_v21 = vsel %vm141_vm8, nan, %v357_v56  ;;  %v4077_v47 = vsel %vm141_vm8, nan, %v150_v3  ;;  %v951_v15 = vand.u32 4294901760, %v950_v23  ;;  %v5538_v36 = vand.u32 4294901760, %v3907_v8 }
  0x79   :  { %468 = vrot.lane.b32.xlu0 %v4073_v21, %s3581_s1  ;;  %v477_v34 = vmul.f32 %v4077_v47, %v4077_v47  ;;  %v479_v0 = vmul.f32 %v4073_v21, %v4073_v21  ;;  %v483_v49 = vmul.f32 %v4073_v21, %v4077_v47  ;;  %464 = vst.msk [vmem:[#allocation2] sm:$0xff] %vm463_vm9, %v4077_v47  ;;  %v5540_v44 = vand.u32 4294901760, %v4005_v19 }
  0x7a   :  { %v4099_v9 = vpack.c.bf16 %v5538_v36, %v823_v11  ;;  %v3135_v35 = vpack.c.bf16 %v951_v15, %v944_v55  ;;  %v4109_v53 = vsub.f32 %v4038_v58, %v5424_v62  ;;  %v5541_v40 = vand.u32 4294901760, %v3913_v46  ;;  %v3496_v8 = vpop.eup %3495 }
  0x7b   :  { %v4104_v13 = vsub.f32 %v4005_v19, %v5540_v44  ;;  %v5542_v42 = vand.u32 4294901760, %v3915_v48  ;;  %v481_v11 = vsub.f32 %v477_v34, %v479_v0  ;;  %v4117_v27 = vadd.f32 %v483_v49, %v483_v49  ;;  %v3498_v3 = vpop.eup %3497 }
  0x7c   :  { %5539 = vst [vmem:[#allocation21_spill] sm:$0xff] %v4099_v9  ;;  %3098 = vmatprep.subr.bf16.mxu0 %v4099_v9  ;;  %v5423_v23 = vand.u32 4294901760, %v4081_v45  ;;  %v5422_v56 = vand.u32 4294901760, %v4083_v39  ;;  %v251_v55 = vxor.u32 2147483648, %v3496_v8  ;;  %3136 = vmatpush3.bf16.msra.mxu1 %v3135_v35  ;;  %v5420_v46 = vand.u32 4294901760, %v4109_v53 }
  0x7d   :  { %v4115_v14 = vpack.c.bf16 %v5542_v42, %v5541_v40  ;;  %v5419_v15 = vand.u32 4294901760, %v4104_v13  ;;  %v5544_v48 = vand.u32 4294901760, %v3937_v6  ;;  %v5545_v34 = vand.u32 4294901760, %v3939_v59  ;;  %489 = vrot.lane.b32.xlu1 %v481_v11, %s3582_s10 }
  0x7e   :  { %v509_v49 = vmul.f32 %v481_v11, %v4077_v47  ;;  %v515_v36 = vmul.f32 %v4117_v27, %v4077_v47  ;;  %v517_v35 = vmul.f32 %v481_v11, %v4073_v21  ;;  %v511_v44 = vmul.f32 %v4117_v27, %v4073_v21 }
  0x7f   :  { %5543 = vst [vmem:[#allocation22_spill] sm:$0xff] %v4115_v14  ;;  %3100 = vmatpush3.bf16.msra.mxu0 %v4115_v14  ;;  %v4129_v0 = vpack.c.bf16 %v5545_v34, %v5544_v48  ;;  %v248_v40 = vxor.u32 2147483648, %v3498_v3  ;;  %v252_v6 = vsel %vm250_vm10, %v251_v55, %v3498_v3  ;;  %v460_v59 = vsel %vm458_vm0, %v251_v55, %v3498_v3 }
  0x80   :  { %v1069_v42 = vsub.f32 %v4104_v13, %v5419_v15  ;;  %v519_v48 = vadd.f32 %v517_v35, %v515_v36  ;;  %v513_v34 = vsub.f32 %v509_v49, %v511_v44  ;;  %v1076_v11 = vsub.f32 %v4109_v53, %v5420_v46 }
  0x81   :  { %5546 = vst [vmem:[#allocation23_spill] sm:$0xff] %v4129_v0  ;;  %3102 = vmatprep.subr.bf16.mxu0 %v4129_v0  ;;  %v4152_v25 = vsub.f32 %v4081_v45, %v5423_v23  ;;  %v249_v3 = vsel %vm247_vm11, %v3496_v8, %v248_v40  ;;  %v457_v55 = vsel %vm455_vm12, %v3496_v8, %v248_v40  ;;  %vm474_vm1 = vcmask 523520  }
  0x82   :  { %v1070_v15 = vand.u32 4294901760, %v1069_v42  ;;  %v4161_v49 = vsub.f32 %v4083_v39, %v5422_v56  ;;  %525 = vrot.lane.b32.xlu0 %v519_v48, %s3581_s1  ;;  %v533_v36 = vmul.f32 %v513_v34, %v4077_v47  ;;  %v535_v35 = vmul.f32 %v519_v48, %v4073_v21  ;;  %521 = vst.msk [vmem:[#allocation2 + $0x8] sm:$0xff] %vm463_vm9, %v513_v34 }
  0x83   :  { %v539_v44 = vmul.f32 %v519_v48, %v4077_v47  ;;  %v541_v46 = vmul.f32 %v513_v34, %v4073_v21  ;;  %v253_v8 = vsel %vm246_vm13, %v249_v3, %v252_v6  ;;  %v461_v40 = vsel %vm454_vm14, %v457_v55, %v460_v59  ;;  %v4190_v59 = vld [vmem:[#allocation6 + $0xe0] sm:$0xff]  ;;  %v4192_v34 = vld [vmem:[#allocation6 + $0xe8] sm:$0xff] }
  0x84   :  { %v1077_v42 = vand.u32 4294901760, %v1076_v11  ;;  %v5428_v54 = vand.u32 4294901760, %v4152_v25  ;;  %v537_v56 = vsub.f32 %v533_v36, %v535_v35  ;;  %v4176_v62 = vsel %vm244_vm15, nan, %v253_v8 }
  0x85   :  { %v543_v23 = vadd.f32 %v541_v46, %v539_v44  ;;  %v4180_v48 = vsel %vm244_vm15, nan, %v461_v40  ;;  %v478_v4 = vmul.f32 %v4176_v62, %v4176_v62  ;;  %465 = vst.msk [vmem:[#allocation2 + $0x20] sm:$0xff] %vm463_vm9, %v4176_v62  ;;  %v5427_v55 = vand.u32 4294901760, %v4161_v49 }
  0x86   :  { %v480_v17 = vmul.f32 %v4180_v48, %v4180_v48  ;;  %v484_v6 = vmul.f32 %v4180_v48, %v4176_v62  ;;  %v3137_v46 = vpack.c.bf16 %v1077_v42, %v1070_v15  ;;  %547 = vrot.lane.b32.xlu1 %v537_v56, %s3582_s10  ;;  %v565_v1 = vmul.f32 %v537_v56, %v4077_v47 }
  0x87   :  { %v573_v11 = vmul.f32 %v537_v56, %v4073_v21  ;;  %557 = vrot.lane.b32.xlu0 %v543_v23, %s3583_s11  ;;  %v567_v3 = vmul.f32 %v543_v23, %v4073_v21  ;;  %v571_v36 = vmul.f32 %v543_v23, %v4077_v47  ;;  %v957_v44 = vsub.f32 %v4152_v25, %v5428_v54 }
  0x88   :  { %v482_v15 = vsub.f32 %v478_v4, %v480_v17  ;;  %v4201_v35 = vadd.f32 %v484_v6, %v484_v6  ;;  %3138 = vmatprep.subr.bf16.mxu1 %v3137_v46  ;;  %v964_v56 = vsub.f32 %v4161_v49, %v5427_v55  ;;  %v5433_v40 = vand.u32 4294901760, %v4190_v59 }
  0x89   :  { %v569_v8 = vsub.f32 %v565_v1, %v567_v3  ;;  %v4211_v0 = vadd.f32 %v573_v11, %v571_v36  ;;  %v958_v11 = vand.u32 4294901760, %v957_v44  ;;  %v5547_v14 = vand.u32 4294901760, %v4192_v34 }
  0x8a   :  { %v516_v23 = vmul.f32 %v4201_v35, %v4176_v62  ;;  %v518_v4 = vmul.f32 %v482_v15, %v4180_v48  ;;  %v510_v17 = vmul.f32 %v482_v15, %v4176_v62  ;;  %500 = vrot.lane.b32.xlu1 %v4117_v27, %s3583_s11  ;;  %v512_v6 = vmul.f32 %v4201_v35, %v4180_v48 }
  0x8b   :  { %v589_v46 = vmul.f32 %v569_v8, %v4077_v47  ;;  %v597_v1 = vmul.f32 %v569_v8, %v4073_v21  ;;  %577 = vst.msk [vmem:[#allocation2 + $0x10] sm:$0xff] %vm463_vm9, %v569_v8  ;;  %v591_v36 = vmul.f32 %v4211_v0, %v4073_v21  ;;  %v595_v55 = vmul.f32 %v4211_v0, %v4077_v47 }
  0x8c   :  { %v520_v3 = vadd.f32 %v518_v4, %v516_v23  ;;  %v965_v54 = vand.u32 4294901760, %v964_v56  ;;  %v514_v42 = vsub.f32 %v510_v17, %v512_v6  ;;  %v4231_v27 = vsub.f32 %v4190_v59, %v5433_v40 }
  0x8d   :  { %v4236_v12 = vsub.f32 %v4192_v34, %v5547_v14  ;;  %v5548_v44 = vand.u32 4294901760, %v3947_v60  ;;  %v5549_v8 = vand.u32 4294901760, %v3979_v30  ;;  %v4247_v17 = vsub.f32 %v589_v46, %v591_v36  ;;  %v4260_v46 = vld [vmem:[#allocation6 + $0x68] sm:$0xff] }
  0x8e   :  { %527 = vrot.lane.b32.xlu0 %v520_v3, %s3581_s1  ;;  %v536_v56 = vmul.f32 %v520_v3, %v4180_v48  ;;  %v540_v4 = vmul.f32 %v520_v3, %v4176_v62  ;;  %v4249_v6 = vadd.f32 %v597_v1, %v595_v55  ;;  %470 = vrot.lane.b32.xlu1 %v4180_v48, %s3581_s1  ;;  %v5448_v50 = vand.u32 4294901760, %v4260_v46 }
  0x8f   :  { %v4242_v23 = vpack.c.bf16 %v5549_v8, %v5548_v44  ;;  %v534_v14 = vmul.f32 %v514_v42, %v4176_v62  ;;  %v542_v60 = vmul.f32 %v514_v42, %v4180_v48  ;;  %522 = vst.msk [vmem:[#allocation2 + $0x28] sm:$0xff] %vm463_vm9, %v514_v42  ;;  %v3139_v30 = vpack.c.bf16 %v965_v54, %v958_v11  ;;  %v4258_v8 = vld [vmem:[#allocation6 + $0x60] sm:$0xff] }
  0x90   :  { %v5447_v44 = vand.u32 4294901760, %v4231_v27  ;;  %v627_v55 = vmul.f32 %v4249_v6, %v4077_v47  ;;  %v629_v1 = vmul.f32 %v4247_v17, %v4073_v21  ;;  %v621_v3 = vmul.f32 %v4247_v17, %v4077_v47 }
  0x91   :  { %5550 = vst [vmem:[#allocation24_spill] sm:$0xff] %v4242_v23  ;;  %3104 = vmatpush3.bf16.msra.mxu0 %v4242_v23  ;;  %v623_v54 = vmul.f32 %v4249_v6, %v4073_v21  ;;  %v538_v42 = vsub.f32 %v534_v14, %v536_v56  ;;  %v544_v11 = vadd.f32 %v542_v60, %v540_v4  ;;  %v5446_v40 = vand.u32 4294901760, %v4236_v12 }
  0x92   :  { %3140 = vmatpush3.bf16.msra.mxu1 %v3139_v30  ;;  %v1083_v36 = vsub.f32 %v4231_v27, %v5447_v44  ;;  %v631_v23 = vadd.f32 %v629_v1, %v627_v55  ;;  %v5449_v61 = vand.u32 4294901760, %v4258_v8  ;;  %491 = vrot.lane.b32.xlu1 %v482_v15, %s3582_s10  ;;  %v5555_v44 = vand.u32 4294901760, %v4083_v39 }
  0x93   :  { %v625_v24 = vsub.f32 %v621_v3, %v623_v54  ;;  %v566_v9 = vmul.f32 %v538_v42, %v4176_v62  ;;  %v574_v63 = vmul.f32 %v538_v42, %v4180_v48  ;;  %549 = vrot.lane.b32.xlu0 %v538_v42, %s3582_s10  ;;  %v568_v56 = vmul.f32 %v544_v11, %v4180_v48 }
  0x94   :  { %v1084_v4 = vand.u32 4294901760, %v1083_v36  ;;  %v572_v14 = vmul.f32 %v544_v11, %v4176_v62  ;;  %v647_v30 = vmul.f32 %v631_v23, %v4073_v21  ;;  %v651_v55 = vmul.f32 %v631_v23, %v4077_v47 }
  0x95   :  { %v645_v60 = vmul.f32 %v625_v24, %v4077_v47  ;;  %633 = vst.msk [vmem:[#allocation2 + $0x18] sm:$0xff] %vm463_vm9, %v625_v24  ;;  %v570_v1 = vsub.f32 %v566_v9, %v568_v56  ;;  %v653_v3 = vmul.f32 %v625_v24, %v4073_v21  ;;  %v1090_v15 = vsub.f32 %v4236_v12, %v5446_v40  ;;  %v4308_v56 = vld [vmem:[#allocation6 + $0xf0] sm:$0xff]  ;;  %v4310_v40 = vld [vmem:[#allocation6 + $0xf8] sm:$0xff] }
  0x96   :  { %v4293_v54 = vsub.f32 %v4258_v8, %v5449_v61  ;;  %v4295_v42 = vadd.f32 %v574_v63, %v572_v14  ;;  %v4300_v47 = vsub.f32 %v4260_v46, %v5448_v50  ;;  %v5551_v9 = vand.u32 4294901760, %v4005_v19  ;;  %502 = vrot.lane.b32.xlu1 %v4201_v35, %s3583_s11  ;;  %v699_v35 = vld [vmem:[#allocation6 + $0x70] sm:$0xff] }
  0x97   :  { %v649_v36 = vsub.f32 %v645_v60, %v647_v30  ;;  %v5552_v24 = vand.u32 4294901760, %v4038_v58  ;;  %559 = vrot.lane.b32.xlu0 %v544_v11, %s3583_s11  ;;  %v655_v63 = vadd.f32 %v653_v3, %v651_v55  ;;  %v590_v14 = vmul.f32 %v570_v1, %v4176_v62  ;;  %578 = vst.msk [vmem:[#allocation2 + $0x30] sm:$0xff] %vm463_vm9, %v570_v1  ;;  %v700_v55 = vld [vmem:[#allocation6 + $0x78] sm:$0xff] }
  0x98   :  { %v598_v60 = vmul.f32 %v570_v1, %v4180_v48  ;;  %v1091_v19 = vand.u32 4294901760, %v1090_v15  ;;  %v592_v58 = vmul.f32 %v4295_v42, %v4180_v48  ;;  %v596_v30 = vmul.f32 %v4295_v42, %v4176_v62 }
  0x99   :  { %v4306_v21 = vpack.c.bf16 %v5552_v24, %v5551_v9  ;;  %v847_v24 = vand.u32 4294901760, %v4308_v56  ;;  %v850_v1 = vand.u32 4294901760, %v4310_v40  ;;  %v5554_v15 = vand.u32 4294901760, %v4081_v45 }
  0x9a   :  { %v3141_v3 = vpack.c.bf16 %v1091_v19, %v1084_v4  ;;  %v4333_v61 = vsub.f32 %v590_v14, %v592_v58  ;;  %v4335_v9 = vadd.f32 %v598_v60, %v596_v30  ;;  %v5557_v11 = vand.u32 4294901760, %v4293_v54  ;;  %581 = vrot.lane.b32.xlu1 %v4211_v0, %s3581_s1 }
  0x9b   :  { %5553 = vst [vmem:[#allocation25_spill] sm:$0xff] %v4306_v21  ;;  %3106 = vmatprep.subr.bf16.mxu0 %v4306_v21  ;;  %v4331_v50 = vpack.c.bf16 %v5555_v44, %v5554_v15  ;;  %v5558_v4 = vand.u32 4294901760, %v4300_v47  ;;  %637 = vrot.lane.b32.xlu0 %v631_v23, %s3581_s1  ;;  %v4347_v45 = vsub.f32 %v4308_v56, %v847_v24  ;;  %v799_v44 = vand.u32 4294901760, %v699_v35 }
  0x9c   :  { %v971_v21 = vsub.f32 %v4293_v54, %v5557_v11  ;;  %v4350_v39 = vsub.f32 %v4310_v40, %v850_v1  ;;  %v802_v14 = vand.u32 4294901760, %v700_v55  ;;  %v628_v60 = vmul.f32 %v4335_v9, %v4176_v62  ;;  %3142 = vmatprep.subr.bf16.mxu1 %v3141_v3 }
  0x9d   :  { %5556 = vst [vmem:[#allocation26_spill] sm:$0xff] %v4331_v50  ;;  %v978_v19 = vsub.f32 %v4300_v47, %v5558_v4  ;;  %v630_v58 = vmul.f32 %v4333_v61, %v4180_v48  ;;  %v622_v23 = vmul.f32 %v4333_v61, %v4176_v62  ;;  %v624_v0 = vmul.f32 %v4335_v9, %v4180_v48 }
  0x9e   :  { %v972_v56 = vand.u32 4294901760, %v971_v21  ;;  %v1096_v40 = vand.u32 4294901760, %v4347_v45  ;;  %v5456_v11 = vand.u32 4294901760, %v4350_v39  ;;  %3108 = vmatpush3.bf16.msra.mxu0 %v4331_v50  ;;  %v4363_v43 = vsub.f32 %v699_v35, %v799_v44  ;;  %603 = vrot.lane.b32.xlu1 %v4247_v17, %s3582_s10 }
  0x9f   :  { %v979_v30 = vand.u32 4294901760, %v978_v19  ;;  %v632_v15 = vadd.f32 %v630_v58, %v628_v60  ;;  %v626_v4 = vsub.f32 %v622_v23, %v624_v0  ;;  %v4365_v5 = vsub.f32 %v700_v55, %v802_v14  ;;  %659 = vrot.lane.b32.xlu0 %v649_v36, %s3582_s10 }
  0xa0   :  { %v1097_v21 = vsub.f32 %v4347_v45, %v1096_v40  ;;  %v1104_v19 = vsub.f32 %v4350_v39, %v5456_v11  ;;  %v984_v60 = vand.u32 4294901760, %v4363_v43  ;;  %v5559_v23 = vand.u32 4294901760, %v4190_v59 }
  0xa1   :  { %v3143_v3 = vpack.c.bf16 %v979_v30, %v972_v56  ;;  %634 = vst.msk [vmem:[#allocation2 + $0x38] sm:$0xff] %vm463_vm9, %v626_v4  ;;  %v991_v36 = vand.u32 4294901760, %v4365_v5  ;;  %v646_v17 = vmul.f32 %v626_v4, %v4176_v62  ;;  %v648_v58 = vmul.f32 %v632_v15, %v4180_v48 }
  0xa2   :  { %v1098_v35 = vand.u32 4294901760, %v1097_v21  ;;  %v1105_v55 = vand.u32 4294901760, %v1104_v19  ;;  %v5560_v0 = vand.u32 4294901760, %v4192_v34  ;;  %v5562_v30 = vand.u32 4294901760, %v4258_v8  ;;  %613 = vrot.lane.b32.xlu1 %v4249_v6, %s3583_s11 }
  0xa3   :  { %3144 = vmatpush3.bf16.msra.mxu1 %v3143_v3  ;;  %v5563_v3 = vand.u32 4294901760, %v4260_v46  ;;  %669 = vrot.lane.b32.xlu0 %v655_v63, %s3583_s11  ;;  %v985_v11 = vsub.f32 %v4363_v43, %v984_v60  ;;  %v992_v59 = vsub.f32 %v4365_v5, %v991_v36  ;;  %v652_v34 = vmul.f32 %v632_v15, %v4176_v62  ;;  %v5587_v62 = vld [vmem:[#allocation17_spill] sm:$0xff] }
  0xa4   :  { %v4385_v56 = vpack.c.bf16 %v5560_v0, %v5559_v23  ;;  %v3145_v19 = vpack.c.bf16 %v1105_v55, %v1098_v35  ;;  %v4400_v23 = vpack.c.bf16 %v850_v1, %v847_v24  ;;  %v654_v8 = vmul.f32 %v626_v4, %v4180_v48 }
  0xa5   :  { %v4391_v21 = vpack.c.bf16 %v5563_v3, %v5562_v30  ;;  %v986_v46 = vand.u32 4294901760, %v985_v11  ;;  %v993_v0 = vand.u32 4294901760, %v992_v59  ;;  %v4404_v63 = vpack.c.bf16 %v802_v14, %v799_v44 }
  0xa6   :  { %5561 = vst [vmem:[#allocation27_spill] sm:$0xff] %v4385_v56  ;;  %3110 = vmatprep.subr.bf16.mxu0 %v4385_v56  ;;  %5564 = vst [vmem:[#allocation28_spill] sm:$0xff] %v4400_v23  ;;  %3146 = vmatprep.subr.bf16.mxu1 %v3145_v19  ;;  %v650_v6 = vsub.f32 %v646_v17, %v648_v58  ;;  %v3149_v35 = vpack.c.bf16 %v3666_v22, %v3660_v18  ;;  %v5565_v58 = vand.u32 4294901760, %v4152_v25  ;;  %vm495_vm2 = vcmask 785920  }
  0xa7   :  { %3112 = vmatpush3.bf16.msra.mxu0 %v4391_v21  ;;  %639 = vrot.lane.b32.xlu0 %v632_v15, %s3581_s1  ;;  %v3147_v48 = vpack.c.bf16 %v993_v0, %v986_v46  ;;  %v5566_v30 = vand.u32 4294901760, %v4161_v49  ;;  %v5569_v19 = vand.u32 4294901760, %v4236_v12  ;;  %vm506_vm3 = vcmask 1048320   ;;  %v5579_v15 = vld [vmem:[#allocation12_spill] sm:$0xff] }
  0xa8   :  { %3114 = vmatprep.subr.bf16.mxu0 %v4400_v23  ;;  %583 = vrot.lane.b32.xlu1 %v4295_v42, %s3581_s1  ;;  %v656_v42 = vadd.f32 %v654_v8, %v652_v34  ;;  %v5571_v34 = vand.u32 4294901760, %v4293_v54  ;;  %v5572_v8 = vand.u32 4294901760, %v4300_v47 }
  0xa9   :  { %3148 = vmatpush3.bf16.msra.mxu1 %v3147_v48  ;;  %v4444_v3 = vpack.c.bf16 %v5566_v30, %v5565_v58 }
  0xaa   :  { %3182 = vmatprep.subr.bf16.mxu1 %v3773_v57  ;;  %v4456_v46 = vpack.c.bf16 %v5572_v8, %v5571_v34 }
  0xab   :  { %3116 = vmatpush3.bf16.msra.mxu0 %v4404_v63  ;;  %661 = vrot.lane.b32.xlu0 %v650_v6, %s3582_s10  ;;  %5567 = vst [vmem:[#allocation29_spill] sm:$0xff] %v4444_v3  ;;  %v4464_v6 = vpack.c.bf16 %v991_v36, %v984_v60 }
  0xac   :  { %3150 = vmatprep.subr.bf16.mxu0 %v3149_v35  ;;  %605 = vrot.lane.b32.xlu1 %v4333_v61, %s3582_s10  ;;  %v5568_v61 = vand.u32 4294901760, %v4231_v27  ;;  %5573 = vst [vmem:[#allocation31_spill] sm:$0xff] %v4456_v46 }
  0xad   :  { %5576 = vst [vmem:[#allocation33_spill] sm:$0xff] %v4464_v6 }
  0xae   :  { %v4450_v59 = vpack.c.bf16 %v5569_v19, %v5568_v61 }
  0xaf   :  { %671 = vrot.lane.b32.xlu0 %v656_v42, %s3583_s11 }
  0xb0   :  { %615 = vrot.lane.b32.xlu1 %v4335_v9, %s3583_s11  ;;  %5570 = vst [vmem:[#allocation30_spill] sm:$0xff] %v4450_v59  ;;  %v5574_v9 = vand.u32 4294901760, %v4350_v39  ;;  %v5592_v59 = vld [vmem:[#allocation24_spill] sm:$0xff] }
  0xb2   :  { %v4462_v0 = vpack.c.bf16 %v5574_v9, %v1096_v40 }
  0xb4   :  { %5575 = vst [vmem:[#allocation32_spill] sm:$0xff] %v4462_v0 }
  0xeb   :  { %v469_v35 = vpop.permute.xlu0 %468 }
  0xec   :  { %475 = vst.msk [vmem:[#allocation2] sm:$0xff] %vm474_vm1, %v469_v35 }
  0xef   :  { %v490_v48 = vpop.permute.xlu1 %489 }
  0xf0   :  { %496 = vst.msk [vmem:[#allocation2] sm:$0xff] %vm495_vm2, %v490_v48 }
  0xf4   :  { %v526_v42 = vpop.permute.xlu0 %525 }
  0xf5   :  { %531 = vst.msk [vmem:[#allocation2 + $0x8] sm:$0xff] %vm474_vm1, %v526_v42 }
  0xf8   :  { %v548_v58 = vpop.permute.xlu1 %547 }
  0xf9   :  { %v558_v30 = vpop.permute.xlu0 %557  ;;  %553 = vst.msk [vmem:[#allocation2 + $0x8] sm:$0xff] %vm495_vm2, %v548_v58 }
  0xfa   :  { %563 = vst.msk [vmem:[#allocation2 + $0x8] sm:$0xff] %vm506_vm3, %v558_v30 }
  0xfc   :  { %v501_v40 = vpop.permute.xlu1 %500 }
  0xfd   :  { %507 = vst.msk [vmem:[#allocation2] sm:$0xff] %vm506_vm3, %v501_v40 }
 0x100   :  { %v528_v60 = vpop.permute.xlu0 %527  ;;  %v471_v36 = vpop.permute.xlu1 %470 }
 0x101   :  { %532 = vst.msk [vmem:[#allocation2 + $0x28] sm:$0xff] %vm474_vm1, %v528_v60  ;;  %476 = vst.msk [vmem:[#allocation2 + $0x20] sm:$0xff] %vm474_vm1, %v471_v36  ;;  %v678_v61 = vld [vmem:[#allocation2 + $0x8] sm:$0xff] }
 0x102   :  { %v4474_v19 = vand.u32 4294901760, %v678_v61 }
 0x104   :  { %v492_v8 = vpop.permute.xlu1 %491  ;;  %1108 = vmatprep.mubr.f32.mxu1 %v4474_v19  ;;  %v677_v9 = vld [vmem:[#allocation2] sm:$0xff]  ;;  %v4478_v35 = vsub.f32 %v678_v61, %v4474_v19 }
 0x105   :  { %v550_v34 = vpop.permute.xlu0 %549  ;;  %497 = vst.msk [vmem:[#allocation2 + $0x20] sm:$0xff] %vm495_vm2, %v492_v8  ;;  %v4482_v48 = vand.u32 4294901760, %v677_v9  ;;  %v3151_v8 = vpack.c.bf16 %v3683_v31, %v3673_v26 }
 0x106   :  { %554 = vst.msk [vmem:[#allocation2 + $0x28] sm:$0xff] %vm495_vm2, %v550_v34  ;;  %v854_v42 = vand.u32 4294901760, %v4478_v35 }
 0x107   :  { %5577 = vst [vmem:[#allocation34_spill] sm:$0xff] %v4482_v48  ;;  %1110 = vmatmul.mubr.f32.vlgmr.msra.gmra.mrb[0].mxu1 %v4482_v48  ;;  %v4487_v58 = vsub.f32 %v677_v9, %v4482_v48 }
 0x108   :  { %3184 = vmatpush3.bf16.msra.mxu1 %v3834_v38  ;;  %v503_v40 = vpop.permute.xlu1 %502  ;;  %v855_v60 = vsub.f32 %v4478_v35, %v854_v42 }
 0x109   :  { %v560_v30 = vpop.permute.xlu0 %559  ;;  %508 = vst.msk [vmem:[#allocation2 + $0x20] sm:$0xff] %vm506_vm3, %v503_v40  ;;  %3186 = vmatprep.subr.bf16.mxu1 %v3965_v41  ;;  %v5457_v36 = vand.u32 4294901760, %v4487_v58  ;;  %v3153_v40 = vpack.c.bf16 %v3783_v32, %v3764_v7 }
 0x10a   :  { %564 = vst.msk [vmem:[#allocation2 + $0x28] sm:$0xff] %vm506_vm3, %v560_v30  ;;  %v856_v61 = vand.u32 4294901760, %v855_v60  ;;  %v5578_v60 = vld [vmem:[#allocation20_spill] sm:$0xff] }
 0x10b   :  { %v861_v34 = vsub.f32 %v4487_v58, %v5457_v36  ;;  %v5580_v36 = vld [vmem:[#allocation13_spill] sm:$0xff] }
 0x10c   :  { %3188 = vmatpush3.bf16.msra.mxu1 %v3977_v20  ;;  %857 = vmatprep.mubr.f32.mxu0 %v856_v61  ;;  %v582_v17 = vpop.permute.xlu1 %581  ;;  %v3155_v4 = vpack.c.bf16 %v5580_v36, %v5579_v15 }
 0x10d   :  { %v638_v9 = vpop.permute.xlu0 %637  ;;  %3190 = vmatprep.subr.bf16.mxu1 %v4036_v33  ;;  %v862_v30 = vand.u32 4294901760, %v861_v34  ;;  %587 = vst.msk [vmem:[#allocation2 + $0x10] sm:$0xff] %vm474_vm1, %v582_v17  ;;  %v5582_v34 = vld [vmem:[#allocation21_spill] sm:$0xff]  ;;  %v5584_v17 = vld [vmem:[#allocation14_spill] sm:$0xff] }
 0x10e   :  { %643 = vst.msk [vmem:[#allocation2 + $0x18] sm:$0xff] %vm474_vm1, %v638_v9 }
 0x10f   :  { %863 = vmatmul.mubr.f32.vlgmr.msra.gmra.mrb[0].mxu0 %v862_v30 }
 0x110   :  { %3152 = vmatpush3.bf16.msra.mxu0 %v3151_v8  ;;  %3192 = vmatpush3.bf16.msra.mxu1 %v5578_v60  ;;  %v681_v55 = vld [vmem:[#allocation2 + $0x20] sm:$0xff]  ;;  %v604_v14 = vpop.permute.xlu1 %603  ;;  %v5585_v8 = vld [vmem:[#allocation15_spill] sm:$0xff] }
 0x111   :  { %v682_v61 = vld [vmem:[#allocation2 + $0x28] sm:$0xff]  ;;  %v660_v11 = vpop.permute.xlu0 %659  ;;  %3154 = vmatprep.subr.bf16.mxu0 %v3153_v40  ;;  %3194 = vmatprep.subr.bf16.mxu1 %v5582_v34  ;;  %v4512_v1 = vand.u32 4294901760, %v681_v55  ;;  %609 = vst.msk [vmem:[#allocation2 + $0x10] sm:$0xff] %vm495_vm2, %v604_v14  ;;  %v3157_v9 = vpack.c.bf16 %v5585_v8, %v5584_v17  ;;  %v5586_v40 = vld [vmem:[#allocation16_spill] sm:$0xff]  ;;  %v5588_v14 = vld [vmem:[#allocation22_spill] sm:$0xff] }
 0x112   :  { %v4509_v44 = vand.u32 4294901760, %v682_v61  ;;  %665 = vst.msk [vmem:[#allocation2 + $0x18] sm:$0xff] %vm495_vm2, %v660_v11  ;;  %v3159_v6 = vpack.c.bf16 %v5587_v62, %v5586_v40 }
 0x113   :  { %5583 = vst [vmem:[#allocation12_spill] sm:$0xff] %v4512_v1  ;;  %v4523_v24 = vsub.f32 %v681_v55, %v4512_v1  ;;  %v5589_v55 = vld [vmem:[#allocation23_spill] sm:$0xff] }
 0x114   :  { %5581 = vst [vmem:[#allocation20_spill] sm:$0xff] %v4509_v44  ;;  %1115 = vmatprep.mubr.f32.mxu1 %v4509_v44  ;;  %v4520_v30 = vsub.f32 %v682_v61, %v4509_v44  ;;  %3156 = vmatpush3.bf16.msra.mxu0 %v3155_v4  ;;  %v614_v0 = vpop.permute.xlu1 %613  ;;  %v4534_v4 = vld [vmem:[#allocation6 + $0x150] sm:$0xff]  ;;  %v4536_v61 = vld [vmem:[#allocation6 + $0x158] sm:$0xff] }
 0x115   :  { %1117 = vmatmul.mubr.f32.gmra.mrb[2].mxu1 %v4512_v1  ;;  %v670_v11 = vpop.permute.xlu0 %669  ;;  %v5465_v48 = vand.u32 4294901760, %v4523_v24  ;;  %619 = vst.msk [vmem:[#allocation2 + $0x10] sm:$0xff] %vm506_vm3, %v614_v0  ;;  %3158 = vmatprep.subr.bf16.mxu0 %v3157_v9  ;;  %5590 = vst [vmem:[#allocation13_spill] sm:$0xff] %v4534_v4  ;;  %v5593_v9 = vpack.c.bf16 %v3929_v29, %v3924_v10 }
 0x116   :  { %3196 = vmatpush3.bf16.msra.mxu1 %v5588_v14  ;;  %1368 = vmatprep.mubr.f32.mxu1 %v854_v42  ;;  %v5464_v46 = vand.u32 4294901760, %v4520_v30  ;;  %675 = vst.msk [vmem:[#allocation2 + $0x18] sm:$0xff] %vm506_vm3, %v670_v11  ;;  %5591 = vst [vmem:[#allocation21_spill] sm:$0xff] %v4536_v61  ;;  %v5596_v14 = vld [vmem:[#allocation25_spill] sm:$0xff] }
 0x117   :  { %3198 = vmatprep.subr.bf16.mxu1 %v5589_v55  ;;  %v876_v42 = vsub.f32 %v4523_v24, %v5465_v48  ;;  %v4552_v48 = vld [vmem:[#allocation6 + $0x1e0] sm:$0xff]  ;;  %v5599_v55 = vpack.c.bf16 %v3957_v28, %v3935_v51 }
 0x118   :  { %v870_v1 = vsub.f32 %v4520_v30, %v5464_v46  ;;  %3160 = vmatpush3.bf16.msra.mxu0 %v3159_v6  ;;  %v5466_v46 = vand.u32 4294901760, %v4534_v4  ;;  %5594 = vst [vmem:[#allocation14_spill] sm:$0xff] %v4552_v48  ;;  %v4554_v6 = vld [vmem:[#allocation6 + $0x1e8] sm:$0xff] }
 0x119   :  { %v640_v44 = vpop.permute.xlu0 %639  ;;  %3162 = vmatprep.subr.bf16.mxu0 %v5593_v9  ;;  %v877_v3 = vand.u32 4294901760, %v876_v42  ;;  %5595 = vst [vmem:[#allocation15_spill] sm:$0xff] %v4554_v6  ;;  %v5606_v9 = vand.u32 4294901760, %v4552_v48 }
 0x11a   :  { %v584_v11 = vpop.permute.xlu1 %583  ;;  %3200 = vmatpush3.bf16.msra.mxu1 %v5592_v59  ;;  %v871_v0 = vand.u32 4294901760, %v870_v1  ;;  %644 = vst.msk [vmem:[#allocation2 + $0x38] sm:$0xff] %vm474_vm1, %v640_v44  ;;  %v4557_v1 = vld [vmem:[#allocation6 + $0x160] sm:$0xff]  ;;  %v4559_v59 = vld [vmem:[#allocation6 + $0x168] sm:$0xff] }
 0x11b   :  { %588 = vst.msk [vmem:[#allocation2 + $0x30] sm:$0xff] %vm474_vm1, %v584_v11  ;;  %3202 = vmatprep.subr.bf16.mxu1 %v5596_v14  ;;  %5597 = vst [vmem:[#allocation16_spill] sm:$0xff] %v4557_v1  ;;  %v4580_v14 = vld [vmem:[#allocation6 + $0x1f0] sm:$0xff] }
 0x11c   :  { %872 = vmatprep.mubr.f32.mxu0 %v871_v0  ;;  %5598 = vst [vmem:[#allocation17_spill] sm:$0xff] %v4559_v59  ;;  %3164 = vmatpush3.bf16.msra.mxu0 %v5599_v55  ;;  %v5600_v0 = vand.u32 4294901760, %v4536_v61  ;;  %5601 = vst [vmem:[#allocation35_spill] sm:$0xff] %v4580_v14  ;;  %v4582_v55 = vld [vmem:[#allocation6 + $0x1f8] sm:$0xff] }
 0x11d   :  { %878 = vmatmul.mubr.f32.gmra.mrb[2].mxu0 %v877_v3  ;;  %v662_v42 = vpop.permute.xlu0 %661  ;;  %v4572_v3 = vsub.f32 %v4534_v4, %v5466_v46  ;;  %5602 = vst [vmem:[#allocation36_spill] sm:$0xff] %v4582_v55  ;;  %v4590_v46 = vld [vmem:[#allocation6 + $0x170] sm:$0xff]  ;;  %v4597_v4 = vsub.f32 %v4552_v48, %v5606_v9  ;;  %v4663_v48 = vld [vmem:[#allocation6 + $0x108] sm:$0xff] }
 0x11e   :  { %v606_v44 = vpop.permute.xlu1 %605  ;;  %3204 = vmatpush3.bf16.msra.mxu1 %v4331_v50  ;;  %666 = vst.msk [vmem:[#allocation2 + $0x38] sm:$0xff] %vm495_vm2, %v662_v42  ;;  %v4577_v11 = vsub.f32 %v4536_v61, %v5600_v0  ;;  %1252 = vmatprep.mubr.f32.mxu0 %v4478_v35  ;;  %v5603_v42 = vpack.c.bf16 %v3996_v2, %v3991_v16  ;;  %5604 = vst [vmem:[#allocation37_spill] sm:$0xff] %v4590_v46  ;;  %v4592_v0 = vld [vmem:[#allocation6 + $0x178] sm:$0xff]  ;;  %v5607_v35 = vand.u32 4294901760, %v4554_v6 }
 0x11f   :  { %610 = vst.msk [vmem:[#allocation2 + $0x30] sm:$0xff] %vm495_vm2, %v606_v44  ;;  %3206 = vmatprep.subr.bf16.mxu1 %v4385_v56  ;;  %5605 = vst [vmem:[#allocation38_spill] sm:$0xff] %v4592_v0  ;;  %v5608_v2 = vpack.c.bf16 %v4020_v52, %v4015_v37  ;;  %v5610_v56 = vpack.c.bf16 %v4109_v53, %v4104_v13  ;;  %v5612_v9 = vand.u32 4294901760, %v4572_v3 }
 0x120   :  { %3166 = vmatprep.subr.bf16.mxu0 %v5603_v42  ;;  %v4602_v50 = vsub.f32 %v4554_v6, %v5607_v35  ;;  %v5609_v35 = vand.u32 4294901760, %v4557_v1  ;;  %v4636_v6 = vld [vmem:[#allocation6 + $0x180] sm:$0xff] }
 0x121   :  { %v672_v61 = vpop.permute.xlu0 %671  ;;  %3168 = vmatpush3.bf16.msra.mxu0 %v5608_v2  ;;  %v5611_v2 = vand.u32 4294901760, %v4559_v59 }
 0x122   :  { %v616_v42 = vpop.permute.xlu1 %615  ;;  %3208 = vmatpush3.bf16.msra.mxu1 %v4391_v21  ;;  %676 = vst.msk [vmem:[#allocation2 + $0x38] sm:$0xff] %vm506_vm3, %v672_v61  ;;  %v4617_v44 = vsub.f32 %v4557_v1, %v5609_v35  ;;  %3170 = vmatprep.subr.bf16.mxu0 %v5610_v56  ;;  %v5613_v35 = vand.u32 4294901760, %v4577_v11  ;;  %v4638_v56 = vld [vmem:[#allocation6 + $0x188] sm:$0xff] }
 0x123   :  { %620 = vst.msk [vmem:[#allocation2 + $0x30] sm:$0xff] %vm506_vm3, %v616_v42  ;;  %3210 = vmatprep.subr.bf16.mxu1 %v4400_v23  ;;  %v4626_v16 = vsub.f32 %v4559_v59, %v5611_v2  ;;  %v5615_v2 = vand.u32 4294901760, %v4580_v14  ;;  %v5616_v42 = vand.u32 4294901760, %v4582_v55  ;;  %v5618_v23 = vpack.c.bf16 %v4236_v12, %v4231_v27 }
 0x124   :  { %v4634_v1 = vpack.c.bf16 %v5613_v35, %v5612_v9  ;;  %v5617_v9 = vpack.c.bf16 %v4161_v49, %v4152_v25  ;;  %v5620_v49 = vand.u32 4294901760, %v4592_v0  ;;  %v5621_v12 = vand.u32 4294901760, %v4597_v4 }
 0x125   :  { %v4645_v61 = vsub.f32 %v4580_v14, %v5615_v2  ;;  %v4650_v59 = vsub.f32 %v4582_v55, %v5616_v42  ;;  %v4661_v2 = vld [vmem:[#allocation6 + $0x100] sm:$0xff]  ;;  %v5624_v35 = vand.u32 4294901760, %v4487_v58 }
 0x126   :  { %5614 = vst [vmem:[#allocation39_spill] sm:$0xff] %v4634_v1  ;;  %3172 = vmatpush3.bf16.msra.mxu0 %v5617_v9  ;;  %3212 = vmatpush3.bf16.msra.mxu1 %v4404_v63  ;;  %v5619_v1 = vand.u32 4294901760, %v4590_v46  ;;  %v4674_v9 = vsub.f32 %v4592_v0, %v5620_v49  ;;  %v5625_v49 = vand.u32 4294901760, %v4617_v44  ;;  %v5626_v0 = vand.u32 4294901760, %v4626_v16 }
 0x127   :  { %3174 = vmatprep.subr.bf16.mxu0 %v5618_v23  ;;  %3246 = vmatprep.subr.bf16.mxu1 %v3773_v57  ;;  %v5622_v57 = vand.u32 4294901760, %v4602_v50  ;;  %v4701_v23 = vld [vmem:[#allocation6 + $0x190] sm:$0xff] }
 0x128   :  { %v4669_v25 = vsub.f32 %v4590_v46, %v5619_v1  ;;  %v5481_v1 = vand.u32 4294901760, %v4645_v61  ;;  %v4692_v55 = vpack.c.bf16 %v5626_v0, %v5625_v49  ;;  %v4703_v46 = vld [vmem:[#allocation6 + $0x198] sm:$0xff]  ;;  %v5630_v0 = vpack.c.bf16 %v4350_v39, %v4347_v45  ;;  %v4732_v39 = vld [vmem:[#allocation6 + $0x110] sm:$0xff] }
 0x129   :  { %v4680_v27 = vpack.c.bf16 %v5622_v57, %v5621_v12  ;;  %1372 = vmatmul.mubr.f32.vlgmr.msra.gmra.mrb[4].mxu1 %v5624_v35  ;;  %v5628_v12 = vpack.c.bf16 %v4300_v47, %v4293_v54  ;;  %v5629_v57 = vand.u32 4294901760, %v4520_v30  ;;  %v5631_v54 = vand.u32 4294901760, %v3660_v18 }
 0x12a   :  { %5627 = vst [vmem:[#allocation41_spill] sm:$0xff] %v4692_v55  ;;  %3248 = vmatpush3.bf16.msra.mxu1 %v3834_v38  ;;  %v5632_v47 = vand.u32 4294901760, %v3666_v22  ;;  %v5633_v35 = vand.u32 4294901760, %v4650_v59  ;;  %v5635_v38 = vand.u32 4294901760, %v4636_v6  ;;  %v5637_v18 = vand.u32 4294901760, %v4638_v56  ;;  %v4941_v55 = vld [vmem:[#allocation6 + $0x1d8] sm:$0xff] }
 0x12b   :  { %5623 = vst [vmem:[#allocation40_spill] sm:$0xff] %v4680_v27  ;;  %3176 = vmatpush3.bf16.msra.mxu0 %v5628_v12  ;;  %1379 = vmatprep.mubr.f32.mxu1 %v5629_v57  ;;  %v5487_v12 = vand.u32 4294901760, %v4669_v25  ;;  %v5482_v57 = vand.u32 4294901760, %v4674_v9 }
 0x12c   :  { %3178 = vmatprep.subr.bf16.mxu0 %v5630_v0  ;;  %v3213_v49 = vpack.c.bf16 %v5632_v47, %v5631_v54  ;;  %v4719_v42 = vpack.c.bf16 %v5633_v35, %v5481_v1  ;;  %3250 = vmatprep.subr.bf16.mxu1 %v3965_v41  ;;  %v4725_v45 = vsub.f32 %v4636_v6, %v5635_v38  ;;  %v5639_v0 = vand.u32 4294901760, %v4523_v24 }
 0x12d   :  { %v4730_v22 = vsub.f32 %v4638_v56, %v5637_v18  ;;  %v4742_v41 = vpack.c.bf16 %v5482_v57, %v5487_v12  ;;  %v5641_v47 = vpack.c.bf16 %v4365_v5, %v4363_v43  ;;  %v5642_v38 = vand.u32 4294901760, %v3673_v26 }
 0x12e   :  { %5634 = vst [vmem:[#allocation42_spill] sm:$0xff] %v4719_v42  ;;  %5636 = vst [vmem:[#allocation43_spill] sm:$0xff] %v4725_v45  ;;  %1383 = vmatmul.mubr.f32.gmra.mrb[6].mxu1 %v5639_v0  ;;  %v5643_v18 = vand.u32 4294901760, %v3683_v31  ;;  %v5644_v1 = vand.u32 4294901760, %v4661_v2  ;;  %v5646_v35 = vand.u32 4294901760, %v4663_v48  ;;  %v5648_v43 = vand.u32 4294901760, %v3764_v7 }
 0x12f   :  { %5638 = vst [vmem:[#allocation44_spill] sm:$0xff] %v4730_v22  ;;  %5640 = vst [vmem:[#allocation45_spill] sm:$0xff] %v4742_v41  ;;  %3180 = vmatpush3.bf16.msra.mxu0 %v5641_v47  ;;  %1660 = vmatprep.mubr.f32.mxu1 %v4474_v19  ;;  %v5649_v26 = vand.u32 4294901760, %v3783_v32  ;;  %v5488_v31 = vand.u32 4294901760, %v4732_v39  ;;  %v5483_v47 = vand.u32 4294901760, %v4730_v22  ;;  %v5652_v7 = vand.u32 4294901760, %v4703_v46 }
 0x130   :  { %v3215_v0 = vpack.c.bf16 %v5643_v18, %v5642_v38  ;;  %v4755_v54 = vsub.f32 %v4661_v2, %v5644_v1  ;;  %v4760_v57 = vsub.f32 %v4663_v48, %v5646_v35  ;;  %3252 = vmatpush3.bf16.msra.mxu1 %v3977_v20  ;;  %3214 = vmatprep.subr.bf16.mxu0 %v3213_v49  ;;  %v5484_v1 = vand.u32 4294901760, %v4725_v45  ;;  %v4771_v38 = vld [vmem:[#allocation6 + $0x118] sm:$0xff] }
 0x131   :  { %v3217_v5 = vpack.c.bf16 %v5649_v26, %v5648_v43  ;;  %3254 = vmatprep.subr.bf16.mxu1 %v4036_v33  ;;  %v5650_v20 = vand.u32 4294901760, %v4701_v23  ;;  %v4782_v32 = vsub.f32 %v4703_v46, %v5652_v7  ;;  %v5654_v33 = vand.u32 4294901760, %v5579_v15  ;;  %v4791_v26 = vld [vmem:[#allocation6 + $0x1a0] sm:$0xff]  ;;  %v4895_v42 = vld [vmem:[#allocation6 + $0x138] sm:$0xff] }
 0x132   :  { %5645 = vst [vmem:[#allocation46_spill] sm:$0xff] %v4755_v54  ;;  %5647 = vst [vmem:[#allocation47_spill] sm:$0xff] %v4760_v57  ;;  %1255 = vmatmul.mubr.f32.vlgmr.msra.gmra.mrb[4].mxu0 %v4487_v58  ;;  %v5655_v35 = vand.u32 4294901760, %v5580_v36  ;;  %v5486_v58 = vand.u32 4294901760, %v4755_v54  ;;  %v5485_v43 = vand.u32 4294901760, %v4760_v57  ;;  %v5657_v7 = vand.u32 4294901760, %v5585_v8 }
 0x133   :  { %v4777_v49 = vsub.f32 %v4701_v23, %v5650_v20  ;;  %5653 = vst [vmem:[#allocation49_spill] sm:$0xff] %v4782_v32  ;;  %1261 = vmatprep.mubr.f32.mxu0 %v4520_v30  ;;  %3216 = vmatpush3.bf16.msra.mxu0 %v3215_v0  ;;  %v5656_v20 = vand.u32 4294901760, %v5584_v17  ;;  %v5492_v0 = vand.u32 4294901760, %v4771_v38  ;;  %v4802_v15 = vsub.f32 %v4732_v39, %v5488_v31  ;;  %v4804_v36 = vld [vmem:[#allocation6 + $0x1a8] sm:$0xff] }
 0x134   :  { %v3219_v18 = vpack.c.bf16 %v5655_v35, %v5654_v33  ;;  %3256 = vmatpush3.bf16.msra.mxu1 %v5578_v60  ;;  %3218 = vmatprep.subr.bf16.mxu0 %v3217_v5  ;;  %v1917_v60 = vsub.f32 %v4725_v45, %v5484_v1  ;;  %v1924_v17 = vsub.f32 %v4730_v22, %v5483_v47  ;;  %v5489_v5 = vand.u32 4294901760, %v4782_v32  ;;  %v4829_v1 = vld [vmem:[#allocation6 + $0x120] sm:$0xff] }
 0x135   :  { %5651 = vst [vmem:[#allocation48_spill] sm:$0xff] %v4777_v49  ;;  %v3221_v30 = vpack.c.bf16 %v5657_v7, %v5656_v20  ;;  %5658 = vst [vmem:[#allocation50_spill] sm:$0xff] %v4802_v15  ;;  %3258 = vmatprep.subr.bf16.mxu1 %v5582_v34  ;;  %v5490_v8 = vand.u32 4294901760, %v4777_v49  ;;  %v5491_v33 = vand.u32 4294901760, %v4791_v26  ;;  %v5659_v34 = vand.u32 4294901760, %v5586_v40 }
 0x136   :  { %1264 = vmatmul.mubr.f32.gmra.mrb[6].mxu0 %v4523_v24  ;;  %v5660_v35 = vand.u32 4294901760, %v5587_v62  ;;  %v1805_v7 = vsub.f32 %v4755_v54, %v5486_v58  ;;  %v1812_v24 = vsub.f32 %v4760_v57, %v5485_v43  ;;  %v5493_v47 = vand.u32 4294901760, %v4804_v36  ;;  %v4842_v43 = vld [vmem:[#allocation6 + $0x128] sm:$0xff] }
 0x137   :  { %3220 = vmatpush3.bf16.msra.mxu0 %v3219_v18  ;;  %1549 = vmatprep.mubr.f32.mxu0 %v4474_v19  ;;  %v5661_v18 = vld [vmem:[#allocation22_spill] sm:$0xff]  ;;  %v5662_v19 = vand.u32 4294901760, %v3924_v10  ;;  %v5663_v62 = vand.u32 4294901760, %v3929_v29  ;;  %v5665_v58 = vld [vmem:[#allocation23_spill] sm:$0xff]  ;;  %v5666_v12 = vand.u32 4294901760, %v3935_v51  ;;  %v1918_v10 = vand.u32 4294901760, %v1917_v60 }
 0x138   :  { %v3223_v20 = vpack.c.bf16 %v5660_v35, %v5659_v34  ;;  %3260 = vmatpush3.bf16.msra.mxu1 %v5661_v18  ;;  %3222 = vmatprep.subr.bf16.mxu0 %v3221_v30  ;;  %v4840_v35 = vsub.f32 %v4771_v38, %v5492_v0  ;;  %v5667_v30 = vand.u32 4294901760, %v3957_v28  ;;  %v1925_v31 = vand.u32 4294901760, %v1924_v17  ;;  %v4863_v28 = vld [vmem:[#allocation6 + $0x1b8] sm:$0xff]  ;;  %v5673_v0 = vld [vmem:[#allocation19_spill] sm:$0xff] }
 0x139   :  { %v3225_v40 = vpack.c.bf16 %v5663_v62, %v5662_v19  ;;  %3262 = vmatprep.subr.bf16.mxu1 %v5665_v58  ;;  %v1931_v29 = vsub.f32 %v4777_v49, %v5490_v8  ;;  %v1938_v19 = vsub.f32 %v4782_v32, %v5489_v5  ;;  %v4858_v62 = vsub.f32 %v4791_v26, %v5491_v33  ;;  %v4861_v58 = vld [vmem:[#allocation6 + $0x1b0] sm:$0xff]  ;;  %v5671_v8 = vld [vmem:[#allocation18_spill] sm:$0xff] }
 0x13a   :  { %5664 = vst [vmem:[#allocation22_spill] sm:$0xff] %v4840_v35  ;;  %v3227_v18 = vpack.c.bf16 %v5667_v30, %v5666_v12  ;;  %v1806_v12 = vand.u32 4294901760, %v1805_v7  ;;  %v1813_v60 = vand.u32 4294901760, %v1812_v24  ;;  %v4868_v17 = vsub.f32 %v4804_v36, %v5493_v47  ;;  %v5670_v5 = vld [vmem:[#allocation24_spill] sm:$0xff]  ;;  %v5676_v24 = vld [vmem:[#allocation25_spill] sm:$0xff] }
 0x13b   :  { %5668 = vst [vmem:[#allocation23_spill] sm:$0xff] %v4858_v62  ;;  %3224 = vmatpush3.bf16.msra.mxu0 %v3223_v20  ;;  %v5672_v33 = vand.u32 4294901760, %v5671_v8  ;;  %v5674_v51 = vand.u32 4294901760, %v5673_v0  ;;  %v5675_v41 = vand.u32 4294901760, %v4802_v15  ;;  %v5677_v47 = vand.u32 4294901760, %v4015_v37  ;;  %v4915_v37 = vld [vmem:[#allocation6 + $0x140] sm:$0xff] }
 0x13c   :  { %5669 = vst [vmem:[#allocation51_spill] sm:$0xff] %v4868_v17  ;;  %3264 = vmatpush3.bf16.msra.mxu1 %v5670_v5  ;;  %3226 = vmatprep.subr.bf16.mxu0 %v3225_v40  ;;  %v5678_v30 = vand.u32 4294901760, %v4020_v52  ;;  %v5679_v40 = vand.u32 4294901760, %v4104_v13  ;;  %v5680_v8 = vand.u32 4294901760, %v4109_v53  ;;  %v1932_v7 = vand.u32 4294901760, %v1931_v29  ;;  %v4903_v13 = vld [vmem:[#allocation6 + $0x1c0] sm:$0xff] }
 0x13d   :  { %v3229_v34 = vpack.c.bf16 %v5674_v51, %v5672_v33  ;;  %v4879_v20 = vsub.f32 %v4802_v15, %v5675_v41  ;;  %3266 = vmatprep.subr.bf16.mxu1 %v5676_v24  ;;  %v4893_v41 = vld [vmem:[#allocation6 + $0x130] sm:$0xff]  ;;  %v1939_v24 = vand.u32 4294901760, %v1938_v19  ;;  %v5681_v52 = vand.u32 4294901760, %v4829_v1  ;;  %v4905_v53 = vld [vmem:[#allocation6 + $0x1c8] sm:$0xff]  ;;  %v5685_v51 = vld [vmem:[#allocation26_spill] sm:$0xff]  ;;  %5691 = vst [vmem:[#allocation25_spill] sm:$0xff] %v4941_v55 }
 0x13e   :  { %v3231_v5 = vpack.c.bf16 %v5678_v30, %v5677_v47  ;;  %v3233_v0 = vpack.c.bf16 %v5680_v8, %v5679_v40  ;;  %v3309_v30 = vpack.c.bf16 %v1925_v31, %v1918_v10  ;;  %v4907_v40 = vpack.c.bf16 %v1813_v60, %v1806_v12  ;;  %v4924_v12 = vld [vmem:[#allocation6 + $0x148] sm:$0xff]  ;;  %v4939_v10 = vld [vmem:[#allocation6 + $0x1d0] sm:$0xff] }
 0x13f   :  { %v4901_v47 = vsub.f32 %v4829_v1, %v5681_v52  ;;  %3228 = vmatpush3.bf16.msra.mxu0 %v3227_v18  ;;  %v5683_v29 = vand.u32 4294901760, %v4842_v43  ;;  %v1820_v52 = vand.u32 4294901760, %v4879_v20  ;;  %v5686_v33 = vand.u32 4294901760, %v4840_v35  ;;  %v680_v60 = vld [vmem:[#allocation2 + $0x18] sm:$0xff]  ;;  %v5696_v32 = vld [vmem:[#allocation28_spill] sm:$0xff] }
 0x140   :  { %3268 = vmatpush3.bf16.msra.mxu1 %v5685_v51  ;;  %3230 = vmatprep.subr.bf16.mxu0 %v3229_v34  ;;  %v5688_v8 = vand.u32 4294901760, %v4861_v58  ;;  %v5690_v34 = vand.u32 4294901760, %v4863_v28  ;;  %v3313_v27 = vpack.c.bf16 %v1939_v24, %v1932_v7  ;;  %v4953_v49 = vand.u32 4294901760, %v680_v60 }
 0x141   :  { %5682 = vst [vmem:[#allocation24_spill] sm:$0xff] %v4901_v47  ;;  %v4913_v19 = vsub.f32 %v4842_v43, %v5683_v29  ;;  %v1826_v31 = vsub.f32 %v4840_v35, %v5686_v33  ;;  %v5687_v29 = vld [vmem:[#allocation27_spill] sm:$0xff]  ;;  %v5694_v7 = vand.u32 4294901760, %v4893_v41  ;;  %v5699_v18 = vand.u32 4294901760, %v4901_v47 }
 0x142   :  { %3270 = vmatprep.subr.bf16.mxu1 %v5687_v29  ;;  %v4930_v51 = vsub.f32 %v4861_v58, %v5688_v8  ;;  %v4935_v20 = vsub.f32 %v4863_v28, %v5690_v34  ;;  %v5692_v29 = vand.u32 4294901760, %v4858_v62  ;;  %v5693_v34 = vand.u32 4294901760, %v4868_v17 }
 0x143   :  { %5684 = vst [vmem:[#allocation18_spill] sm:$0xff] %v4913_v19  ;;  %3232 = vmatpush3.bf16.msra.mxu0 %v3231_v5  ;;  %v4959_v24 = vsub.f32 %v4893_v41, %v5694_v7  ;;  %v5695_v5 = vand.u32 4294901760, %v4895_v42  ;;  %v5698_v8 = vand.u32 4294901760, %v4905_v53  ;;  %v5700_v15 = vand.u32 4294901760, %v4915_v37 }
 0x144   :  { %5689 = vst [vmem:[#allocation19_spill] sm:$0xff] %v4930_v51  ;;  %v1945_v35 = vsub.f32 %v4858_v62, %v5692_v29  ;;  %v1952_v33 = vsub.f32 %v4868_v17, %v5693_v34  ;;  %3272 = vmatpush3.bf16.msra.mxu1 %v4391_v21  ;;  %3234 = vmatprep.subr.bf16.mxu0 %v3233_v0  ;;  %v5697_v0 = vand.u32 4294901760, %v4903_v13  ;;  %v1827_v17 = vand.u32 4294901760, %v1826_v31  ;;  %v5701_v62 = vld [vmem:[#allocation29_spill] sm:$0xff] }
 0x145   :  { %v4964_v29 = vsub.f32 %v4895_v42, %v5695_v5  ;;  %3274 = vmatprep.subr.bf16.mxu1 %v5696_v32  ;;  %v4979_v5 = vsub.f32 %v4905_v53, %v5698_v8  ;;  %v1833_v32 = vsub.f32 %v4901_v47, %v5699_v18  ;;  %v4987_v21 = vsub.f32 %v4915_v37, %v5700_v15  ;;  %v5704_v18 = vld [vmem:[#allocation30_spill] sm:$0xff] }
 0x146   :  { %v4974_v7 = vsub.f32 %v4903_v13, %v5697_v0  ;;  %v1946_v34 = vand.u32 4294901760, %v1945_v35  ;;  %v1953_v0 = vand.u32 4294901760, %v1952_v33  ;;  %v5702_v57 = vand.u32 4294901760, %v4913_v19 }
 0x147   :  { %3236 = vmatpush3.bf16.msra.mxu0 %v5701_v62  ;;  %v5703_v8 = vand.u32 4294901760, %v4924_v12  ;;  %v4999_v31 = vsub.f32 %v680_v60, %v4953_v49  ;;  %v5705_v33 = vand.u32 4294901760, %v4939_v10  ;;  %v5707_v60 = vand.u32 4294901760, %v4930_v51 }
 0x148   :  { %v1840_v54 = vsub.f32 %v4913_v19, %v5702_v57  ;;  %3276 = vmatpush3.bf16.msra.mxu1 %v4404_v63  ;;  %3238 = vmatprep.subr.bf16.mxu0 %v5704_v18  ;;  %v5706_v19 = vand.u32 4294901760, %v4941_v55  ;;  %v5708_v18 = vand.u32 4294901760, %v4935_v20  ;;  %v5709_v22 = vand.u32 4294901760, %v4636_v6 }
 0x149   :  { %v4996_v35 = vsub.f32 %v4924_v12, %v5703_v8  ;;  %v5008_v57 = vsub.f32 %v4939_v10, %v5705_v33  ;;  %3310 = vmatprep.subr.bf16.mxu1 %v3309_v30  ;;  %v1959_v63 = vsub.f32 %v4930_v51, %v5707_v60  ;;  %v3315_v33 = vpack.c.bf16 %v1827_v17, %v1820_v52  ;;  %v5712_v60 = vld [vmem:[#allocation31_spill] sm:$0xff]  ;;  %v5713_v17 = vld [vmem:[#allocation20_spill] sm:$0xff] }
 0x14a   :  { %v5013_v8 = vsub.f32 %v4941_v55, %v5706_v19  ;;  %v1966_v15 = vsub.f32 %v4935_v20, %v5708_v18  ;;  %v5710_v45 = vand.u32 4294901760, %v4638_v56  ;;  %v1834_v30 = vand.u32 4294901760, %v1833_v32  ;;  %v5711_v55 = vld [vmem:[#allocation34_spill] sm:$0xff] }
 0x14b   :  { %v5522_v14 = vand.u32 4294901760, %v4987_v21  ;;  %1662 = vmatmul.mubr.f32.vlgmr.msra.gmra.mrb[8].mxu1 %v5711_v55  ;;  %3240 = vmatpush3.bf16.msra.mxu0 %v5712_v60  ;;  %v3317_v51 = vpack.c.bf16 %v1953_v0, %v1946_v34  ;;  %v1841_v18 = vand.u32 4294901760, %v1840_v54  ;;  %v5714_v6 = vand.u32 4294901760, %v4959_v24  ;;  %v5716_v34 = vld [vmem:[#allocation32_spill] sm:$0xff] }
 0x14c   :  { %v5027_v19 = vpack.c.bf16 %v5710_v45, %v5709_v22  ;;  %1667 = vmatprep.mubr.f32.mxu1 %v5713_v17  ;;  %3312 = vmatpush3.bf16.msra.mxu1 %v4907_v40  ;;  %v5715_v45 = vand.u32 4294901760, %v4964_v29  ;;  %v1960_v32 = vand.u32 4294901760, %v1959_v63  ;;  %v1967_v0 = vand.u32 4294901760, %v1966_v15 }
 0x14d   :  { %v1847_v56 = vsub.f32 %v4959_v24, %v5714_v6  ;;  %3242 = vmatprep.subr.bf16.mxu0 %v5716_v34  ;;  %3314 = vmatprep.subr.bf16.mxu1 %v3313_v27  ;;  %v5717_v60 = vand.u32 4294901760, %v4974_v7  ;;  %v5718_v47 = vand.u32 4294901760, %v4979_v5  ;;  %v5719_v62 = vand.u32 4294901760, %v4661_v2  ;;  %v5723_v34 = vld [vmem:[#allocation12_spill] sm:$0xff] }
 0x14e   :  { %v1854_v22 = vsub.f32 %v4964_v29, %v5715_v45  ;;  %v5720_v45 = vand.u32 4294901760, %v4663_v48  ;;  %v5721_v54 = vand.u32 4294901760, %v4701_v23  ;;  %v5722_v27 = vand.u32 4294901760, %v4703_v46 }
 0x14f   :  { %v1973_v40 = vsub.f32 %v4974_v7, %v5717_v60  ;;  %v1980_v6 = vsub.f32 %v4979_v5, %v5718_v47  ;;  %v1861_v15 = vsub.f32 %v4987_v21, %v5522_v14  ;;  %1669 = vmatmul.mubr.f32.gmra.mrb[10].mxu1 %v5723_v34  ;;  %v5724_v60 = vld [vmem:[#allocation33_spill] sm:$0xff]  ;;  %v3319_v47 = vpack.c.bf16 %v1841_v18, %v1834_v30 }
 0x150   :  { %v5055_v52 = vpack.c.bf16 %v5720_v45, %v5719_v62  ;;  %v5061_v63 = vpack.c.bf16 %v5722_v27, %v5721_v54  ;;  %3244 = vmatpush3.bf16.msra.mxu0 %v5724_v60  ;;  %v5725_v2 = vand.u32 4294901760, %v4996_v35  ;;  %v5726_v62 = vand.u32 4294901760, %v4999_v31  ;;  %3316 = vmatpush3.bf16.msra.mxu1 %v3315_v33 }
 0x151   :  { %3278 = vmatprep.subr.bf16.mxu0 %v5027_v19  ;;  %v1848_v46 = vand.u32 4294901760, %v1847_v56  ;;  %v1855_v54 = vand.u32 4294901760, %v1854_v22  ;;  %v5727_v45 = vand.u32 4294901760, %v5008_v57  ;;  %v5728_v60 = vand.u32 4294901760, %v5013_v8  ;;  %3318 = vmatprep.subr.bf16.mxu1 %v3317_v51 }
 0x152   :  { %v1868_v48 = vsub.f32 %v4996_v35, %v5725_v2  ;;  %v1773_v23 = vsub.f32 %v4999_v31, %v5726_v62  ;;  %v3321_v18 = vpack.c.bf16 %v1967_v0, %v1960_v32  ;;  %v1974_v2 = vand.u32 4294901760, %v1973_v40  ;;  %2026 = vmatprep.mubr.f32.mxu1 %v4953_v49 }
 0x153   :  { %v1987_v27 = vsub.f32 %v5008_v57, %v5727_v45  ;;  %v1994_v30 = vsub.f32 %v5013_v8, %v5728_v60  ;;  %v1981_v14 = vand.u32 4294901760, %v1980_v6  ;;  %1551 = vmatmul.mubr.f32.vlgmr.msra.gmra.mrb[8].mxu0 %v5711_v55  ;;  %v5729_v33 = vand.u32 4294901760, %v4732_v39 }
 0x154   :  { %v5730_v56 = vand.u32 4294901760, %v4771_v38  ;;  %v1862_v62 = vand.u32 4294901760, %v1861_v15  ;;  %1556 = vmatprep.mubr.f32.mxu0 %v5713_v17  ;;  %3280 = vmatpush3.bf16.msra.mxu0 %v5055_v52  ;;  %v1869_v45 = vand.u32 4294901760, %v1868_v48  ;;  %v5731_v51 = vand.u32 4294901760, %v4572_v3 }
 0x155   :  { %v5732_v0 = vand.u32 4294901760, %v4577_v11  ;;  %v1774_v40 = vand.u32 4294901760, %v1773_v23  ;;  %3320 = vmatpush3.bf16.msra.mxu1 %v3319_v47  ;;  %3282 = vmatprep.subr.bf16.mxu0 %v5061_v63  ;;  %v3323_v39 = vpack.c.bf16 %v1855_v54, %v1848_v46  ;;  %v5733_v38 = vand.u32 4294901760, %v4791_v26 }
 0x156   :  { %v5087_v22 = vpack.c.bf16 %v5730_v56, %v5729_v33  ;;  %v1875_v32 = vsub.f32 %v4572_v3, %v5731_v51  ;;  %v5734_v17 = vand.u32 4294901760, %v4804_v36  ;;  %v1988_v15 = vand.u32 4294901760, %v1987_v27  ;;  %3322 = vmatprep.subr.bf16.mxu1 %v3321_v18 }
 0x157   :  { %v1882_v55 = vsub.f32 %v4577_v11, %v5732_v0  ;;  %v1995_v48 = vand.u32 4294901760, %v1994_v30  ;;  %v3325_v60 = vpack.c.bf16 %v1981_v14, %v1974_v2  ;;  %v5735_v33 = vand.u32 4294901760, %v4597_v4  ;;  %1558 = vmatmul.mubr.f32.gmra.mrb[10].mxu0 %v5723_v34 }
 0x158   :  { %v5102_v6 = vpack.c.bf16 %v5734_v17, %v5733_v38  ;;  %v5736_v23 = vand.u32 4294901760, %v4602_v50  ;;  %v5737_v26 = vand.u32 4294901760, %v4829_v1  ;;  %v5738_v36 = vand.u32 4294901760, %v4842_v43  ;;  %3284 = vmatpush3.bf16.msra.mxu0 %v5087_v22  ;;  %1775 = vmatprep.mubr.f32.mxu0 %v1774_v40 }
 0x159   :  { %v2001_v56 = vsub.f32 %v4597_v4, %v5735_v33  ;;  %v3327_v54 = vpack.c.bf16 %v1869_v45, %v1862_v62  ;;  %v5739_v14 = vand.u32 4294901760, %v4861_v58  ;;  %v5740_v27 = vand.u32 4294901760, %v4863_v28  ;;  %3324 = vmatpush3.bf16.msra.mxu1 %v3323_v39 }
 0x15a   :  { %v2008_v47 = vsub.f32 %v4602_v50, %v5736_v23  ;;  %v5115_v46 = vpack.c.bf16 %v5738_v36, %v5737_v26  ;;  %v1876_v18 = vand.u32 4294901760, %v1875_v32  ;;  %v1883_v2 = vand.u32 4294901760, %v1882_v55  ;;  %3286 = vmatprep.subr.bf16.mxu0 %v5102_v6  ;;  %3326 = vmatprep.subr.bf16.mxu1 %v3325_v60  ;;  %v684_v26 = vld [vmem:[#allocation2 + $0x38] sm:$0xff] }
 0x15b   :  { %v5122_v30 = vpack.c.bf16 %v5740_v27, %v5739_v14  ;;  %v3329_v1 = vpack.c.bf16 %v1995_v48, %v1988_v15  ;;  %v5741_v43 = vand.u32 4294901760, %v4617_v44  ;;  %v5742_v51 = vand.u32 4294901760, %v4626_v16  ;;  %v679_v14 = vld [vmem:[#allocation2 + $0x10] sm:$0xff] }
 0x15c   :  { %v2002_v58 = vand.u32 4294901760, %v2001_v56  ;;  %v2009_v28 = vand.u32 4294901760, %v2008_v47  ;;  %v5743_v45 = vand.u32 4294901760, %v4645_v61  ;;  %v5744_v0 = vand.u32 4294901760, %v4650_v59  ;;  %3288 = vmatpush3.bf16.msra.mxu0 %v5115_v46 }
 0x15d   :  { %v1889_v34 = vsub.f32 %v4617_v44, %v5741_v43  ;;  %v1896_v62 = vsub.f32 %v4626_v16, %v5742_v51  ;;  %v5745_v40 = vand.u32 4294901760, %v4893_v41  ;;  %v5746_v39 = vand.u32 4294901760, %v4895_v42  ;;  %3328 = vmatpush3.bf16.msra.mxu1 %v3327_v54  ;;  %3290 = vmatprep.subr.bf16.mxu0 %v5122_v30  ;;  %v5754_v43 = vld [vmem:[#allocation25_spill] sm:$0xff] }
 0x15e   :  { %v2015_v32 = vsub.f32 %v4645_v61, %v5743_v45  ;;  %v2022_v55 = vsub.f32 %v4650_v59, %v5744_v0  ;;  %v3331_v17 = vpack.c.bf16 %v1883_v2, %v1876_v18  ;;  %v5747_v15 = vand.u32 4294901760, %v4903_v13  ;;  %3330 = vmatprep.subr.bf16.mxu1 %v3329_v1  ;;  %v683_v1 = vld [vmem:[#allocation2 + $0x30] sm:$0xff] }
 0x15f   :  { %v5142_v38 = vpack.c.bf16 %v5746_v39, %v5745_v40  ;;  %v5748_v48 = vand.u32 4294901760, %v4905_v53  ;;  %v1890_v33 = vand.u32 4294901760, %v1889_v34  ;;  %v1897_v56 = vand.u32 4294901760, %v1896_v62 }
 0x160   :  { %v5749_v23 = vand.u32 4294901760, %v4669_v25  ;;  %v5750_v42 = vand.u32 4294901760, %v4674_v9  ;;  %v3333_v13 = vpack.c.bf16 %v2009_v28, %v2002_v58  ;;  %v2016_v36 = vand.u32 4294901760, %v2015_v32 }
 0x161   :  { %v5148_v60 = vpack.c.bf16 %v5748_v48, %v5747_v15  ;;  %v2023_v53 = vand.u32 4294901760, %v2022_v55  ;;  %3292 = vmatpush3.bf16.msra.mxu0 %v5142_v38  ;;  %v5751_v54 = vand.u32 4294901760, %v4915_v37  ;;  %v5752_v27 = vand.u32 4294901760, %v4924_v12  ;;  %3332 = vmatpush3.bf16.msra.mxu1 %v3331_v17  ;;  %v5758_v55 = vld [vmem:[#allocation21_spill] sm:$0xff]  ;;  %v5760_v48 = vld [vmem:[#allocation14_spill] sm:$0xff] }
 0x162   :  { %v1903_v41 = vsub.f32 %v4669_v25, %v5749_v23  ;;  %v1910_v47 = vsub.f32 %v4674_v9, %v5750_v42  ;;  %v5753_v2 = vand.u32 4294901760, %v4939_v10  ;;  %v5755_v34 = vand.u32 4294901760, %v5754_v43  ;;  %3334 = vmatprep.subr.bf16.mxu1 %v3333_v13  ;;  %v5756_v10 = vld [vmem:[#allocation13_spill] sm:$0xff] }
 0x163   :  { %v5162_v18 = vpack.c.bf16 %v5752_v27, %v5751_v54  ;;  %v5170_v62 = vand.u32 4294901760, %v684_v26  ;;  %3294 = vmatprep.subr.bf16.mxu0 %v5148_v60  ;;  %v3335_v58 = vpack.c.bf16 %v1897_v56, %v1890_v33  ;;  %v5173_v37 = vand.u32 4294901760, %v679_v14  ;;  %v5762_v56 = vld [vmem:[#allocation15_spill] sm:$0xff] }
 0x164   :  { %v5168_v51 = vpack.c.bf16 %v5755_v34, %v5753_v2  ;;  %v1904_v28 = vand.u32 4294901760, %v1903_v41  ;;  %v1911_v45 = vand.u32 4294901760, %v1910_v47  ;;  %v3337_v12 = vpack.c.bf16 %v2023_v53, %v2016_v36  ;;  %v5766_v36 = vld [vmem:[#allocation17_spill] sm:$0xff]  ;;  %v5768_v2 = vld [vmem:[#allocation35_spill] sm:$0xff]  ;;  %v5770_v34 = vld [vmem:[#allocation36_spill] sm:$0xff] }
 0x165   :  { %v5175_v32 = vand.u32 4294901760, %v683_v1  ;;  %3296 = vmatpush3.bf16.msra.mxu0 %v5162_v18  ;;  %v5757_v0 = vand.u32 4294901760, %v5756_v10  ;;  %v5759_v40 = vand.u32 4294901760, %v5758_v55  ;;  %v5185_v17 = vsub.f32 %v684_v26, %v5170_v62  ;;  %3336 = vmatpush3.bf16.msra.mxu1 %v3335_v58  ;;  %v5764_v26 = vld [vmem:[#allocation16_spill] sm:$0xff]  ;;  %v5774_v10 = vld [vmem:[#allocation38_spill] sm:$0xff] }
 0x166   :  { %3298 = vmatprep.subr.bf16.mxu0 %v5168_v51  ;;  %v3339_v15 = vpack.c.bf16 %v1911_v45, %v1904_v28  ;;  %v5761_v33 = vand.u32 4294901760, %v5760_v48  ;;  %v5763_v23 = vand.u32 4294901760, %v5762_v56  ;;  %v5195_v42 = vsub.f32 %v679_v14, %v5173_v37  ;;  %3338 = vmatprep.subr.bf16.mxu1 %v3337_v12  ;;  %v5772_v45 = vld [vmem:[#allocation37_spill] sm:$0xff]  ;;  %v5776_v48 = vld [vmem:[#allocation43_spill] sm:$0xff] }
 0x167   :  { %v5182_v39 = vpack.c.bf16 %v5759_v40, %v5757_v0  ;;  %v5198_v47 = vsub.f32 %v683_v1, %v5175_v32  ;;  %v5765_v13 = vand.u32 4294901760, %v5764_v26  ;;  %v5767_v53 = vand.u32 4294901760, %v5766_v36  ;;  %v5778_v26 = vld [vmem:[#allocation46_spill] sm:$0xff] }
 0x168   :  { %v5192_v41 = vpack.c.bf16 %v5763_v23, %v5761_v33  ;;  %v5524_v27 = vand.u32 4294901760, %v5185_v17  ;;  %v1778_v14 = vand.u32 4294901760, %v5195_v42  ;;  %v5769_v43 = vand.u32 4294901760, %v5768_v2  ;;  %v5777_v33 = vld [vmem:[#allocation44_spill] sm:$0xff] }
 0x169   :  { %3300 = vmatpush3.bf16.msra.mxu0 %v5182_v39  ;;  %v5205_v54 = vpack.c.bf16 %v5767_v53, %v5765_v13  ;;  %3340 = vmatpush3.bf16.msra.mxu1 %v3339_v15  ;;  %v5771_v1 = vand.u32 4294901760, %v5770_v34  ;;  %v5523_v28 = vand.u32 4294901760, %v5198_v47  ;;  %v5773_v12 = vand.u32 4294901760, %v5772_v45  ;;  %v5779_v13 = vld [vmem:[#allocation47_spill] sm:$0xff]  ;;  %v5781_v34 = vld [vmem:[#allocation48_spill] sm:$0xff] }
 0x16a   :  { %3302 = vmatprep.subr.bf16.mxu0 %v5192_v41  ;;  %3374 = vmatprep.subr.bf16.mxu1 %v5027_v19  ;;  %v5775_v0 = vand.u32 4294901760, %v5774_v10  ;;  %v1788_v40 = vsub.f32 %v5185_v17, %v5524_v27  ;;  %v1779_v15 = vsub.f32 %v5195_v42, %v1778_v14  ;;  %v3341_v56 = vpack.c.bf16 %v5777_v33, %v5776_v48  ;;  %v5783_v10 = vld [vmem:[#allocation50_spill] sm:$0xff]  ;;  %v5786_v27 = vld [vmem:[#allocation51_spill] sm:$0xff] }
 0x16b   :  { %v5215_v58 = vpack.c.bf16 %v5771_v1, %v5769_v43  ;;  %v1794_v23 = vsub.f32 %v5198_v47, %v5523_v28  ;;  %v3343_v36 = vpack.c.bf16 %v5779_v13, %v5778_v26  ;;  %v5780_v2 = vand.u32 4294901760, %v4999_v31  ;;  %v5782_v1 = vld [vmem:[#allocation49_spill] sm:$0xff] }
 0x16c   :  { %2028 = vmatmul.mubr.f32.vlgmr.msra.gmra.mrb[12].mxu1 %v5173_v37  ;;  %v5224_v55 = vpack.c.bf16 %v5775_v0, %v5773_v12  ;;  %v1789_v53 = vand.u32 4294901760, %v1788_v40  ;;  %v1780_v43 = vand.u32 4294901760, %v1779_v15  ;;  %v3345_v45 = vpack.c.bf16 %v5782_v1, %v5781_v34  ;;  %v5784_v0 = vld [vmem:[#allocation22_spill] sm:$0xff]  ;;  %v5785_v40 = vld [vmem:[#allocation23_spill] sm:$0xff]  ;;  %v5787_v15 = vld [vmem:[#allocation24_spill] sm:$0xff] }
 0x16d   :  { %3304 = vmatpush3.bf16.msra.mxu0 %v5205_v54  ;;  %3376 = vmatpush3.bf16.msra.mxu1 %v5055_v52  ;;  %v1795_v12 = vand.u32 4294901760, %v1794_v23  ;;  %v3347_v28 = vpack.c.bf16 %v5784_v0, %v5783_v10 }
 0x16e   :  { %2033 = vmatprep.mubr.f32.mxu1 %v5170_v62  ;;  %3306 = vmatprep.subr.bf16.mxu0 %v5215_v58 }
 0x16f   :  { %3378 = vmatprep.subr.bf16.mxu1 %v5061_v63 }
 0x170   :  { %2035 = vmatmul.mubr.f32.gmra.mrb[14].mxu1 %v5175_v32 }
 0x171   :  { %3308 = vmatpush3.bf16.msra.mxu0 %v5224_v55  ;;  %3380 = vmatpush3.bf16.msra.mxu1 %v5087_v22 }
 0x172   :  { %2286 = vmatprep.mubr.f32.mxu1 %v5780_v2  ;;  %3342 = vmatprep.subr.bf16.mxu0 %v3341_v56  ;;  %v3349_v2 = vpack.c.bf16 %v5786_v27, %v5785_v40  ;;  %v5788_v56 = vld [vmem:[#allocation18_spill] sm:$0xff] }
 0x173   :  { %3382 = vmatprep.subr.bf16.mxu1 %v5102_v6  ;;  %v3351_v23 = vpack.c.bf16 %v5788_v56, %v5787_v15 }
 0x174   :  { %1781 = vmatmul.mubr.f32.vlgmr.msra.gmra.mrb[12].mxu0 %v1780_v43  ;;  %v3355_v43 = vpack.c.bf16 %v4964_v29, %v4959_v24 }
 0x175   :  { %3344 = vmatpush3.bf16.msra.mxu0 %v3343_v36  ;;  %1790 = vmatprep.mubr.f32.mxu0 %v1789_v53  ;;  %v5789_v36 = vld [vmem:[#allocation19_spill] sm:$0xff] }
 0x176   :  { %3384 = vmatpush3.bf16.msra.mxu1 %v5115_v46  ;;  %3346 = vmatprep.subr.bf16.mxu0 %v3345_v45  ;;  %v3353_v53 = vpack.c.bf16 %v4935_v20, %v5789_v36  ;;  %v3361_v45 = vpack.c.bf16 %v5013_v8, %v5008_v57 }
 0x177   :  { %3386 = vmatprep.subr.bf16.mxu1 %v5122_v30 }
 0x178   :  { %1796 = vmatmul.mubr.f32.gmra.mrb[14].mxu0 %v1795_v12  ;;  %v3363_v12 = vpack.c.bf16 %v4577_v11, %v4572_v3  ;;  %v3369_v11 = vpack.c.bf16 %v4650_v59, %v4645_v61  ;;  %v5792_v3 = vand.u32 4294901760, %v5777_v33  ;;  %v5794_v61 = vand.u32 4294901760, %v5778_v26 }
 0x179   :  { %3348 = vmatpush3.bf16.msra.mxu0 %v3347_v28  ;;  %2170 = vmatprep.mubr.f32.mxu0 %v4999_v31  ;;  %v3357_v31 = vpack.c.bf16 %v4979_v5, %v4974_v7  ;;  %v3359_v28 = vpack.c.bf16 %v4996_v35, %v4987_v21  ;;  %v5800_v33 = vand.u32 4294901760, %v5785_v40  ;;  %v5801_v26 = vand.u32 4294901760, %v5786_v27 }
 0x17a   :  { %3388 = vmatpush3.bf16.msra.mxu1 %v5142_v38  ;;  %3350 = vmatprep.subr.bf16.mxu0 %v3349_v2  ;;  %v3365_v2 = vpack.c.bf16 %v4602_v50, %v4597_v4  ;;  %v3371_v50 = vpack.c.bf16 %v4674_v9, %v4669_v25  ;;  %v5790_v4 = vand.u32 4294901760, %v5185_v17  ;;  %v5795_v25 = vand.u32 4294901760, %v5779_v13 }
 0x17b   :  { %3390 = vmatprep.subr.bf16.mxu1 %v5148_v60  ;;  %v3413_v13 = vpack.c.bf16 %v5801_v26, %v5800_v33  ;;  %v5805_v27 = vand.u32 4294901760, %v4935_v20  ;;  %v5810_v20 = vand.u32 4294901760, %v4987_v21  ;;  %v5814_v21 = vld [vmem:[#allocation39_spill] sm:$0xff] }
 0x17c   :  { %v3407_v9 = vpack.c.bf16 %v5795_v25, %v5794_v61 }
 0x17d   :  { %3352 = vmatpush3.bf16.msra.mxu0 %v3351_v23  ;;  %v3367_v23 = vpack.c.bf16 %v4626_v16, %v4617_v44  ;;  %v5791_v16 = vand.u32 4294901760, %v5776_v48  ;;  %v5793_v44 = vand.u32 4294901760, %v5198_v47  ;;  %v5799_v48 = vand.u32 4294901760, %v5784_v0 }
 0x17e   :  { %3392 = vmatpush3.bf16.msra.mxu1 %v5162_v18  ;;  %3354 = vmatprep.subr.bf16.mxu0 %v3353_v53 }
 0x17f   :  { %3394 = vmatprep.subr.bf16.mxu1 %v5168_v51  ;;  %v3405_v59 = vpack.c.bf16 %v5792_v3, %v5791_v16 }
 0x181   :  { %3356 = vmatpush3.bf16.msra.mxu0 %v3355_v43 }
 0x182   :  { %3396 = vmatpush3.bf16.msra.mxu1 %v5182_v39  ;;  %3358 = vmatprep.subr.bf16.mxu0 %v3357_v31 }
 0x183   :  { %3398 = vmatprep.subr.bf16.mxu1 %v5192_v41 }
 0x185   :  { %3360 = vmatpush3.bf16.msra.mxu0 %v3359_v28 }
 0x186   :  { %3400 = vmatpush3.bf16.msra.mxu1 %v5205_v54  ;;  %3362 = vmatprep.subr.bf16.mxu0 %v3361_v45 }
 0x187   :  { %3402 = vmatprep.subr.bf16.mxu1 %v5215_v58 }
 0x189   :  { %3364 = vmatpush3.bf16.msra.mxu0 %v3363_v12 }
 0x18a   :  { %3404 = vmatpush3.bf16.msra.mxu1 %v5224_v55  ;;  %3366 = vmatprep.subr.bf16.mxu0 %v3365_v2 }
 0x18b   :  { %3438 = vmatprep.subr.bf16.mxu1 %v5027_v19  ;;  %v5796_v19 = vand.u32 4294901760, %v5781_v34 }
 0x18d   :  { %2290 = vmatmul.mubr.f32.vlgmr.msra.gmra.mrb[16].mxu1 %v1778_v14  ;;  %3368 = vmatpush3.bf16.msra.mxu0 %v3367_v23  ;;  %v5798_v14 = vand.u32 4294901760, %v5783_v10 }
 0x18e   :  { %2297 = vmatprep.mubr.f32.mxu1 %v5790_v4  ;;  %3440 = vmatpush3.bf16.msra.mxu1 %v5055_v52  ;;  %v5797_v52 = vand.u32 4294901760, %v5782_v1  ;;  %v5808_v1 = vand.u32 4294901760, %v4974_v7  ;;  %v5815_v7 = vld [vmem:[#allocation40_spill] sm:$0xff] }
 0x18f   :  { %3370 = vmatprep.subr.bf16.mxu0 %v3369_v11  ;;  %3442 = vmatprep.subr.bf16.mxu1 %v5061_v63 }
 0x190   :  { %v3409_v63 = vpack.c.bf16 %v5797_v52, %v5796_v19 }
 0x191   :  { %2301 = vmatmul.mubr.f32.gmra.mrb[18].mxu1 %v5793_v44  ;;  %3372 = vmatpush3.bf16.msra.mxu0 %v3371_v50 }
 0x192   :  { %3444 = vmatpush3.bf16.msra.mxu1 %v5087_v22  ;;  %2578 = vmatprep.mubr.f32.mxu1 %v4953_v49  ;;  %v3411_v22 = vpack.c.bf16 %v5799_v48, %v5798_v14 }
 0x193   :  { %3406 = vmatprep.subr.bf16.mxu0 %v3405_v59  ;;  %3446 = vmatprep.subr.bf16.mxu1 %v5102_v6  ;;  %v5802_v6 = vand.u32 4294901760, %v5787_v15 }
 0x194   :  { %2173 = vmatmul.mubr.f32.vlgmr.msra.gmra.mrb[16].mxu0 %v5195_v42 }
 0x195   :  { %2179 = vmatprep.mubr.f32.mxu0 %v5185_v17  ;;  %3408 = vmatpush3.bf16.msra.mxu0 %v3407_v9  ;;  %v5803_v17 = vand.u32 4294901760, %v5788_v56 }
 0x196   :  { %3448 = vmatpush3.bf16.msra.mxu1 %v5115_v46  ;;  %3410 = vmatprep.subr.bf16.mxu0 %v3409_v63  ;;  %v5804_v46 = vand.u32 4294901760, %v5789_v36 }
 0x197   :  { %3450 = vmatprep.subr.bf16.mxu1 %v5122_v30  ;;  %v3415_v42 = vpack.c.bf16 %v5803_v17, %v5802_v6  ;;  %v5806_v30 = vand.u32 4294901760, %v4959_v24  ;;  %v5812_v24 = vand.u32 4294901760, %v5008_v57  ;;  %v5818_v57 = vld [vmem:[#allocation45_spill] sm:$0xff] }
 0x198   :  { %2182 = vmatmul.mubr.f32.gmra.mrb[18].mxu0 %v5198_v47  ;;  %v3417_v34 = vpack.c.bf16 %v5805_v27, %v5804_v46 }
 0x199   :  { %3412 = vmatpush3.bf16.msra.mxu0 %v3411_v22  ;;  %2467 = vmatprep.mubr.f32.mxu0 %v4953_v49  ;;  %v5807_v49 = vand.u32 4294901760, %v4964_v29  ;;  %v5813_v29 = vand.u32 4294901760, %v5013_v8 }
 0x19a   :  { %3452 = vmatpush3.bf16.msra.mxu1 %v5142_v38  ;;  %3414 = vmatprep.subr.bf16.mxu0 %v3413_v13  ;;  %v5809_v38 = vand.u32 4294901760, %v4979_v5  ;;  %v5816_v5 = vld [vmem:[#allocation41_spill] sm:$0xff] }
 0x19b   :  { %3454 = vmatprep.subr.bf16.mxu1 %v5148_v60  ;;  %v3419_v47 = vpack.c.bf16 %v5807_v49, %v5806_v30  ;;  %v5811_v60 = vand.u32 4294901760, %v4996_v35  ;;  %v5817_v35 = vld [vmem:[#allocation42_spill] sm:$0xff] }
 0x19c   :  { %v3421_v10 = vpack.c.bf16 %v5809_v38, %v5808_v1 }
 0x19d   :  { %3416 = vmatpush3.bf16.msra.mxu0 %v3415_v42  ;;  %v3423_v0 = vpack.c.bf16 %v5811_v60, %v5810_v20 }
 0x19e   :  { %3456 = vmatpush3.bf16.msra.mxu1 %v5162_v18  ;;  %3418 = vmatprep.subr.bf16.mxu0 %v3417_v34  ;;  %v3425_v18 = vpack.c.bf16 %v5813_v29, %v5812_v24 }
 0x19f   :  { %3458 = vmatprep.subr.bf16.mxu1 %v5168_v51 }
 0x1a1   :  { %3420 = vmatpush3.bf16.msra.mxu0 %v3419_v47 }
 0x1a2   :  { %3460 = vmatpush3.bf16.msra.mxu1 %v5182_v39  ;;  %3422 = vmatprep.subr.bf16.mxu0 %v3421_v10 }
 0x1a3   :  { %3462 = vmatprep.subr.bf16.mxu1 %v5192_v41 }
 0x1a5   :  { %3424 = vmatpush3.bf16.msra.mxu0 %v3423_v0 }
 0x1a6   :  { %3464 = vmatpush3.bf16.msra.mxu1 %v5205_v54  ;;  %3426 = vmatprep.subr.bf16.mxu0 %v3425_v18  ;;  %v2628_v54 = vld [vmem:[%s5391_s2] ss:$0 sm:$0xff]  ;;  %s3584_s2 = smov [#allocation8]  }
 0x1a7   :  { %3466 = vmatprep.subr.bf16.mxu1 %v5215_v58  ;;  %s2599_s14 = sshll.u32 %s3584_s2, 4  ;;  %s2600_s14 = int_to_ptr.vmem [resolvable:$true] %s2599_s14 }
 0x1a8   :  { %s3543_s15 = scalar_lea.vmem %s2600_s14, 256  ;;  %p3548_p3 = scmp.lt.s32.totalorder %s2600_s14, %s2600_s14 }
 0x1a9   :  { %3428 = vmatpush3.bf16.msra.mxu0 %v5814_v21  ;;  %p3544_p2 = scmp.ne.s32.totalorder %s2600_s14, %s3543_s15  ;;  %p3549_p4 = scmp.lt.s32.totalorder %s3543_s15, %s3543_s15 }
 0x1aa   :  { %3468 = vmatpush3.bf16.msra.mxu1 %v5224_v55  ;;  %3430 = vmatprep.subr.bf16.mxu0 %v5815_v7 }
 0x1ab   :  { %p3550_p5 = por %p3549_p4, %p3548_p3 }
 0x1ad   :  { %2580 = vmatmul.mubr.f32.vlgmr.msra.gmra.mrb[20].mxu1 %v5173_v37  ;;  %3432 = vmatpush3.bf16.msra.mxu0 %v5816_v5  ;;  %p3551_p6 = pnand %p3550_p5, %p3544_p2 }
 0x1ae   :  { %2585 = vmatprep.mubr.f32.mxu1 %v5170_v62  ;;  %3434 = vmatprep.subr.bf16.mxu0 %v5817_v35 }
 0x1b1   :  { %2587 = vmatmul.mubr.f32.gmra.mrb[22].mxu1 %v5175_v32  ;;  %3436 = vmatpush3.bf16.msra.mxu0 %v5818_v57 }
 0x1b4   :  { %2469 = vmatmul.mubr.f32.vlgmr.msra.gmra.mrb[20].mxu0 %v5173_v37 }
 0x1b5   :  { %2474 = vmatprep.mubr.f32.mxu0 %v5170_v62 }
 0x1b8   :  { %2476 = vmatmul.mubr.f32.gmra.mrb[22].mxu0 %v5175_v32 }
 0x1da   :  { %v2699_v8 = vpop.f32.mrb[0].mxu1 }
 0x1db   :  { %v2700_v51 = vpop.f32.mrb[1].mxu1 }
 0x1dc   :  { %v2701_v39 = vadd.f32 %v2700_v51, %v2699_v8 }
 0x1e2   :  { %v2661_v41 = vpop.f32.mrb[0].mxu0 }
 0x1e3   :  { %v2662_v58 = vpop.f32.mrb[1].mxu0 }
 0x1e4   :  { %v2663_v55 = vadd.f32 %v2662_v58, %v2661_v41 }
 0x1e6   :  { %v865_v40 = vadd.f32 %v2663_v55, %v2628_v54 }
 0x1e8   :  { %v2702_v15 = vpop.f32.mrb[2].mxu1  ;;  %v1112_v36 = vadd.f32 %v2701_v39, %v865_v40 }
 0x1e9   :  { %v2703_v56 = vpop.f32.mrb[3].mxu1 }
 0x1ea   :  { %v2704_v53 = vadd.f32 %v2703_v56, %v2702_v15 }
 0x1f0   :  { %v2664_v37 = vpop.f32.mrb[2].mxu0 }
 0x1f1   :  { %v2665_v43 = vpop.f32.mrb[3].mxu0 }
 0x1f2   :  { %v2666_v62 = vadd.f32 %v2665_v43, %v2664_v37 }
 0x1f4   :  { %v880_v31 = vadd.f32 %v2666_v62, %v2628_v54 }
 0x1f6   :  { %v1119_v32 = vadd.f32 %v2704_v53, %v880_v31 }
 0x1fc   :  { %v2775_v28 = vpop.f32.mrb[4].mxu1 }
 0x1fd   :  { %v2776_v45 = vpop.f32.mrb[5].mxu1 }
 0x1fe   :  { %v2777_v12 = vadd.f32 %v2776_v45, %v2775_v28 }
 0x201   :  { %v2778_v2 = vpop.f32.mrb[6].mxu1 }
 0x202   :  { %v2779_v23 = vpop.f32.mrb[7].mxu1 }
 0x203   :  { %v2780_v11 = vadd.f32 %v2779_v23, %v2778_v2 }
 0x205   :  { %v2737_v50 = vpop.f32.mrb[4].mxu0 }
 0x206   :  { %v2738_v4 = vpop.f32.mrb[5].mxu0 }
 0x207   :  { %v2739_v16 = vadd.f32 %v2738_v4, %v2737_v50 }
 0x209   :  { %v1257_v3 = vadd.f32 %v2739_v16, %v1112_v36  ;;  %v2740_v59 = vpop.f32.mrb[6].mxu0 }
 0x20a   :  { %v2741_v44 = vpop.f32.mrb[7].mxu0 }
 0x20b   :  { %v2742_v61 = vadd.f32 %v2741_v44, %v2740_v59  ;;  %v1374_v25 = vadd.f32 %v2777_v12, %v1257_v3 }
 0x20d   :  { %v1266_v9 = vadd.f32 %v2742_v61, %v1119_v32 }
 0x20f   :  { %v1385_v19 = vadd.f32 %v2780_v11, %v1266_v9 }
 0x21e   :  { %v2851_v52 = vpop.f32.mrb[8].mxu1 }
 0x21f   :  { %v2852_v63 = vpop.f32.mrb[9].mxu1 }
 0x220   :  { %v2853_v14 = vadd.f32 %v2852_v63, %v2851_v52 }
 0x222   :  { %v2854_v48 = vpop.f32.mrb[10].mxu1 }
 0x223   :  { %v2855_v22 = vpop.f32.mrb[11].mxu1 }
 0x224   :  { %v2856_v33 = vadd.f32 %v2855_v22, %v2854_v48 }
 0x226   :  { %v2813_v26 = vpop.f32.mrb[8].mxu0 }
 0x227   :  { %v2814_v13 = vpop.f32.mrb[9].mxu0 }
 0x228   :  { %v2815_v6 = vadd.f32 %v2814_v13, %v2813_v26 }
 0x22a   :  { %v1553_v17 = vadd.f32 %v2815_v6, %v1374_v25  ;;  %v2816_v42 = vpop.f32.mrb[10].mxu0 }
 0x22b   :  { %v2817_v46 = vpop.f32.mrb[11].mxu0 }
 0x22c   :  { %v2818_v27 = vadd.f32 %v2817_v46, %v2816_v42  ;;  %v1664_v34 = vadd.f32 %v2853_v14, %v1553_v17 }
 0x22e   :  { %v1560_v30 = vadd.f32 %v2818_v27, %v1385_v19 }
 0x230   :  { %v1671_v49 = vadd.f32 %v2856_v33, %v1560_v30 }
 0x23f   :  { %v2927_v47 = vpop.f32.mrb[12].mxu1 }
 0x240   :  { %v2928_v1 = vpop.f32.mrb[13].mxu1 }
 0x241   :  { %v2929_v38 = vadd.f32 %v2928_v1, %v2927_v47 }
 0x243   :  { %v2930_v10 = vpop.f32.mrb[14].mxu1 }
 0x244   :  { %v2931_v20 = vpop.f32.mrb[15].mxu1 }
 0x245   :  { %v2932_v60 = vadd.f32 %v2931_v20, %v2930_v10 }
 0x247   :  { %v2889_v0 = vpop.f32.mrb[12].mxu0 }
 0x248   :  { %v2890_v24 = vpop.f32.mrb[13].mxu0 }
 0x249   :  { %v2891_v29 = vadd.f32 %v2890_v24, %v2889_v0 }
 0x24b   :  { %v1783_v18 = vadd.f32 %v2891_v29, %v1664_v34  ;;  %v2892_v21 = vpop.f32.mrb[14].mxu0 }
 0x24c   :  { %v2893_v7 = vpop.f32.mrb[15].mxu0 }
 0x24d   :  { %v2894_v5 = vadd.f32 %v2893_v7, %v2892_v21  ;;  %v2030_v35 = vadd.f32 %v2929_v38, %v1783_v18 }
 0x24f   :  { %v1798_v57 = vadd.f32 %v2894_v5, %v1671_v49 }
 0x251   :  { %v2037_v8 = vadd.f32 %v2932_v60, %v1798_v57 }
 0x260   :  { %v3003_v51 = vpop.f32.mrb[16].mxu1 }
 0x261   :  { %v3004_v39 = vpop.f32.mrb[17].mxu1 }
 0x262   :  { %v3005_v41 = vadd.f32 %v3004_v39, %v3003_v51 }
 0x264   :  { %v3006_v54 = vpop.f32.mrb[18].mxu1 }
 0x265   :  { %v3007_v58 = vpop.f32.mrb[19].mxu1 }
 0x266   :  { %v3008_v55 = vadd.f32 %v3007_v58, %v3006_v54 }
 0x267   :  { %v2965_v40 = vpop.f32.mrb[16].mxu0 }
 0x268   :  { %v2966_v15 = vpop.f32.mrb[17].mxu0 }
 0x269   :  { %v2967_v56 = vadd.f32 %v2966_v15, %v2965_v40 }
 0x26b   :  { %v2175_v36 = vadd.f32 %v2967_v56, %v2030_v35  ;;  %v2968_v53 = vpop.f32.mrb[18].mxu0 }
 0x26c   :  { %v2969_v37 = vpop.f32.mrb[19].mxu0 }
 0x26d   :  { %v2970_v43 = vadd.f32 %v2969_v37, %v2968_v53  ;;  %v2292_v62 = vadd.f32 %v3005_v41, %v2175_v36 }
 0x26f   :  { %v2184_v31 = vadd.f32 %v2970_v43, %v2037_v8 }
 0x271   :  { %v2303_v32 = vadd.f32 %v3008_v55, %v2184_v31 }
 0x280   :  { %v3079_v28 = vpop.f32.mrb[20].mxu1 }
 0x281   :  { %v3080_v45 = vpop.f32.mrb[21].mxu1 }
 0x282   :  { %v3081_v12 = vadd.f32 %v3080_v45, %v3079_v28 }
 0x284   :  { %v3082_v2 = vpop.f32.mrb[22].mxu1 }
 0x285   :  { %v3083_v23 = vpop.f32.mrb[23].mxu1 }
 0x286   :  { %v3084_v11 = vadd.f32 %v3083_v23, %v3082_v2 }
 0x287   :  { %v3041_v50 = vpop.f32.mrb[20].mxu0 }
 0x288   :  { %v3042_v4 = vpop.f32.mrb[21].mxu0 }
 0x289   :  { %v3043_v16 = vadd.f32 %v3042_v4, %v3041_v50 }
 0x28b   :  { %v2471_v3 = vadd.f32 %v3043_v16, %v2292_v62  ;;  %v3044_v59 = vpop.f32.mrb[22].mxu0 }
 0x28c   :  { %v3045_v44 = vpop.f32.mrb[23].mxu0 }
 0x28d   :  { %v2582_v61 = vadd.f32 %v3081_v12, %v2471_v3  ;;  %v3046_v25 = vadd.f32 %v3045_v44, %v3044_v59 }
 0x28f   :  { %2592 = vst [vmem:[#allocation8] sm:$0xff] %v2582_v61  ;;  %v2478_v9 = vadd.f32 %v3046_v25, %v2303_v32 }
 0x291   :  { %v2589_v19 = vadd.f32 %v3084_v11, %v2478_v9 }
 0x293   :  { %2593 = vst [vmem:[#allocation8 + $0x8] sm:$0xff] %v2589_v19 }
 0x294   :  { %3554 = shalt.err (!%p3551_p6)
}
 0x295   :  { %s3555_s18 = scalar_lea.hbm %s5392_s3, 256 }
 0x296   :  { %p3556_p7 = scmp.ne.s32.totalorder %s5392_s3, %s3555_s18  ;;  %p3559_p8 = scmp.lt.u32.totalorder %s3555_s18, %s5392_s3 }
 0x298   :  { %p3561_p9 = pnand %p3559_p8, %p3556_p7 }
 0x29a   :  { %3564 = shalt.err (!%p3561_p9)
}
 0x29b   :  { %2605 = dma.vmem_to_hbm [thread:$0]  %s2600_s14, 256, %s5392_s3, [#allocation5], %s3572_s22, %s3572_s22, %s3573_s23  }
 0x29c   :  { %3569 = dma.done.wait [#allocation5], 256  }
 0x29d   :  { %3570 = vsyncadd [#allocation5], 4294967040 }
 0x29e   :  { %2609 = vsyncpa [#allocation4], 1 }
 0x29f   :  { %2610 = vsyncpa [#allocation7], 1 }
 0x2a0   :  { %2611 = vsyncpa [#allocation5], 1 }

</bundles_post_ra>
